<compile_context>
chip_gen: v6e
topology: v6e:2x2x1
jax: 0.10.0
libtpu: 0.0.40
codegen_flags: <defaults>
</compile_context>

<pallas_src>
import math
import functools

import jax
import jax.numpy as jnp
from jax.experimental import pallas as pl
from jax.experimental.pallas import tpu as pltpu


def _mha_kernel(q_ref, k_ref, v_ref, wqt_ref, bq_ref, wot_ref, bo_ref, o_ref,
                kh_s, vh_s, *, head_nums, d_k, seq_kv):
    """Grid step = (batch element, query tile).

    The K/V projection (with W_q, faithful to the reference) and head split are done
    only once per batch element (qi == 0) and cached in VMEM scratch across all query
    tiles of that batch element.
    """
    tq = q_ref.shape[1]
    d_model = q_ref.shape[2]
    cdt = wqt_ref.dtype                      # MXU operand dtype (f32 or bf16)

    wqt = wqt_ref[...]                       # (D, D), already W_q.T -> x @ wqt == x @ W_q.T
    bq = bq_ref[...]                         # (1, D) f32 (biases stay f32 in both paths)
    scale = 1.0 / math.sqrt(d_k)

    # ---- once per batch element: project K and V, split heads, cache in scratch ----
    @pl.when(pl.program_id(1) == 0)
    def _():
        kp = jnp.dot(k_ref[0], wqt, preferred_element_type=jnp.float32) + bq   # (S, D)
        vp = jnp.dot(v_ref[0], wqt, preferred_element_type=jnp.float32) + bq   # (S, D)
        # Head-split relayout also hoisted: once per batch element, not per query tile.
        kh_s[...] = kp.reshape(seq_kv, head_nums, d_k).swapaxes(0, 1).astype(kh_s.dtype)
        vh_s[...] = vp.reshape(seq_kv, head_nums, d_k).swapaxes(0, 1).astype(vh_s.dtype)

    # ---- per query tile ----
    # Q projection with 1/sqrt(d_k) folded in (cheaper than scaling the (TQ, S) scores).
    qp = (jnp.dot(q_ref[0], wqt, preferred_element_type=jnp.float32) + bq) * scale
    qh = qp.reshape(tq, head_nums, d_k).swapaxes(0, 1).astype(cdt)      # (H, TQ, dk)

    kh = kh_s[...]                                                       # (H, S, dk)
    vh = vh_s[...]                                                       # (H, S, dk)

    s = jnp.einsum("hqd,hkd->hqk", qh, kh,
                   preferred_element_type=jnp.float32)                   # (H, TQ, S) f32
    m = jnp.max(s, axis=-1, keepdims=True)
    e = jnp.exp(s - m)
    p = e * pl.reciprocal(jnp.sum(e, axis=-1, keepdims=True), approx=True)  # softmax(-1)

    ctx = jnp.einsum("hqk,hkd->hqd", p.astype(cdt), vh,
                     preferred_element_type=jnp.float32)                  # (H, TQ, dk)
    # transpose(1, 2).contiguous().view(bs, -1, d_model)
    ctx = ctx.swapaxes(0, 1).reshape(tq, d_model)                         # (TQ, D)

    out = jnp.dot(ctx.astype(cdt), wot_ref[...],
                  preferred_element_type=jnp.float32) + bo_ref[...]
    o_ref[0] = out.astype(o_ref.dtype)


def _vmem_limit_bytes():
    """Per-generation VMEM budget, leaving headroom for compiler scratch/semaphores."""
    try:
        cap = int(pltpu.get_tpu_info().vmem_capacity_bytes)
    except Exception:
        cap = 64 * 1024 * 1024           # conservative: v7x physical VMEM per core
    cap = min(cap, 128 * 1024 * 1024)
    return min(max(cap - 8 * 1024 * 1024, 32 * 1024 * 1024), 112 * 1024 * 1024)


def multi_head_atten(q, k, v, params, head_nums, *, use_bf16=True, q_tile=256):
    """Pallas implementation of MultiHeadAtten.forward(q, k, v)."""
    bs, seq, d_model = q.shape
    assert d_model % head_nums == 0
    d_k = d_model // head_nums

    cdt = jnp.bfloat16 if use_bf16 else jnp.float32
    out_dtype = q.dtype

    # Pre-transpose nn.Linear weights once host-side -> no (D, D) transpose per step.
    # NOTE: faithful to the PyTorch forward, W_q projects q, k AND v; W_k/W_v unused.
    wqt = params["W_q_w"].T.astype(cdt)                       # (D, D)
    wot = params["W_o_w"].T.astype(cdt)                       # (D, D)
    # Biases stay f32 (tiny; avoids a needless bf16 round-trip in the bf16 path).
    bq = params["W_q_b"].reshape(1, d_model).astype(jnp.float32)
    bo = params["W_o_b"].reshape(1, d_model).astype(jnp.float32)

    # No wrapper-side concat: K and V go in as separate operands (saves one full HBM
    # write + read of all K/V data).
    qc = q.astype(cdt)
    kc = k.astype(cdt)
    vc = v.astype(cdt)

    # Cap the query tile so the (H, TQ, S) f32 softmax intermediates (s, e, p) stay
    # within a few MiB of VMEM.
    tq = min(seq, q_tile)
    per_row_bytes = 3 * head_nums * seq * 4
    tq = min(tq, max(8, (6 * 1024 * 1024) // max(per_row_bytes, 1)))
    if tq != seq:
        tq = max(8, (tq // 8) * 8)       # keep the (8, 128) block constraint
    nq = pl.cdiv(seq, tq)

    kernel = functools.partial(_mha_kernel, head_nums=head_nums, d_k=d_k, seq_kv=seq)

    def build_and_call(single_buffer_weights):
        # Constant-index weight/bias blocks: DMA'd once for the whole grid; when
        # supported, single-buffered so only one VMEM copy of each (D, D) weight lives.
        w_kw = dict(pipeline_mode=pl.Buffered(1)) if single_buffer_weights else {}
        w_spec = pl.BlockSpec((d_model, d_model), lambda b, qi: (0, 0), **w_kw)
        vec_spec = pl.BlockSpec((1, d_model), lambda b, qi: (0, 0), **w_kw)

        q_spec = pl.BlockSpec((1, tq, d_model), lambda b, qi: (b, qi, 0))
        kv_spec = pl.BlockSpec((1, seq, d_model), lambda b, qi: (b, 0, 0))
        out_spec = pl.BlockSpec((1, tq, d_model), lambda b, qi: (b, qi, 0))

        return pl.pallas_call(
            kernel,
            out_shape=jax.ShapeDtypeStruct((bs, seq, d_model), out_dtype),
            grid_spec=pltpu.PrefetchScalarGridSpec(
                num_scalar_prefetch=0,
                grid=(bs, nq),
                in_specs=[q_spec, kv_spec, kv_spec, w_spec, vec_spec, w_spec, vec_spec],
                out_specs=out_spec,
                # Persistent per-batch-element cache of the projected, head-split K / V.
                scratch_shapes=[pltpu.VMEM((head_nums, seq, d_k), cdt),
                                pltpu.VMEM((head_nums, seq, d_k), cdt)],
            ),
            compiler_params=pltpu.CompilerParams(
                # Batch axis is independent ("parallel", megacore / v7x 2-TC split).
                # Query-tile axis is "arbitrary" because the K/V scratch is a
                # cross-iteration dependency along it.
                dimension_semantics=("parallel", "arbitrary"),
                vmem_limit_bytes=_vmem_limit_bytes(),
            ),
        )(qc, kc, vc, wqt, bq, wot, bo)

    try:
        return build_and_call(True)
    except Exception:
        # Fallback for environments without BlockSpec(pipeline_mode=pl.Buffered(1)):
        # identical kernel, default double-buffered weights.
        return build_and_call(False)


def _reference(q, k, v, params, head_nums):
    """Pure-JAX reference mirroring the PyTorch forward (W_q used for q, k and v)."""
    bs, seq, d_model = q.shape
    d_k = d_model // head_nums
    wq, bq = params["W_q_w"], params["W_q_b"]
    wo, bo = params["W_o_w"], params["W_o_b"]

    def proj(x):
        return x @ wq.T + bq

    def split(x):
        return x.reshape(bs, seq, head_nums, d_k).transpose(0, 2, 1, 3)

    qh, kh, vh = split(proj(q)), split(proj(k)), split(proj(v))
    scores = jnp.einsum("bhqd,bhkd->bhqk", qh, kh) / math.sqrt(d_k)
    p = jax.nn.softmax(scores, axis=-1)
    ctx = jnp.einsum("bhqk,bhkd->bhqd", p, vh)
    ctx = ctx.transpose(0, 2, 1, 3).reshape(bs, seq, d_model)
    return ctx @ wo.T + bo


if __name__ == "__main__":
    # Small shapes consistent with the module ((bs, max_len, d_model)).  d_model is a
    # multiple of 128 so output stores stay lane-dense; d_k=64 matches 768/12.
    bs, seq, d_model, head_nums = 2, 8, 256, 4

    key = jax.random.PRNGKey(0)
    keys = jax.random.split(key, 11)

    q = jax.random.normal(keys[0], (bs, seq, d_model), jnp.float32)
    k = jax.random.normal(keys[1], (bs, seq, d_model), jnp.float32)
    v = jax.random.normal(keys[2], (bs, seq, d_model), jnp.float32)

    # nn.Linear-style params: weight (out_features, in_features), bias (out_features,).
    s = 1.0 / math.sqrt(d_model)
    params = {
        "W_q_w": jax.random.uniform(keys[3], (d_model, d_model), jnp.float32, -s, s),
        "W_q_b": jax.random.uniform(keys[4], (d_model,), jnp.float32, -s, s),
        # W_k / W_v exist in __init__ but are unused by the reference forward pass.
        "W_k_w": jax.random.uniform(keys[5], (d_model, d_model), jnp.float32, -s, s),
        "W_k_b": jax.random.uniform(keys[6], (d_model,), jnp.float32, -s, s),
        "W_v_w": jax.random.uniform(keys[7], (d_model, d_model), jnp.float32, -s, s),
        "W_v_b": jax.random.uniform(keys[8], (d_model,), jnp.float32, -s, s),
        "W_o_w": jax.random.uniform(keys[9], (d_model, d_model), jnp.float32, -s, s),
        "W_o_b": jax.random.uniform(keys[10], (d_model,), jnp.float32, -s, s),
    }

    ref = _reference(q, k, v, params, head_nums)

    # f32 MXU path: tight-ish check (slack only for the approx softmax reciprocal).
    out = jax.block_until_ready(
        multi_head_atten(q, k, v, params, head_nums, use_bf16=False))
    assert out.shape == (bs, seq, d_model)
    assert jnp.allclose(out, ref, rtol=5e-3, atol=5e-3), "f32 kernel mismatch vs reference"

    # bf16 MXU-operand path (f32 accumulation, default): loose check.
    out_bf16 = jax.block_until_ready(
        multi_head_atten(q, k, v, params, head_nums, use_bf16=True))
    assert out_bf16.shape == (bs, seq, d_model)
    assert bool(jnp.all(jnp.isfinite(out_bf16)))
    assert jnp.allclose(out_bf16, ref, rtol=1e-1, atol=1e-1), "bf16 kernel mismatch vs reference"

    print("KERNEL_OK")
</pallas_src>

<mosaic_0001>
module attributes {stable_mosaic.version = 11 : i64} {
  func.func @_mha_kernel(%arg0: i32, %arg1: i32, %arg2: memref<1x8x256xf32, #tpu.memory_space<vmem>>, %arg3: memref<1x8x256xf32, #tpu.memory_space<vmem>>, %arg4: memref<1x8x256xf32, #tpu.memory_space<vmem>>, %arg5: memref<256x256xf32, #tpu.memory_space<vmem>>, %arg6: memref<1x256xf32, #tpu.memory_space<vmem>>, %arg7: memref<256x256xf32, #tpu.memory_space<vmem>>, %arg8: memref<1x256xf32, #tpu.memory_space<vmem>>, %arg9: memref<1x8x256xf32, #tpu.memory_space<vmem>>, %arg10: memref<4x8x64xf32, #tpu.memory_space<vmem>>, %arg11: memref<4x8x64xf32, #tpu.memory_space<vmem>>) attributes {dimension_semantics = [#tpu.dimension_semantics<parallel>, #tpu.dimension_semantics<arbitrary>], iteration_bounds = array<i64: 2, 1>, scalar_prefetch = 0 : i64, scratch_operands = 2 : i64, tpu.core_type = #tpu.core_type<tc>, window_params = [{transform_indices = @transform_0, window_bounds = array<i64: 1, 8, 256>}, {transform_indices = @transform_1, window_bounds = array<i64: 1, 8, 256>}, {transform_indices = @transform_2, window_bounds = array<i64: 1, 8, 256>}, {pipeline_mode = #tpu.pipeline_mode<synchronous>, transform_indices = @transform_3, window_bounds = array<i64: 256, 256>}, {pipeline_mode = #tpu.pipeline_mode<synchronous>, transform_indices = @transform_4, window_bounds = array<i64: 1, 256>}, {pipeline_mode = #tpu.pipeline_mode<synchronous>, transform_indices = @transform_5, window_bounds = array<i64: 256, 256>}, {pipeline_mode = #tpu.pipeline_mode<synchronous>, transform_indices = @transform_6, window_bounds = array<i64: 1, 256>}, {transform_indices = @transform_7, window_bounds = array<i64: 1, 8, 256>}]} {
    %c0 = arith.constant 0 : index
    %c0_0 = arith.constant 0 : index
    %0 = vector.load %arg5[%c0, %c0_0] : memref<256x256xf32, #tpu.memory_space<vmem>>, vector<256x256xf32>
    %c0_1 = arith.constant 0 : index
    %c0_2 = arith.constant 0 : index
    %1 = vector.load %arg6[%c0_1, %c0_2] : memref<1x256xf32, #tpu.memory_space<vmem>>, vector<1x256xf32>
    %c0_i32 = arith.constant 0 : i32
    %2 = arith.cmpi eq, %arg1, %c0_i32 : i32
    %3 = arith.extui %2 : i1 to i32
    %c0_i32_3 = arith.constant 0 : i32
    %4 = arith.cmpi ne, %3, %c0_i32_3 : i32
    scf.if %4 {
      %c0_26 = arith.constant 0 : index
      %c0_27 = arith.constant 0 : index
      %c0_28 = arith.constant 0 : index
      %38 = vector.load %arg3[%c0_26, %c0_27, %c0_28] : memref<1x8x256xf32, #tpu.memory_space<vmem>>, vector<1x8x256xf32>
      %39 = vector.shape_cast %38 : vector<1x8x256xf32> to vector<8x256xf32>
      %cst_29 = arith.constant dense<0.000000e+00> : vector<8x256xf32>
      %40 = tpu.matmul %39, %0, %cst_29 {dimension_numbers = #tpu.dot_dimension_numbers<[1], [0], [0], [1], [0, 0, 1, 1], [], []>} : vector<8x256xf32>, vector<256x256xf32>, vector<8x256xf32> -> vector<8x256xf32>
      %41 = vector.broadcast %1 : vector<1x256xf32> to vector<8x256xf32>
      %42 = arith.addf %40, %41 : vector<8x256xf32>
      %c0_30 = arith.constant 0 : index
      %c0_31 = arith.constant 0 : index
      %c0_32 = arith.constant 0 : index
      %43 = vector.load %arg4[%c0_30, %c0_31, %c0_32] : memref<1x8x256xf32, #tpu.memory_space<vmem>>, vector<1x8x256xf32>
      %44 = vector.shape_cast %43 : vector<1x8x256xf32> to vector<8x256xf32>
      %cst_33 = arith.constant dense<0.000000e+00> : vector<8x256xf32>
      %45 = tpu.matmul %44, %0, %cst_33 {dimension_numbers = #tpu.dot_dimension_numbers<[1], [0], [0], [1], [0, 0, 1, 1], [], []>} : vector<8x256xf32>, vector<256x256xf32>, vector<8x256xf32> -> vector<8x256xf32>
      %46 = vector.broadcast %1 : vector<1x256xf32> to vector<8x256xf32>
      %47 = arith.addf %45, %46 : vector<8x256xf32>
      %48 = vector.shape_cast %42 : vector<8x256xf32> to vector<8x4x64xf32>
      %49 = tpu.transpose %48, [1, 0, 2] : vector<8x4x64xf32> -> vector<4x8x64xf32>
      %c0_34 = arith.constant 0 : index
      %c0_35 = arith.constant 0 : index
      %c0_36 = arith.constant 0 : index
      %50 = vector.load %arg10[%c0_34, %c0_35, %c0_36] : memref<4x8x64xf32, #tpu.memory_space<vmem>>, vector<4x8x64xf32>
      tpu.vector_store %arg10[%c0_34, %c0_35, %c0_36], %49 {strides = array<i32>} : memref<4x8x64xf32, #tpu.memory_space<vmem>>, vector<4x8x64xf32>,
      %51 = vector.shape_cast %47 : vector<8x256xf32> to vector<8x4x64xf32>
      %52 = tpu.transpose %51, [1, 0, 2] : vector<8x4x64xf32> -> vector<4x8x64xf32>
      %c0_37 = arith.constant 0 : index
      %c0_38 = arith.constant 0 : index
      %c0_39 = arith.constant 0 : index
      %53 = vector.load %arg11[%c0_37, %c0_38, %c0_39] : memref<4x8x64xf32, #tpu.memory_space<vmem>>, vector<4x8x64xf32>
      tpu.vector_store %arg11[%c0_37, %c0_38, %c0_39], %52 {strides = array<i32>} : memref<4x8x64xf32, #tpu.memory_space<vmem>>, vector<4x8x64xf32>,
    } else {
    }
    %c0_4 = arith.constant 0 : index
    %c0_5 = arith.constant 0 : index
    %c0_6 = arith.constant 0 : index
    %5 = vector.load %arg2[%c0_4, %c0_5, %c0_6] : memref<1x8x256xf32, #tpu.memory_space<vmem>>, vector<1x8x256xf32>
    %6 = vector.shape_cast %5 : vector<1x8x256xf32> to vector<8x256xf32>
    %cst = arith.constant dense<0.000000e+00> : vector<8x256xf32>
    %7 = tpu.matmul %6, %0, %cst {dimension_numbers = #tpu.dot_dimension_numbers<[1], [0], [0], [1], [0, 0, 1, 1], [], []>} : vector<8x256xf32>, vector<256x256xf32>, vector<8x256xf32> -> vector<8x256xf32>
    %8 = vector.broadcast %1 : vector<1x256xf32> to vector<8x256xf32>
    %9 = arith.addf %7, %8 : vector<8x256xf32>
    %cst_7 = arith.constant 1.250000e-01 : f32
    %10 = vector.broadcast %cst_7 : f32 to vector<8x256xf32>
    %11 = arith.mulf %9, %10 : vector<8x256xf32>
    %12 = vector.shape_cast %11 : vector<8x256xf32> to vector<8x4x64xf32>
    %13 = tpu.transpose %12, [1, 0, 2] : vector<8x4x64xf32> -> vector<4x8x64xf32>
    %c0_8 = arith.constant 0 : index
    %c0_9 = arith.constant 0 : index
    %c0_10 = arith.constant 0 : index
    %14 = vector.load %arg10[%c0_8, %c0_9, %c0_10] : memref<4x8x64xf32, #tpu.memory_space<vmem>>, vector<4x8x64xf32>
    %c0_11 = arith.constant 0 : index
    %c0_12 = arith.constant 0 : index
    %c0_13 = arith.constant 0 : index
    %15 = vector.load %arg11[%c0_11, %c0_12, %c0_13] : memref<4x8x64xf32, #tpu.memory_space<vmem>>, vector<4x8x64xf32>
    "tpu.trace_start"() <{level = 10 : i32, message = "hqd,hkd->hqk"}> : () -> ()
    %cst_14 = arith.constant dense<0.000000e+00> : vector<4x8x8xf32>
    %16 = tpu.matmul %13, %14, %cst_14 {dimension_numbers = #tpu.dot_dimension_numbers<[2], [2], [1], [1], [0, 0, 0, 1, 1, 1], [0], [0]>} : vector<4x8x64xf32>, vector<4x8x64xf32>, vector<4x8x8xf32> -> vector<4x8x8xf32>
    "tpu.trace_stop"() : () -> ()
    %cst_15 = arith.constant dense<0xFF800000> : vector<4x8xf32>
    %17 = vector.multi_reduction <maximumf>, %16, %cst_15 [2] : vector<4x8x8xf32> to vector<4x8xf32>
    %18 = vector.shape_cast %17 : vector<4x8xf32> to vector<4x8x1xf32>
    %19 = vector.broadcast %18 : vector<4x8x1xf32> to vector<4x8x8xf32>
    %20 = arith.subf %16, %19 : vector<4x8x8xf32>
    %21 = math.exp %20 : vector<4x8x8xf32>
    %cst_16 = arith.constant dense<0.000000e+00> : vector<4x8xf32>
    %22 = vector.multi_reduction <add>, %21, %cst_16 [2] : vector<4x8x8xf32> to vector<4x8xf32>
    %23 = vector.shape_cast %22 : vector<4x8xf32> to vector<4x8x1xf32>
    %24 = tpu.reciprocal %23 {approx = true} : vector<4x8x1xf32> -> vector<4x8x1xf32>
    %25 = vector.broadcast %24 : vector<4x8x1xf32> to vector<4x8x8xf32>
    %26 = arith.mulf %21, %25 : vector<4x8x8xf32>
    "tpu.trace_start"() <{level = 10 : i32, message = "hqk,hkd->hqd"}> : () -> ()
    %cst_17 = arith.constant dense<0.000000e+00> : vector<4x8x64xf32>
    %27 = tpu.matmul %26, %15, %cst_17 {dimension_numbers = #tpu.dot_dimension_numbers<[2], [1], [1], [2], [0, 0, 0, 1, 1, 2], [0], [0]>} : vector<4x8x8xf32>, vector<4x8x64xf32>, vector<4x8x64xf32> -> vector<4x8x64xf32>
    "tpu.trace_stop"() : () -> ()
    %28 = tpu.transpose %27, [1, 0, 2] : vector<4x8x64xf32> -> vector<8x4x64xf32>
    %29 = vector.shape_cast %28 : vector<8x4x64xf32> to vector<8x256xf32>
    %c0_18 = arith.constant 0 : index
    %c0_19 = arith.constant 0 : index
    %30 = vector.load %arg7[%c0_18, %c0_19] : memref<256x256xf32, #tpu.memory_space<vmem>>, vector<256x256xf32>
    %cst_20 = arith.constant dense<0.000000e+00> : vector<8x256xf32>
    %31 = tpu.matmul %29, %30, %cst_20 {dimension_numbers = #tpu.dot_dimension_numbers<[1], [0], [0], [1], [0, 0, 1, 1], [], []>} : vector<8x256xf32>, vector<256x256xf32>, vector<8x256xf32> -> vector<8x256xf32>
    %c0_21 = arith.constant 0 : index
    %c0_22 = arith.constant 0 : index
    %32 = vector.load %arg8[%c0_21, %c0_22] : memref<1x256xf32, #tpu.memory_space<vmem>>, vector<1x256xf32>
    %33 = vector.broadcast %32 : vector<1x256xf32> to vector<8x256xf32>
    %34 = arith.addf %31, %33 : vector<8x256xf32>
    %c0_23 = arith.constant 0 : index
    %c0_24 = arith.constant 0 : index
    %c0_25 = arith.constant 0 : index
    %35 = vector.load %arg9[%c0_23, %c0_24, %c0_25] : memref<1x8x256xf32, #tpu.memory_space<vmem>>, vector<1x8x256xf32>
    %36 = vector.shape_cast %35 : vector<1x8x256xf32> to vector<8x256xf32>
    %37 = vector.shape_cast %34 : vector<8x256xf32> to vector<1x8x256xf32>
    tpu.vector_store %arg9[%c0_23, %c0_24, %c0_25], %37 {strides = array<i32>} : memref<1x8x256xf32, #tpu.memory_space<vmem>>, vector<1x8x256xf32>,
    return
  }
  func.func @transform_0(%arg0: i32, %arg1: i32) -> (i32, i32, i32) {
    %c0_i32 = arith.constant 0 : i32
    %c0_i32_0 = arith.constant 0 : i32
    return %arg0, %arg1, %c0_i32 : i32, i32, i32
  }
  func.func @transform_1(%arg0: i32, %arg1: i32) -> (i32, i32, i32) {
    %c0_i32 = arith.constant 0 : i32
    %c0_i32_0 = arith.constant 0 : i32
    %c0_i32_1 = arith.constant 0 : i32
    return %arg0, %c0_i32, %c0_i32_0 : i32, i32, i32
  }
  func.func @transform_2(%arg0: i32, %arg1: i32) -> (i32, i32, i32) {
    %c0_i32 = arith.constant 0 : i32
    %c0_i32_0 = arith.constant 0 : i32
    %c0_i32_1 = arith.constant 0 : i32
    return %arg0, %c0_i32, %c0_i32_0 : i32, i32, i32
  }
  func.func @transform_3(%arg0: i32, %arg1: i32) -> (i32, i32) {
    %c0_i32 = arith.constant 0 : i32
    %c0_i32_0 = arith.constant 0 : i32
    %c0_i32_1 = arith.constant 0 : i32
    return %c0_i32, %c0_i32_0 : i32, i32
  }
  func.func @transform_4(%arg0: i32, %arg1: i32) -> (i32, i32) {
    %c0_i32 = arith.constant 0 : i32
    %c0_i32_0 = arith.constant 0 : i32
    %c0_i32_1 = arith.constant 0 : i32
    return %c0_i32, %c0_i32_0 : i32, i32
  }
  func.func @transform_5(%arg0: i32, %arg1: i32) -> (i32, i32) {
    %c0_i32 = arith.constant 0 : i32
    %c0_i32_0 = arith.constant 0 : i32
    %c0_i32_1 = arith.constant 0 : i32
    return %c0_i32, %c0_i32_0 : i32, i32
  }
  func.func @transform_6(%arg0: i32, %arg1: i32) -> (i32, i32) {
    %c0_i32 = arith.constant 0 : i32
    %c0_i32_0 = arith.constant 0 : i32
    %c0_i32_1 = arith.constant 0 : i32
    return %c0_i32, %c0_i32_0 : i32, i32
  }
  func.func @transform_7(%arg0: i32, %arg1: i32) -> (i32, i32, i32) {
    %c0_i32 = arith.constant 0 : i32
    %c0_i32_0 = arith.constant 0 : i32
    return %arg0, %arg1, %c0_i32 : i32, i32, i32
  }
}

module attributes {stable_mosaic.version = 11 : i64} {
  func.func @_mha_kernel(%arg0: i32, %arg1: i32, %arg2: memref<1x8x256xf32, #tpu.memory_space<vmem>>, %arg3: memref<1x8x256xf32, #tpu.memory_space<vmem>>, %arg4: memref<1x8x256xf32, #tpu.memory_space<vmem>>, %arg5: memref<256x256xf32, #tpu.memory_space<vmem>>, %arg6: memref<1x256xf32, #tpu.memory_space<vmem>>, %arg7: memref<256x256xf32, #tpu.memory_space<vmem>>, %arg8: memref<1x256xf32, #tpu.memory_space<vmem>>, %arg9: memref<1x8x256xf32, #tpu.memory_space<vmem>>, %arg10: memref<4x8x64xf32, #tpu.memory_space<vmem>>, %arg11: memref<4x8x64xf32, #tpu.memory_space<vmem>>) attributes {dimension_semantics = [#tpu.dimension_semantics<parallel>, #tpu.dimension_semantics<arbitrary>], iteration_bounds = array<i64: 2, 1>, scalar_prefetch = 0 : i64, scratch_operands = 2 : i64, tpu.core_type = #tpu.core_type<tc>, window_params = [{transform_indices = @transform_0, window_bounds = array<i64: 1, 8, 256>}, {transform_indices = @transform_1, window_bounds = array<i64: 1, 8, 256>}, {transform_indices = @transform_2, window_bounds = array<i64: 1, 8, 256>}, {pipeline_mode = #tpu.pipeline_mode<synchronous>, transform_indices = @transform_3, window_bounds = array<i64: 256, 256>}, {pipeline_mode = #tpu.pipeline_mode<synchronous>, transform_indices = @transform_4, window_bounds = array<i64: 1, 256>}, {pipeline_mode = #tpu.pipeline_mode<synchronous>, transform_indices = @transform_5, window_bounds = array<i64: 256, 256>}, {pipeline_mode = #tpu.pipeline_mode<synchronous>, transform_indices = @transform_6, window_bounds = array<i64: 1, 256>}, {transform_indices = @transform_7, window_bounds = array<i64: 1, 8, 256>}]} {
    %c0 = arith.constant 0 : index
    %c0_0 = arith.constant 0 : index
    %0 = vector.load %arg5[%c0, %c0_0] : memref<256x256xf32, #tpu.memory_space<vmem>>, vector<256x256xf32>
    %c0_1 = arith.constant 0 : index
    %c0_2 = arith.constant 0 : index
    %1 = vector.load %arg6[%c0_1, %c0_2] : memref<1x256xf32, #tpu.memory_space<vmem>>, vector<1x256xf32>
    %c0_i32 = arith.constant 0 : i32
    %2 = arith.cmpi eq, %arg1, %c0_i32 : i32
    %3 = arith.extui %2 : i1 to i32
    %c0_i32_3 = arith.constant 0 : i32
    %4 = arith.cmpi ne, %3, %c0_i32_3 : i32
    scf.if %4 {
      %c0_26 = arith.constant 0 : index
      %c0_27 = arith.constant 0 : index
      %c0_28 = arith.constant 0 : index
      %38 = vector.load %arg3[%c0_26, %c0_27, %c0_28] : memref<1x8x256xf32, #tpu.memory_space<vmem>>, vector<1x8x256xf32>
      %39 = vector.shape_cast %38 : vector<1x8x256xf32> to vector<8x256xf32>
      %cst_29 = arith.constant dense<0.000000e+00> : vector<8x256xf32>
      %40 = tpu.matmul %39, %0, %cst_29 {dimension_numbers = #tpu.dot_dimension_numbers<[1], [0], [0], [1], [0, 0, 1, 1], [], []>} : vector<8x256xf32>, vector<256x256xf32>, vector<8x256xf32> -> vector<8x256xf32>
      %41 = vector.broadcast %1 : vector<1x256xf32> to vector<8x256xf32>
      %42 = arith.addf %40, %41 : vector<8x256xf32>
      %c0_30 = arith.constant 0 : index
      %c0_31 = arith.constant 0 : index
      %c0_32 = arith.constant 0 : index
      %43 = vector.load %arg4[%c0_30, %c0_31, %c0_32] : memref<1x8x256xf32, #tpu.memory_space<vmem>>, vector<1x8x256xf32>
      %44 = vector.shape_cast %43 : vector<1x8x256xf32> to vector<8x256xf32>
      %cst_33 = arith.constant dense<0.000000e+00> : vector<8x256xf32>
      %45 = tpu.matmul %44, %0, %cst_33 {dimension_numbers = #tpu.dot_dimension_numbers<[1], [0], [0], [1], [0, 0, 1, 1], [], []>} : vector<8x256xf32>, vector<256x256xf32>, vector<8x256xf32> -> vector<8x256xf32>
      %46 = vector.broadcast %1 : vector<1x256xf32> to vector<8x256xf32>
      %47 = arith.addf %45, %46 : vector<8x256xf32>
      %48 = vector.shape_cast %42 : vector<8x256xf32> to vector<8x4x64xf32>
      %49 = tpu.transpose %48, [1, 0, 2] : vector<8x4x64xf32> -> vector<4x8x64xf32>
      %c0_34 = arith.constant 0 : index
      %c0_35 = arith.constant 0 : index
      %c0_36 = arith.constant 0 : index
      %50 = vector.load %arg10[%c0_34, %c0_35, %c0_36] : memref<4x8x64xf32, #tpu.memory_space<vmem>>, vector<4x8x64xf32>
      tpu.vector_store %arg10[%c0_34, %c0_35, %c0_36], %49 {strides = array<i32>} : memref<4x8x64xf32, #tpu.memory_space<vmem>>, vector<4x8x64xf32>,
      %51 = vector.shape_cast %47 : vector<8x256xf32> to vector<8x4x64xf32>
      %52 = tpu.transpose %51, [1, 0, 2] : vector<8x4x64xf32> -> vector<4x8x64xf32>
      %c0_37 = arith.constant 0 : index
      %c0_38 = arith.constant 0 : index
      %c0_39 = arith.constant 0 : index
      %53 = vector.load %arg11[%c0_37, %c0_38, %c0_39] : memref<4x8x64xf32, #tpu.memory_space<vmem>>, vector<4x8x64xf32>
      tpu.vector_store %arg11[%c0_37, %c0_38, %c0_39], %52 {strides = array<i32>} : memref<4x8x64xf32, #tpu.memory_space<vmem>>, vector<4x8x64xf32>,
    } else {
    }
    %c0_4 = arith.constant 0 : index
    %c0_5 = arith.constant 0 : index
    %c0_6 = arith.constant 0 : index
    %5 = vector.load %arg2[%c0_4, %c0_5, %c0_6] : memref<1x8x256xf32, #tpu.memory_space<vmem>>, vector<1x8x256xf32>
    %6 = vector.shape_cast %5 : vector<1x8x256xf32> to vector<8x256xf32>
    %cst = arith.constant dense<0.000000e+00> : vector<8x256xf32>
    %7 = tpu.matmul %6, %0, %cst {dimension_numbers = #tpu.dot_dimension_numbers<[1], [0], [0], [1], [0, 0, 1, 1], [], []>} : vector<8x256xf32>, vector<256x256xf32>, vector<8x256xf32> -> vector<8x256xf32>
    %8 = vector.broadcast %1 : vector<1x256xf32> to vector<8x256xf32>
    %9 = arith.addf %7, %8 : vector<8x256xf32>
    %cst_7 = arith.constant 1.250000e-01 : f32
    %10 = vector.broadcast %cst_7 : f32 to vector<8x256xf32>
    %11 = arith.mulf %9, %10 : vector<8x256xf32>
    %12 = vector.shape_cast %11 : vector<8x256xf32> to vector<8x4x64xf32>
    %13 = tpu.transpose %12, [1, 0, 2] : vector<8x4x64xf32> -> vector<4x8x64xf32>
    %c0_8 = arith.constant 0 : index
    %c0_9 = arith.constant 0 : index
    %c0_10 = arith.constant 0 : index
    %14 = vector.load %arg10[%c0_8, %c0_9, %c0_10] : memref<4x8x64xf32, #tpu.memory_space<vmem>>, vector<4x8x64xf32>
    %c0_11 = arith.constant 0 : index
    %c0_12 = arith.constant 0 : index
    %c0_13 = arith.constant 0 : index
    %15 = vector.load %arg11[%c0_11, %c0_12, %c0_13] : memref<4x8x64xf32, #tpu.memory_space<vmem>>, vector<4x8x64xf32>
    "tpu.trace_start"() <{level = 10 : i32, message = "hqd,hkd->hqk"}> : () -> ()
    %cst_14 = arith.constant dense<0.000000e+00> : vector<4x8x8xf32>
    %16 = tpu.matmul %13, %14, %cst_14 {dimension_numbers = #tpu.dot_dimension_numbers<[2], [2], [1], [1], [0, 0, 0, 1, 1, 1], [0], [0]>} : vector<4x8x64xf32>, vector<4x8x64xf32>, vector<4x8x8xf32> -> vector<4x8x8xf32>
    "tpu.trace_stop"() : () -> ()
    %cst_15 = arith.constant dense<0xFF800000> : vector<4x8xf32>
    %17 = vector.multi_reduction <maximumf>, %16, %cst_15 [2] : vector<4x8x8xf32> to vector<4x8xf32>
    %18 = vector.shape_cast %17 : vector<4x8xf32> to vector<4x8x1xf32>
    %19 = vector.broadcast %18 : vector<4x8x1xf32> to vector<4x8x8xf32>
    %20 = arith.subf %16, %19 : vector<4x8x8xf32>
    %21 = math.exp %20 : vector<4x8x8xf32>
    %cst_16 = arith.constant dense<0.000000e+00> : vector<4x8xf32>
    %22 = vector.multi_reduction <add>, %21, %cst_16 [2] : vector<4x8x8xf32> to vector<4x8xf32>
    %23 = vector.shape_cast %22 : vector<4x8xf32> to vector<4x8x1xf32>
    %24 = tpu.reciprocal %23 {approx = true} : vector<4x8x1xf32> -> vector<4x8x1xf32>
    %25 = vector.broadcast %24 : vector<4x8x1xf32> to vector<4x8x8xf32>
    %26 = arith.mulf %21, %25 : vector<4x8x8xf32>
    "tpu.trace_start"() <{level = 10 : i32, message = "hqk,hkd->hqd"}> : () -> ()
    %cst_17 = arith.constant dense<0.000000e+00> : vector<4x8x64xf32>
    %27 = tpu.matmul %26, %15, %cst_17 {dimension_numbers = #tpu.dot_dimension_numbers<[2], [1], [1], [2], [0, 0, 0, 1, 1, 2], [0], [0]>} : vector<4x8x8xf32>, vector<4x8x64xf32>, vector<4x8x64xf32> -> vector<4x8x64xf32>
    "tpu.trace_stop"() : () -> ()
    %28 = tpu.transpose %27, [1, 0, 2] : vector<4x8x64xf32> -> vector<8x4x64xf32>
    %29 = vector.shape_cast %28 : vector<8x4x64xf32> to vector<8x256xf32>
    %c0_18 = arith.constant 0 : index
    %c0_19 = arith.constant 0 : index
    %30 = vector.load %arg7[%c0_18, %c0_19] : memref<256x256xf32, #tpu.memory_space<vmem>>, vector<256x256xf32>
    %cst_20 = arith.constant dense<0.000000e+00> : vector<8x256xf32>
    %31 = tpu.matmul %29, %30, %cst_20 {dimension_numbers = #tpu.dot_dimension_numbers<[1], [0], [0], [1], [0, 0, 1, 1], [], []>} : vector<8x256xf32>, vector<256x256xf32>, vector<8x256xf32> -> vector<8x256xf32>
    %c0_21 = arith.constant 0 : index
    %c0_22 = arith.constant 0 : index
    %32 = vector.load %arg8[%c0_21, %c0_22] : memref<1x256xf32, #tpu.memory_space<vmem>>, vector<1x256xf32>
    %33 = vector.broadcast %32 : vector<1x256xf32> to vector<8x256xf32>
    %34 = arith.addf %31, %33 : vector<8x256xf32>
    %c0_23 = arith.constant 0 : index
    %c0_24 = arith.constant 0 : index
    %c0_25 = arith.constant 0 : index
    %35 = vector.load %arg9[%c0_23, %c0_24, %c0_25] : memref<1x8x256xf32, #tpu.memory_space<vmem>>, vector<1x8x256xf32>
    %36 = vector.shape_cast %35 : vector<1x8x256xf32> to vector<8x256xf32>
    %37 = vector.shape_cast %34 : vector<8x256xf32> to vector<1x8x256xf32>
    tpu.vector_store %arg9[%c0_23, %c0_24, %c0_25], %37 {strides = array<i32>} : memref<1x8x256xf32, #tpu.memory_space<vmem>>, vector<1x8x256xf32>,
    return
  }
  func.func @transform_0(%arg0: i32, %arg1: i32) -> (i32, i32, i32) {
    %c0_i32 = arith.constant 0 : i32
    %c0_i32_0 = arith.constant 0 : i32
    return %arg0, %arg1, %c0_i32 : i32, i32, i32
  }
  func.func @transform_1(%arg0: i32, %arg1: i32) -> (i32, i32, i32) {
    %c0_i32 = arith.constant 0 : i32
    %c0_i32_0 = arith.constant 0 : i32
    %c0_i32_1 = arith.constant 0 : i32
    return %arg0, %c0_i32, %c0_i32_0 : i32, i32, i32
  }
  func.func @transform_2(%arg0: i32, %arg1: i32) -> (i32, i32, i32) {
    %c0_i32 = arith.constant 0 : i32
    %c0_i32_0 = arith.constant 0 : i32
    %c0_i32_1 = arith.constant 0 : i32
    return %arg0, %c0_i32, %c0_i32_0 : i32, i32, i32
  }
  func.func @transform_3(%arg0: i32, %arg1: i32) -> (i32, i32) {
    %c0_i32 = arith.constant 0 : i32
    %c0_i32_0 = arith.constant 0 : i32
    %c0_i32_1 = arith.constant 0 : i32
    return %c0_i32, %c0_i32_0 : i32, i32
  }
  func.func @transform_4(%arg0: i32, %arg1: i32) -> (i32, i32) {
    %c0_i32 = arith.constant 0 : i32
    %c0_i32_0 = arith.constant 0 : i32
    %c0_i32_1 = arith.constant 0 : i32
    return %c0_i32, %c0_i32_0 : i32, i32
  }
  func.func @transform_5(%arg0: i32, %arg1: i32) -> (i32, i32) {
    %c0_i32 = arith.constant 0 : i32
    %c0_i32_0 = arith.constant 0 : i32
    %c0_i32_1 = arith.constant 0 : i32
    return %c0_i32, %c0_i32_0 : i32, i32
  }
  func.func @transform_6(%arg0: i32, %arg1: i32) -> (i32, i32) {
    %c0_i32 = arith.constant 0 : i32
    %c0_i32_0 = arith.constant 0 : i32
    %c0_i32_1 = arith.constant 0 : i32
    return %c0_i32, %c0_i32_0 : i32, i32
  }
  func.func @transform_7(%arg0: i32, %arg1: i32) -> (i32, i32, i32) {
    %c0_i32 = arith.constant 0 : i32
    %c0_i32_0 = arith.constant 0 : i32
    return %arg0, %arg1, %c0_i32 : i32, i32, i32
  }
}

</mosaic_0001>

<bundles_post_ra>
// kernel: tpu_custom_call.1
= control target key start
LH: loop header
LB: loop body
LE: loop exit
PB: predicated region body
PF: predicated region fallthrough
CT: control target
= control target key end

     0   :  { %s3518_s0 = inlined_call_operand.hbm [shape: f32[2,8,256], index: 0, kind: input, shape index: {}]   ;;  %s3519_s1 = inlined_call_operand.hbm [shape: f32[2,8,256], index: 1, kind: input, shape index: {}]   ;;  %s3520_s2 = inlined_call_operand.hbm [shape: f32[2,8,256], index: 2, kind: input, shape index: {}]   ;;  %s3521_s3 = inlined_call_operand.hbm [shape: f32[256,256], index: 3, kind: input, shape index: {}]   ;;  %s3522_s4 = inlined_call_operand.vmem [shape: f32[1,256], index: 4, kind: input, shape index: {}]   ;;  %s3523_s5 = inlined_call_operand.hbm [shape: f32[256,256], index: 5, kind: input, shape index: {}]   ;;  %s3524_s6 = inlined_call_operand.vmem [shape: f32[1,256], index: 6, kind: input, shape index: {}]   ;;  %s3525_s7 = inlined_call_operand.hbm [shape: f32[2,8,256], index: 7, kind: output, shape index: {}]  }
   0x1   :  { %3544 = sst [smem:[#allocation26_spill]] %s3519_s1 }
   0x2   :  { %3545 = sst [smem:[#allocation27_spill]] %s3521_s3 }
   0x3   :  { %3546 = sst [smem:[#allocation28_spill]] %s3525_s7 }
   0x4   :  { %12 = vsyncpa [#allocation5], 0 }
   0x5   :  { %14 = vsyncpa [#allocation5 + $0x1], 0 }
   0x6   :  { %15 = vsyncpa [#allocation8], 0 }
   0x7   :  { %17 = vsyncpa [#allocation8 + $0x1], 0 }
   0x8   :  { %18 = vsyncpa [#allocation11], 0 }
   0x9   :  { %19 = vsyncpa [#allocation6], 0 }
   0xa   :  { %21 = vsyncpa [#allocation6 + $0x1], 0  ;;  %s2783_s24 = smov 0   ;;  %s2785_s25 = smov 0  }
   0xb   :  { %s2787_s26 = smov 0   ;;  %s2789_s27 = smov 0  }
   0xc   :  { %s2791_s28 = smov 0   ;;  %s2793_s29 = smov 0  }
   0xd LB: > { %3547 = sst [smem:[#allocation18_spill]] %s2708_s24  ;;  %s2814_s30 = sadd.s32 4294967295, %s2728_s29   ;;  %s2728_s29 = sphi %s2793_s29, %s27_s29   ;;  %s2724_s28 = sphi %s2791_s28, %s3585_s28   ;;  %s2720_s27 = sphi %s2789_s27, %s3584_s27   ;;  %s2716_s26 = sphi %s2787_s26, %s3588_s26   ;;  %s2712_s25 = sphi %s2785_s25, %s3587_s25   ;;  %s2708_s24 = sphi %s2783_s24, %s3586_s24  }
   0xe   : > { %3548 = sst [smem:[#allocation19_spill]] %s2724_s28  ;;  %s2277_s8 = sadd.s32 4294967294, %s2728_s29  }
   0xf   : > { %3549 = sst [smem:[#allocation20_spill]] %s2728_s29  ;;  %p61_p0 = scmp.ne.s32.totalorder %s2712_s25, %s2708_s24 }
  0x10   : > { %p3534_p1 = scmp.eq.s32.totalorder %s2814_s30, 0  ;;  %p229_p3 = scmp.eq.s32.totalorder %s2277_s8, 1 }
  0x11   : > { %p2278_p5 = scmp.ge.s32.totalorder %s2728_s29, 1  ;;  %p236_p7 = scmp.lt.s32.totalorder %s2728_s29, 3 }
  0x12   : > { %p2823_p4 = por %p3534_p1, %p61_p0  ;;  %p2828_p6 = por %p229_p3, %p61_p0 }
  0x13   : > { %p2833_p8 = pnand %p2278_p5, %p236_p7  ;;  %s2730_s12 = smov [#allocation10]  }
  0x14   : > { %s3550_s9 = scalar_select %p2823_p4, 1, 0 }
  0x15   : > { %s3551_s10 = scalar_select %p2828_p6, 1, 0 }
  0x16   : > { %s3553_s11 = scalar_select %p2833_p8, 1, 0 }
  0x17   : > { %3552 = sst [smem:[#allocation21_spill]] %s3551_s10  ;;  %s248_s13 = sshll.u32 %s2730_s12, 4  ;;  %s249_s13 = int_to_ptr.vmem [resolvable:$true] %s248_s13 }
  0x18   : > { %p2399_p9 = pneg %p2833_p8  ;;  %s39_s15 = sadd.s32 1, %s2724_s28 }
  0x19   : > { %s2515_s16 = scalar_lea.vmem %s249_s13, 8192  ;;  %p2523_p5 = scmp.lt.s32.totalorder %s249_s13, %s249_s13 }
  0x1a   : > { %p2842_p11 = pnand %p2399_p9, %p3534_p1  ;;  %p2516_p13 = scmp.ne.s32.totalorder %s249_s13, %s2515_s16 }
  0x1b   : > { %p2524_p7 = scmp.lt.s32.totalorder %s2515_s16, %s2515_s16 }
  0x1c   : > { %p3535_p12 = pneg %p2842_p11 }
  0x1d   : > { %p2525_p2 = por %p2524_p7, %p2523_p5 }
  0x1e   : > { %p2518_p0 = pnand %p2516_p13, %p3535_p12 }
  0x20   : > { %p2519_p3 = pneg %p2518_p0 }
  0x22   : > { %p2526_p10 = pnand %p2525_p2, %p2519_p3 }
  0x24   : > { %2529 = shalt.err (!%p2526_p10)
}
  0x25   : > { %s3526_s17 = smov 256   ;;  %s3527_s18 = smov 16  }
  0x26   : > { %s3555_s3 = sld [smem:[#allocation27_spill]]  ;;  %p41_p2 = scmp.ge.s32.totalorder %s39_s15, 2 }
  0x27   : > { %s48_s21 = sadd.s32 1, %s2716_s26  ;;  %p55_p9 = scmp.ne.s32.totalorder %s2716_s26, %s2712_s25 }
  0x28   : > { %p56_p10 = scmp.eq.s32.totalorder %s2728_s29, 0  ;;  %s3590_s15 = smov (%p41_p2, %s39_s15), 0 }
  0x29   : > { %3556 = sst [smem:[#allocation22_spill]] %s3590_s15  ;;  %p3557_p0 = scmp.eq.s32.totalorder %s2814_s30, 1 }
  0x2a   : > { %p57_p13 = por %p56_p10, %p55_p9  ;;  %s43_s23 = ssub.s32 %s2724_s28, %s3590_s15 }
  0x2b   : > { %p2868_p3 = por %p3557_p0, %p55_p9  ;;  %p2422_p5 = scmp.lt.s32.totalorder %s2728_s29, 2 }
  0x2c   : > { %2402 = dma.hbm_to_vmem [thread:$0]  (!%p2842_p11), %s3555_s3, 8192, %s249_s13, [#allocation11], %s3526_s17, %s3526_s17, %s3527_s18  }
  0x2d   : > { %s3558_s22 = scalar_select %p2868_p3, 1, 0 }
  0x2e   : > { %p46_p7 = scmp.eq.s32.totalorder %s43_s23, 0  ;;  %s3528_s8 = sand.u32 1, %s2716_s26  }
  0x2f   : > { %s2878_s12 = sshll.u32 %s3528_s8, 4  ;;  %s2881_s13 = sshll.u32 %s2724_s28, 8 }
  0x30   : > { %s2884_s16 = scalar_select %p46_p7, %s2716_s26, %s48_s21  }
  0x31   : > { %p2886_p2 = pnand %p2422_p5, %p57_p13  ;;  %s302_s20 = sand.u32 1, %s2728_s29  }
  0x32   : > { %3559 = sst [smem:[#allocation23_spill]] %s2884_s16  ;;  %s306_s3 = scalar_lea.vmem [#allocation7], %s2878_s12 }
  0x33   : > { %s3561_s1 = sld [smem:[#allocation26_spill]]  ;;  %s314_s8 = sshll.u32 %s306_s3, 4  ;;  %s315_s8 = int_to_ptr.vmem [resolvable:$true] %s314_s8 }
  0x34   : > { %s2733_s15 = smov [#allocation12]   ;;  %s2896_s10 = scalar_lea.sflag [#allocation8], %s302_s20 }
  0x35   : > { %s264_s28 = sshll.u32 %s2733_s15, 4  ;;  %p3536_p9 = pneg %p2886_p2  ;;  %s265_s28 = int_to_ptr.vmem [resolvable:$true] %s264_s28 }
  0x36   : > { %s2543_s21 = scalar_lea.vmem %s315_s8, 256  ;;  %s2734_s16 = smov [#allocation7]  }
  0x37   : > { %p2544_p10 = scmp.ne.s32.totalorder %s315_s8, %s2543_s21  ;;  %s2548_s29 = sshll.u32 %s2734_s16, 4  ;;  %s2549_s29 = int_to_ptr.vmem [resolvable:$false] %s2548_s29 }
  0x38   : > { %s2550_s17 = scalar_lea.vmem %s2549_s29, 512  ;;  %p2551_p5 = scmp.lt.s32.totalorder %s315_s8, %s2549_s29 }
  0x39   : > { %s312_s23 = scalar_lea.hbm %s3561_s1, %s2881_s13  ;;  %p2546_p13 = pnand %p2544_p10, %p3536_p9 }
  0x3a   : > { %p2552_p7 = scmp.lt.s32.totalorder %s2550_s17, %s2543_s21 }
  0x3b   : > { %p2547_p0 = pneg %p2546_p13 }
  0x3c   : > { %p2553_p1 = por %p2552_p7, %p2551_p5 }
  0x3e   : > { %p2554_p12 = pnand %p2553_p1, %p2547_p0 }
  0x40   : > { %2557 = shalt.err (!%p2554_p12)
}
  0x41   : > { %2412 = dma.hbm_to_vmem [thread:$0]  (!%p2886_p2), %s312_s23, 256, %s315_s8, %s2896_s10  }
  0x42   : > { %s2569_s3 = scalar_lea.vmem %s265_s28, 8192  ;;  %p3562_p10 = pneg %p2842_p11 }
  0x43   : > { %p2570_p6 = scmp.ne.s32.totalorder %s265_s28, %s2569_s3  ;;  %p2577_p3 = scmp.lt.s32.totalorder %s265_s28, %s265_s28 }
  0x44   : > { %p2578_p4 = scmp.lt.s32.totalorder %s2569_s3, %s2569_s3 }
  0x45   : > { %p2572_p13 = pnand %p2570_p6, %p3562_p10 }
  0x46   : > { %p2579_p8 = por %p2578_p4, %p2577_p3 }
  0x47   : > { %p2573_p9 = pneg %p2572_p13 }
  0x49   : > { %p2580_p5 = pnand %p2579_p8, %p2573_p9 }
  0x4b   : > { %2583 = shalt.err (!%p2580_p5)
}
  0x4c   : > { %s3563_s29 = smov 16   ;;  %s3564_s15 = smov 256  }
  0x4d   : > { %2405 = dma.hbm_to_vmem [thread:$0]  (!%p2842_p11), %s3523_s5, 8192, %s265_s28, [#allocation11], %s3564_s15, %s3564_s15, %s3563_s29  }
  0x4e   : > { %s293_s23 = scalar_lea.hbm %s3518_s0, %s2881_s13  ;;  %s285_s21 = scalar_lea.vmem [#allocation4], %s2878_s12 }
  0x4f   : > { %s295_s17 = sshll.u32 %s285_s21, 4  ;;  %s331_s1 = scalar_lea.hbm %s3520_s2, %s2881_s13  ;;  %s296_s17 = int_to_ptr.vmem [resolvable:$true] %s295_s17 }
  0x50   : > { %s3565_s24 = sand.u32 1, %s2716_s26   ;;  %s2597_s18 = scalar_lea.vmem %s296_s17, 256 }
  0x51   : > { %s282_s7 = scalar_lea.sflag [#allocation5], %s3565_s24  ;;  %p2598_p1 = scmp.ne.s32.totalorder %s296_s17, %s2597_s18 }
  0x52   : > { %p3566_p4 = pneg %p2886_p2  ;;  %s2735_s28 = smov [#allocation4]  }
  0x53   : > { %s2602_s29 = sshll.u32 %s2735_s28, 4  ;;  %s2603_s29 = int_to_ptr.vmem [resolvable:$false] %s2602_s29 }
  0x54   : > { %p2600_p6 = pnand %p2598_p1, %p3566_p4  ;;  %s2604_s15 = scalar_lea.vmem %s2603_s29, 512 }
  0x55   : > { %p2605_p11 = scmp.lt.s32.totalorder %s296_s17, %s2603_s29  ;;  %p2606_p12 = scmp.lt.s32.totalorder %s2604_s15, %s2597_s18 }
  0x56   : > { %p2601_p8 = pneg %p2600_p6 }
  0x57   : > { %p2607_p3 = por %p2606_p12, %p2605_p11 }
  0x59   : > { %p2608_p9 = pnand %p2607_p3, %p2601_p8 }
  0x5b   : > { %2611 = shalt.err (!%p2608_p9)
}
  0x5c   : > { %2409 = dma.hbm_to_vmem [thread:$0]  (!%p2886_p2), %s293_s23, 256, %s296_s17, %s282_s7  }
  0x5d   : > { %s325_s24 = scalar_lea.vmem [#allocation9], %s2878_s12  ;;  %p3567_p7 = pmov %p3566_p4 }
  0x5e   : > { %s333_s16 = sshll.u32 %s325_s24, 4  ;;  %s2736_s20 = smov [#allocation9]   ;;  %s334_s16 = int_to_ptr.vmem [resolvable:$true] %s333_s16 }
  0x5f   : > { %s2625_s8 = scalar_lea.vmem %s334_s16, 256  ;;  %s2630_s21 = sshll.u32 %s2736_s20, 4  ;;  %s2631_s21 = int_to_ptr.vmem [resolvable:$false] %s2630_s21 }
  0x60   : > { %p2626_p0 = scmp.ne.s32.totalorder %s334_s16, %s2625_s8  ;;  %s2632_s14 = scalar_lea.vmem %s2631_s21, 512 }
  0x61   : > { %p2633_p5 = scmp.lt.s32.totalorder %s334_s16, %s2631_s21  ;;  %p2634_p1 = scmp.lt.s32.totalorder %s2632_s14, %s2625_s8 }
  0x62   : > { %p2628_p10 = pnand %p2626_p0, %p3567_p7 }
  0x63   : > { %p2635_p4 = por %p2634_p1, %p2633_p5 }
  0x64   : > { %p2629_p13 = pneg %p2628_p10 }
  0x66   : > { %p2636_p6 = pnand %p2635_p4, %p2629_p13 }
  0x68   : > { %2639 = shalt.err (!%p2636_p6)
}
  0x69   : > { %2415 = dma.hbm_to_vmem [thread:$0]  (!%p2886_p2), %s331_s1, 256, %s334_s16, %s2896_s10  }
  0x6a   : > { %p3568_p8 = scmp.ne.s32.totalorder %s3553_s11, 0 }
  0x6c   : > { %342 = sbr.rel (%p3568_p8) target bundleno = 1646 (0x66e), region = 48 }
  0x71   : > { %s2948_s23 = sand.u32 1, %s2712_s25   ;;  %p3569_p11 = scmp.ne.s32.totalorder %s3550_s9, 0 }
  0x72   : > { %s2951_s17 = sshll.u32 %s2948_s23, 4  ;;  %s345_s19 = scalar_lea.sflag [#allocation5], %s2948_s23 }
  0x73   : > { %s348_s3 = scalar_lea.vmem [#allocation4], %s2951_s17 }
  0x74   : > { %2691 = dma.done.wait (%p3569_p11), %s345_s19, 256  }
  0x75   : > { %2693 = vsyncadd (%p3569_p11), %s345_s19, 4294967040  ;;  %s353_s1 = sand.u32 1, %s2814_s30   ;;  %s357_s11 = scalar_lea.vmem [#allocation7], %s2951_s17 }
  0x76   : > { %s354_s10 = scalar_lea.sflag [#allocation8], %s353_s1 }
  0x77   : > { %2695 = dma.done.wait (%p3569_p11), %s354_s10, 512  }
  0x78   : > { %2697 = vsyncadd (%p3569_p11), %s354_s10, 4294966784  ;;  %s366_s13 = scalar_lea.vmem [#allocation9], %s2951_s17  ;;  %p3570_p2 = scmp.eq.s32.totalorder %s2814_s30, 0 }
  0x7a   : > { %2699 = dma.done.wait (%p3570_p2), [#allocation11], 16384   ;;  %p3571_p12 = pmov %p3570_p2 }
  0x7b   : > { %v2970_v0 = vld [vmem:[#allocation10 + $0xf8] sm:$0xff]  ;;  %v2972_v1 = vld [vmem:[#allocation10 + $0xf0] sm:$0xff]  ;;  %v2974_v2 = vld [vmem:[#allocation10 + $0xe8] sm:$0xff]  ;;  %s2737_s18 = smov 64   ;;  %vm2739_vm0 = vmmov 0   ;;  %vm785_vm1 = vcmask 523264  }
  0x7c   : > { %2701 = vsyncadd (%p3571_p12), [#allocation11], 4294950912  ;;  %497 = vmatprep.subr.mxu0 %v2970_v0  ;;  %v2977_v3 = vld [vmem:[#allocation10 + $0xe0] sm:$0xff]  ;;  %570 = vmatprep.subr.mxu1 %v2970_v0  ;;  %v2981_v4 = vld [vmem:[#allocation10 + $0xd8] sm:$0xff]  ;;  %vm1481_vm2 = vcmask 64512   ;;  %s2326_s15 = sshll.u32 %s2720_s27, 8 }
  0x7d   : > { %498 = vmatpush1.msra.mxu0 %v2972_v1  ;;  %571 = vmatpush1.msra.mxu1 %v2972_v1  ;;  %v2985_v5 = vld [vmem:[#allocation10 + $0xd0] sm:$0xff]  ;;  %v2989_v6 = vld [vmem:[#allocation10 + $0xc8] sm:$0xff]  ;;  %v2993_v7 = vld [vmem:[#allocation10 + $0xc0] sm:$0xff]  ;;  %s414_s24 = scalar_lea.vmem [#allocation13], %s2951_s17  ;;  %s3576_s21 = sld [smem:[#allocation28_spill]] }
  0x7e   : > { %499 = vmatprep.subr.mxu0 %v2974_v2  ;;  %572 = vmatprep.subr.mxu1 %v2974_v2  ;;  %v2997_v8 = vld [vmem:[#allocation10 + $0xb8] sm:$0xff]  ;;  %v3001_v9 = vld [vmem:[#allocation10 + $0xb0] sm:$0xff]  ;;  %v3005_v10 = vld [vmem:[#allocation10 + $0xa8] sm:$0xff]  ;;  %s2130_s16 = sshll.u32 %s414_s24, 4  ;;  %s2114_s7 = scalar_lea.sflag [#allocation6], %s2948_s23  ;;  %s2131_s16 = int_to_ptr.vmem [resolvable:$true] %s2130_s16 }
  0x7f   : > { %500 = vmatpush1.msra.mxu0 %v2977_v3  ;;  %573 = vmatpush1.msra.mxu1 %v2977_v3  ;;  %v3009_v11 = vld [vmem:[#allocation10 + $0xa0] sm:$0xff]  ;;  %v3013_v12 = vld [vmem:[#allocation10 + $0x98] sm:$0xff]  ;;  %v3017_v13 = vld [vmem:[#allocation10 + $0x90] sm:$0xff]  ;;  %s2640_s12 = scalar_lea.vmem %s2131_s16, 256  ;;  %p3577_p9 = scmp.ne.s32.totalorder %s3558_s22, 0 }
  0x80   : > { %501 = vmatprep.subr.mxu0 %v2981_v4  ;;  %574 = vmatprep.subr.mxu1 %v2981_v4  ;;  %v3021_v14 = vld [vmem:[#allocation10 + $0x88] sm:$0xff]  ;;  %v3025_v15 = vld [vmem:[#allocation10 + $0x80] sm:$0xff]  ;;  %v3029_v16 = vld [vmem:[#allocation10 + $0x78] sm:$0xff]  ;;  %p2641_p3 = scmp.ne.s32.totalorder %s2131_s16, %s2640_s12  ;;  %s2742_s19 = smov [#allocation13]  }
  0x81   : > { %502 = vmatpush1.msra.mxu0 %v2985_v5  ;;  %575 = vmatpush1.msra.mxu1 %v2985_v5  ;;  %v3033_v17 = vld [vmem:[#allocation10 + $0x70] sm:$0xff]  ;;  %v3037_v18 = vld [vmem:[#allocation10 + $0x68] sm:$0xff]  ;;  %v3041_v19 = vld [vmem:[#allocation10 + $0x60] sm:$0xff]  ;;  %s2644_s27 = sshll.u32 %s2742_s19, 4  ;;  %s2645_s27 = int_to_ptr.vmem [resolvable:$false] %s2644_s27 }
  0x82   : > { %503 = vmatprep.subr.mxu0 %v2989_v6  ;;  %576 = vmatprep.subr.mxu1 %v2989_v6  ;;  %v3045_v20 = vld [vmem:[#allocation10 + $0x58] sm:$0xff]  ;;  %v3049_v21 = vld [vmem:[#allocation10 + $0x50] sm:$0xff]  ;;  %v3053_v22 = vld [vmem:[#allocation10 + $0x48] sm:$0xff]  ;;  %p2642_p0 = pnand %p2641_p3, %p3577_p9  ;;  %s2646_s17 = scalar_lea.vmem %s2645_s27, 512 }
  0x83   : > { %504 = vmatpush1.msra.mxu0 %v2993_v7  ;;  %577 = vmatpush1.msra.mxu1 %v2993_v7  ;;  %v3057_v23 = vld [vmem:[#allocation10 + $0x40] sm:$0xff]  ;;  %v485_v24 = vld [vmem:[%s357_s11 + $0x8] sm:$0xff]  ;;  %v3066_v26 = vld [vmem:[#allocation10 + $0x30] sm:$0xff]  ;;  %s2128_s14 = scalar_lea.hbm %s3576_s21, %s2326_s15  ;;  %p2647_p10 = scmp.lt.s32.totalorder %s2131_s16, %s2645_s27 }
  0x84   : > { %505 = vmatprep.subr.mxu0 %v2997_v8  ;;  %578 = vmatprep.subr.mxu1 %v2997_v8  ;;  %v3063_v25 = vld [vmem:[#allocation10 + $0x38] sm:$0xff]  ;;  %v3070_v27 = vld [vmem:[#allocation10 + $0x28] sm:$0xff]  ;;  %v3074_v28 = vld [vmem:[#allocation10 + $0x20] sm:$0xff]  ;;  %p2643_p7 = pneg %p2642_p0  ;;  %p2648_p13 = scmp.lt.s32.totalorder %s2646_s17, %s2640_s12 }
  0x85   : > { %506 = vmatpush1.msra.mxu0 %v3001_v9  ;;  %579 = vmatpush1.msra.mxu1 %v3001_v9  ;;  %v3078_v29 = vld [vmem:[#allocation10 + $0x18] sm:$0xff]  ;;  %v3082_v30 = vld [vmem:[#allocation10 + $0x10] sm:$0xff]  ;;  %v3086_v31 = vld [vmem:[#allocation10 + $0x8] sm:$0xff] }
  0x86   : > { %507 = vmatprep.subr.mxu0 %v3005_v10  ;;  %580 = vmatprep.subr.mxu1 %v3005_v10  ;;  %v3090_v32 = vld [vmem:[#allocation10] sm:$0xff]  ;;  %v3094_v33 = vld [vmem:[#allocation10 + $0x1f8] sm:$0xff]  ;;  %v3098_v34 = vld [vmem:[#allocation10 + $0x1f0] sm:$0xff]  ;;  %p2649_p5 = por %p2648_p13, %p2647_p10 }
  0x87   : > { %508 = vmatpush1.msra.mxu0 %v3009_v11  ;;  %581 = vmatpush1.msra.mxu1 %v3009_v11  ;;  %v3102_v35 = vld [vmem:[#allocation10 + $0x1e8] sm:$0xff]  ;;  %v3106_v36 = vld [vmem:[#allocation10 + $0x1e0] sm:$0xff]  ;;  %v3110_v37 = vld [vmem:[#allocation10 + $0x1d8] sm:$0xff] }
  0x88   : > { %509 = vmatprep.subr.mxu0 %v3013_v12  ;;  %582 = vmatprep.subr.mxu1 %v3013_v12  ;;  %v3114_v38 = vld [vmem:[#allocation10 + $0x1d0] sm:$0xff]  ;;  %v3118_v39 = vld [vmem:[#allocation10 + $0x1c8] sm:$0xff]  ;;  %v3122_v40 = vld [vmem:[#allocation10 + $0x1c0] sm:$0xff]  ;;  %p2650_p1 = pnand %p2649_p5, %p2643_p7 }
  0x89   : > { %510 = vmatpush1.msra.mxu0 %v3017_v13  ;;  %583 = vmatpush1.msra.mxu1 %v3017_v13  ;;  %v3126_v41 = vld [vmem:[#allocation10 + $0x1b8] sm:$0xff]  ;;  %v3130_v42 = vld [vmem:[#allocation10 + $0x1b0] sm:$0xff]  ;;  %v3134_v43 = vld [vmem:[#allocation10 + $0x1a8] sm:$0xff] }
  0x8a   : > { %511 = vmatprep.subr.mxu0 %v3021_v14  ;;  %584 = vmatprep.subr.mxu1 %v3021_v14  ;;  %v3138_v44 = vld [vmem:[#allocation10 + $0x1a0] sm:$0xff]  ;;  %v3142_v45 = vld [vmem:[#allocation10 + $0x198] sm:$0xff]  ;;  %v3146_v46 = vld [vmem:[#allocation10 + $0x190] sm:$0xff] }
  0x8b   : > { %512 = vmatpush1.msra.mxu0 %v3025_v15  ;;  %585 = vmatpush1.msra.mxu1 %v3025_v15  ;;  %v3150_v47 = vld [vmem:[#allocation10 + $0x188] sm:$0xff]  ;;  %v3154_v48 = vld [vmem:[#allocation10 + $0x180] sm:$0xff]  ;;  %v3158_v49 = vld [vmem:[#allocation10 + $0x178] sm:$0xff] }
  0x8c   : > { %513 = vmatprep.subr.mxu0 %v3029_v16  ;;  %586 = vmatprep.subr.mxu1 %v3029_v16  ;;  %v3162_v50 = vld [vmem:[#allocation10 + $0x170] sm:$0xff]  ;;  %v3166_v51 = vld [vmem:[#allocation10 + $0x168] sm:$0xff]  ;;  %v3170_v52 = vld [vmem:[#allocation10 + $0x160] sm:$0xff] }
  0x8d   : > { %514 = vmatpush1.msra.mxu0 %v3033_v17  ;;  %587 = vmatpush1.msra.mxu1 %v3033_v17  ;;  %v3174_v53 = vld [vmem:[#allocation10 + $0x158] sm:$0xff]  ;;  %v3178_v54 = vld [vmem:[#allocation10 + $0x150] sm:$0xff]  ;;  %v3182_v55 = vld [vmem:[#allocation10 + $0x148] sm:$0xff] }
  0x8e   : > { %515 = vmatprep.subr.mxu0 %v3037_v18  ;;  %588 = vmatprep.subr.mxu1 %v3037_v18  ;;  %v3186_v56 = vld [vmem:[#allocation10 + $0x140] sm:$0xff]  ;;  %v3190_v57 = vld [vmem:[#allocation10 + $0x138] sm:$0xff]  ;;  %v3194_v58 = vld [vmem:[#allocation10 + $0x130] sm:$0xff] }
  0x8f   : > { %516 = vmatpush1.msra.mxu0 %v3041_v19  ;;  %589 = vmatpush1.msra.mxu1 %v3041_v19  ;;  %3572 = vst [vmem:[#allocation24_spill] sm:$0xff] %v3190_v57  ;;  %3573 = vst [vmem:[#allocation25_spill] sm:$0xff] %v3194_v58  ;;  %v3198_v59 = vld [vmem:[#allocation10 + $0x128] sm:$0xff]  ;;  %v3202_v60 = vld [vmem:[#allocation10 + $0x120] sm:$0xff] }
  0x90   : > { %517 = vmatprep.subr.mxu0 %v3045_v20  ;;  %590 = vmatprep.subr.mxu1 %v3045_v20  ;;  %v3206_v61 = vld [vmem:[#allocation10 + $0x118] sm:$0xff]  ;;  %v3210_v62 = vld [vmem:[#allocation10 + $0x110] sm:$0xff]  ;;  %v3214_v63 = vld [vmem:[#allocation10 + $0x108] sm:$0xff] }
  0x91   : > { %518 = vmatpush1.msra.mxu0 %v3049_v21  ;;  %561 = vmatprep.mubr.f32.mxu0 %v485_v24  ;;  %v3218_v24 = vld [vmem:[#allocation10 + $0x100] sm:$0xff] }
  0x92   : > { %519 = vmatprep.subr.mxu0 %v3053_v22  ;;  %591 = vmatpush1.msra.mxu1 %v3049_v21 }
  0x93   : > { %520 = vmatpush1.msra.mxu0 %v3057_v23  ;;  %592 = vmatprep.subr.mxu1 %v3053_v22 }
  0x94   : > { %521 = vmatprep.subr.mxu0 %v3063_v25  ;;  %593 = vmatpush1.msra.mxu1 %v3057_v23 }
  0x95   : > { %522 = vmatpush1.msra.mxu0 %v3066_v26  ;;  %594 = vmatprep.subr.mxu1 %v3063_v25 }
  0x96   : > { %523 = vmatprep.subr.mxu0 %v3070_v27  ;;  %595 = vmatpush1.msra.mxu1 %v3066_v26 }
  0x97   : > { %524 = vmatpush1.msra.mxu0 %v3074_v28  ;;  %596 = vmatprep.subr.mxu1 %v3070_v27 }
  0x98   : > { %525 = vmatprep.subr.mxu0 %v3078_v29  ;;  %597 = vmatpush1.msra.mxu1 %v3074_v28 }
  0x99   : > { %526 = vmatpush1.msra.mxu0 %v3082_v30  ;;  %598 = vmatprep.subr.mxu1 %v3078_v29 }
  0x9a   : > { %527 = vmatprep.subr.mxu0 %v3086_v31  ;;  %599 = vmatpush1.msra.mxu1 %v3082_v30 }
  0x9b   : > { %528 = vmatpush1.msra.mxu0 %v3090_v32  ;;  %600 = vmatprep.subr.mxu1 %v3086_v31 }
  0x9c   : > { %529 = vmatprep.subr.mxu0 %v3094_v33  ;;  %601 = vmatpush1.msra.mxu1 %v3090_v32 }
  0x9d   : > { %530 = vmatpush2.msra.mxu0 %v3098_v34  ;;  %602 = vmatprep.subr.mxu1 %v3094_v33 }
  0x9e   : > { %531 = vmatprep.subr.mxu0 %v3102_v35  ;;  %603 = vmatpush2.msra.mxu1 %v3098_v34 }
  0x9f   : > { %532 = vmatpush2.msra.mxu0 %v3106_v36  ;;  %604 = vmatprep.subr.mxu1 %v3102_v35 }
  0xa0   : > { %533 = vmatprep.subr.mxu0 %v3110_v37  ;;  %605 = vmatpush2.msra.mxu1 %v3106_v36 }
  0xa1   : > { %534 = vmatpush2.msra.mxu0 %v3114_v38  ;;  %606 = vmatprep.subr.mxu1 %v3110_v37 }
  0xa2   : > { %535 = vmatprep.subr.mxu0 %v3118_v39  ;;  %607 = vmatpush2.msra.mxu1 %v3114_v38 }
  0xa3   : > { %536 = vmatpush2.msra.mxu0 %v3122_v40  ;;  %608 = vmatprep.subr.mxu1 %v3118_v39 }
  0xa4   : > { %537 = vmatprep.subr.mxu0 %v3126_v41  ;;  %609 = vmatpush2.msra.mxu1 %v3122_v40 }
  0xa5   : > { %538 = vmatpush2.msra.mxu0 %v3130_v42  ;;  %610 = vmatprep.subr.mxu1 %v3126_v41 }
  0xa6   : > { %539 = vmatprep.subr.mxu0 %v3134_v43  ;;  %611 = vmatpush2.msra.mxu1 %v3130_v42 }
  0xa7   : > { %540 = vmatpush2.msra.mxu0 %v3138_v44  ;;  %612 = vmatprep.subr.mxu1 %v3134_v43 }
  0xa8   : > { %541 = vmatprep.subr.mxu0 %v3142_v45  ;;  %613 = vmatpush2.msra.mxu1 %v3138_v44 }
  0xa9   : > { %542 = vmatpush2.msra.mxu0 %v3146_v46  ;;  %614 = vmatprep.subr.mxu1 %v3142_v45 }
  0xaa   : > { %543 = vmatprep.subr.mxu0 %v3150_v47  ;;  %615 = vmatpush2.msra.mxu1 %v3146_v46 }
  0xab   : > { %544 = vmatpush2.msra.mxu0 %v3154_v48  ;;  %616 = vmatprep.subr.mxu1 %v3150_v47 }
  0xac   : > { %545 = vmatprep.subr.mxu0 %v3158_v49  ;;  %617 = vmatpush2.msra.mxu1 %v3154_v48 }
  0xad   : > { %546 = vmatpush2.msra.mxu0 %v3162_v50  ;;  %618 = vmatprep.subr.mxu1 %v3158_v49 }
  0xae   : > { %547 = vmatprep.subr.mxu0 %v3166_v51  ;;  %619 = vmatpush2.msra.mxu1 %v3162_v50 }
  0xaf   : > { %548 = vmatpush2.msra.mxu0 %v3170_v52  ;;  %620 = vmatprep.subr.mxu1 %v3166_v51 }
  0xb0   : > { %549 = vmatprep.subr.mxu0 %v3174_v53  ;;  %621 = vmatpush2.msra.mxu1 %v3170_v52 }
  0xb1   : > { %550 = vmatpush2.msra.mxu0 %v3178_v54  ;;  %622 = vmatprep.subr.mxu1 %v3174_v53 }
  0xb2   : > { %551 = vmatprep.subr.mxu0 %v3182_v55  ;;  %623 = vmatpush2.msra.mxu1 %v3178_v54 }
  0xb3   : > { %552 = vmatpush2.msra.mxu0 %v3186_v56  ;;  %624 = vmatprep.subr.mxu1 %v3182_v55 }
  0xb4   : > { %553 = vmatprep.subr.mxu0 %v3190_v57  ;;  %625 = vmatpush2.msra.mxu1 %v3186_v56 }
  0xb5   : > { %554 = vmatpush2.msra.mxu0 %v3194_v58  ;;  %626 = vmatprep.subr.mxu1 %v3190_v57  ;;  %v484_v57 = vld [vmem:[%s357_s11] sm:$0xff] }
  0xb6   : > { %555 = vmatprep.subr.mxu0 %v3198_v59  ;;  %627 = vmatpush2.msra.mxu1 %v3194_v58  ;;  %v939_v58 = vld [vmem:[%s348_s3 + $0x8] sm:$0xff] }
  0xb7   : > { %556 = vmatpush2.msra.mxu0 %v3202_v60  ;;  %628 = vmatprep.subr.mxu1 %v3198_v59 }
  0xb8   : > { %557 = vmatprep.subr.mxu0 %v3206_v61  ;;  %629 = vmatpush2.msra.mxu1 %v3202_v60 }
  0xb9   : > { %558 = vmatpush2.msra.mxu0 %v3210_v62  ;;  %630 = vmatprep.subr.mxu1 %v3206_v61 }
  0xba   : > { %559 = vmatprep.subr.mxu0 %v3214_v63  ;;  %631 = vmatpush2.msra.mxu1 %v3210_v62 }
  0xbb   : > { %560 = vmatpush2.msra.mxu0 %v3218_v24  ;;  %632 = vmatprep.subr.mxu1 %v3214_v63 }
  0xbc   : > { %562 = vmatmul.mubr.f32.vlgmr.msra.gmra.mxu0 %v484_v57  ;;  %951 = vmatprep.subr.mxu0 %v2970_v0  ;;  %v3574_v0 = vld [vmem:[#allocation24_spill] sm:$0xff] }
  0xbd   : > { %952 = vmatpush1.msra.mxu0 %v2972_v1  ;;  %1015 = vmatprep.mubr.f32.mxu0 %v939_v58  ;;  %v3575_v1 = vld [vmem:[#allocation25_spill] sm:$0xff] }
  0xbe   : > { %953 = vmatprep.subr.mxu0 %v2974_v2  ;;  %633 = vmatpush2.msra.mxu1 %v3218_v24  ;;  %v938_v2 = vld [vmem:[%s348_s3] sm:$0xff] }
  0xbf   : > { %954 = vmatpush1.msra.mxu0 %v2977_v3  ;;  %v487_v3 = vlaneseq }
  0xc0   : > { %955 = vmatprep.subr.mxu0 %v2981_v4 }
  0xc1   : > { %956 = vmatpush1.msra.mxu0 %v2985_v5  ;;  %v3298_v4 = vshrl.u32 %v487_v3, 7 }
  0xc2   : > { %957 = vmatprep.subr.mxu0 %v2989_v6  ;;  %v479_v6 = vld [vmem:[%s3522_s4] sm:$0x3] }
  0xc3   : > { %958 = vmatpush1.msra.mxu0 %v2993_v7  ;;  %v489_v5 = vsub.s32 0, %v3298_v4  ;;  %v493_v7 = vsub.s32 1, %v3298_v4 }
  0xc4   : > { %959 = vmatprep.subr.mxu0 %v2997_v8 }
  0xc5   : > { %960 = vmatpush1.msra.mxu0 %v3001_v9  ;;  %v3307_v8 = vrot.slane %v479_v6, %v489_v5  ;;  %v3311_v9 = vrot.slane %v479_v6, %v493_v7 }
  0xc6   : > { %961 = vmatprep.subr.mxu0 %v3005_v10 }
  0xc7   : > { %962 = vmatpush1.msra.mxu0 %v3009_v11 }
  0xc8   : > { %963 = vmatprep.subr.mxu0 %v3013_v12 }
  0xc9   : > { %964 = vmatpush1.msra.mxu0 %v3017_v13 }
  0xca   : > { %965 = vmatprep.subr.mxu0 %v3021_v14 }
  0xcb   : > { %966 = vmatpush1.msra.mxu0 %v3025_v15 }
  0xcc   : > { %967 = vmatprep.subr.mxu0 %v3029_v16  ;;  %v2738_v16 = vmov 0.0  }
  0xcd   : > { %968 = vmatpush1.msra.mxu0 %v3033_v17  ;;  %2363 = vmatprep.subr.mxu1 %v2738_v16 }
  0xce   : > { %969 = vmatprep.subr.mxu0 %v3037_v18 }
  0xcf   : > { %970 = vmatpush1.msra.mxu0 %v3041_v19 }
  0xd0   : > { %971 = vmatprep.subr.mxu0 %v3045_v20 }
  0xd1   : > { %972 = vmatpush1.msra.mxu0 %v3049_v21 }
  0xd2   : > { %973 = vmatprep.subr.mxu0 %v3053_v22 }
  0xd3   : > { %974 = vmatpush1.msra.mxu0 %v3057_v23 }
  0xd4   : > { %975 = vmatprep.subr.mxu0 %v3063_v25 }
  0xd5   : > { %976 = vmatpush1.msra.mxu0 %v3066_v26  ;;  %v569_v26 = vld [vmem:[%s366_s13 + $0x8] sm:$0xff] }
  0xd6   : > { %977 = vmatprep.subr.mxu0 %v3070_v27  ;;  %v568_v27 = vld [vmem:[%s366_s13] sm:$0xff]  ;;  %634 = vmatprep.mubr.f32.mxu1 %v569_v26 }
  0xd7   : > { %978 = vmatpush1.msra.mxu0 %v3074_v28  ;;  %635 = vmatmul.mubr.f32.vlgmr.msra.gmra.mxu1 %v568_v27  ;;  %v2740_v28 = vmov 1983009808  }
  0xd8   : > { %979 = vmatprep.subr.mxu0 %v3078_v29  ;;  %2365 = vmatprep.mubr.msk.f32.mxu1 %vm2739_vm0, %v2738_v16  ;;  %v652_v29 = vunpack.c.l.s4 %v2740_v28 }
  0xd9   : > { %980 = vmatpush1.msra.mxu0 %v3082_v30  ;;  %v2741_v30 = vmov 1934713408  }
  0xda   : > { %981 = vmatprep.subr.mxu0 %v3086_v31  ;;  %v684_v31 = vunpack.c.l.s4 %v2741_v30 }
  0xdb   : > { %982 = vmatpush1.msra.mxu0 %v3090_v32  ;;  %v653_v32 = vunpack.c.0.s8 %v652_v29 }
  0xdc   : > { %983 = vmatprep.subr.mxu0 %v3094_v33 }
  0xdd   : > { %984 = vmatpush2.msra.mxu0 %v3098_v34  ;;  %v685_v34 = vunpack.c.0.s8 %v684_v31 }
  0xde   : > { %985 = vmatprep.subr.mxu0 %v3102_v35  ;;  %v3342_v35 = vsub.s32 %v653_v32, %v3298_v4 }
  0xdf   : > { %986 = vmatpush2.msra.mxu0 %v3106_v36 }
  0xe0   : > { %987 = vmatprep.subr.mxu0 %v3110_v37 }
  0xe1   : > { %988 = vmatpush2.msra.mxu0 %v3114_v38 }
  0xe2   : > { %989 = vmatprep.subr.mxu0 %v3118_v39  ;;  %v3345_v39 = vsub.s32 %v685_v34, %v3298_v4 }
  0xe3   : > { %990 = vmatpush2.msra.mxu0 %v3122_v40 }
  0xe4   : > { %991 = vmatprep.subr.mxu0 %v3126_v41 }
  0xe5   : > { %992 = vmatpush2.msra.mxu0 %v3130_v42 }
  0xe6   : > { %993 = vmatprep.subr.mxu0 %v3134_v43 }
  0xe7   : > { %994 = vmatpush2.msra.mxu0 %v3138_v44 }
  0xe8   : > { %995 = vmatprep.subr.mxu0 %v3142_v45 }
  0xe9   : > { %996 = vmatpush2.msra.mxu0 %v3146_v46 }
  0xea   : > { %997 = vmatprep.subr.mxu0 %v3150_v47 }
  0xeb   : > { %998 = vmatpush2.msra.mxu0 %v3154_v48 }
  0xec   : > { %999 = vmatprep.subr.mxu0 %v3158_v49 }
  0xed   : > { %1000 = vmatpush2.msra.mxu0 %v3162_v50 }
  0xee   : > { %1001 = vmatprep.subr.mxu0 %v3166_v51 }
  0xef   : > { %1002 = vmatpush2.msra.mxu0 %v3170_v52 }
  0xf0   : > { %1003 = vmatprep.subr.mxu0 %v3174_v53 }
  0xf1   : > { %1004 = vmatpush2.msra.mxu0 %v3178_v54 }
  0xf2   : > { %1005 = vmatprep.subr.mxu0 %v3182_v55 }
  0xf3   : > { %1006 = vmatpush2.msra.mxu0 %v3186_v56 }
  0xf4   : > { %1007 = vmatprep.subr.mxu0 %v3574_v0 }
  0xf5   : > { %1008 = vmatpush2.msra.mxu0 %v3575_v1 }
  0xf6   : > { %1009 = vmatprep.subr.mxu0 %v3198_v59 }
  0xf7   : > { %1010 = vmatpush2.msra.mxu0 %v3202_v60 }
  0xf8   : > { %1011 = vmatprep.subr.mxu0 %v3206_v61 }
  0xf9   : > { %1012 = vmatpush2.msra.mxu0 %v3210_v62 }
  0xfa   : > { %1013 = vmatprep.subr.mxu0 %v3214_v63 }
  0xfb   : > { %1014 = vmatpush2.msra.mxu0 %v3218_v24 }
  0xfc   : > { %1016 = vmatmul.mubr.f32.vlgmr.msra.gmra.mxu0 %v938_v2  ;;  %2343 = vmatprep.subr.mxu0 %v2738_v16 }
  0xfd   : > { %2345 = vmatprep.mubr.msk.f32.mxu0 %vm2739_vm0, %v2738_v16 }
 0x17c   : > { %v563_v10 = vpop.f32.mrf.mxu0 }
 0x17d   : > { %v564_v11 = vadd.f32 %v563_v10, %v3307_v8 }
 0x17e   : > { %v565_v12 = vpop.f32.mrf.mxu0 }
 0x17f   : > { %v566_v13 = vadd.f32 %v565_v12, %v3311_v9  ;;  %642 = vrot.lane.b32.xlu0 %v564_v11, %s2737_s18 }
 0x181   : > { %v649_v14 = vcombine.low %v564_v11, %v566_v13  ;;  %v650_v15 = vcombine.high %v564_v11, %v566_v13 }
 0x183   : > { %646 = vrot.lane.b32.xlu0 %v566_v13, %s2737_s18  ;;  %v657_v40 = vrot.slane %v649_v14, %v3342_v35  ;;  %v664_v41 = vrot.slane %v650_v15, %v3342_v35 }
 0x1bc   : > { %v1017_v17 = vpop.f32.mrf.mxu0 }
 0x1bd   : > { %v1018_v18 = vadd.f32 %v1017_v17, %v3307_v8 }
 0x1be   : > { %v1019_v19 = vpop.f32.mrf.mxu0 }
 0x1bf   : > { %v3320_v20 = vmul.f32 0.125, %v1018_v18  ;;  %v1020_v21 = vadd.f32 %v1019_v19, %v3311_v9 }
 0x1c1   : > { %v3323_v22 = vmul.f32 0.125, %v1020_v21  ;;  %1025 = vrot.lane.b32.xlu1 %v3320_v20, %s2737_s18 }
 0x1c3   : > { %v1032_v23 = vcombine.low %v3320_v20, %v3323_v22  ;;  %v1033_v25 = vcombine.high %v3320_v20, %v3323_v22 }
 0x1c5   : > { %1029 = vrot.lane.b32.xlu1 %v3323_v22, %s2737_s18  ;;  %v1040_v18 = vrot.slane %v1032_v23, %v3342_v35  ;;  %v1047_v19 = vrot.slane %v1033_v25, %v3342_v35 }
 0x1f1   : > { %v643_v33 = vpop.permute.xlu0 %642 }
 0x1f5   : > { %v647_v36 = vpop.permute.xlu0 %646 }
 0x1f6   : > { %v665_v37 = vcombine.low %v643_v33, %v647_v36  ;;  %v666_v38 = vcombine.high %v643_v33, %v647_v36 }
 0x1f8   : > { %v673_v42 = vrot.slane %v665_v37, %v3342_v35  ;;  %v680_v43 = vrot.slane %v666_v38, %v3342_v35 }
 0x1fa   : > { %v681_v44 = vcombine.low %v657_v40, %v673_v42  ;;  %v682_v45 = vcombine.high %v657_v40, %v673_v42  ;;  %v697_v46 = vcombine.low %v664_v41, %v680_v43  ;;  %v698_v47 = vcombine.high %v664_v41, %v680_v43 }
 0x1fc   : > { %v689_v48 = vrot.slane %v681_v44, %v3345_v39  ;;  %v696_v49 = vrot.slane %v682_v45, %v3345_v39  ;;  %v705_v50 = vrot.slane %v697_v46, %v3345_v39  ;;  %v712_v51 = vrot.slane %v698_v47, %v3345_v39 }
 0x1fe   : > { %v717_v52 = vcombine.low %v689_v48, %v696_v49  ;;  %v2298_v53 = vcombine.high %v689_v48, %v696_v49  ;;  %v733_v54 = vcombine.low %v705_v50, %v712_v51  ;;  %v2299_v55 = vcombine.high %v705_v50, %v712_v51 }
 0x200   : > { %v724_v56 = vrot.slane %v717_v52, %v3342_v35  ;;  %v732_v57 = vrot.slane %v2298_v53, %v3342_v35  ;;  %v740_v58 = vrot.slane %v733_v54, %v3342_v35  ;;  %v748_v59 = vrot.slane %v2299_v55, %v3342_v35 }
 0x202   : > { %v749_v60 = vcombine.low %v724_v56, %v732_v57  ;;  %v750_v61 = vcombine.high %v724_v56, %v732_v57  ;;  %v765_v62 = vcombine.low %v740_v58, %v748_v59  ;;  %v766_v63 = vcombine.high %v740_v58, %v748_v59 }
 0x204   : > { %v757_v24 = vrot.slane %v749_v60, %v3345_v39  ;;  %v764_v0 = vrot.slane %v750_v61, %v3345_v39  ;;  %v773_v1 = vrot.slane %v765_v62, %v3345_v39  ;;  %v780_v2 = vrot.slane %v766_v63, %v3345_v39 }
 0x206   : > { %v781_v3 = vcombine.low %v757_v24, %v773_v1  ;;  %v782_v6 = vcombine.high %v757_v24, %v773_v1  ;;  %v783_v10 = vcombine.low %v764_v0, %v780_v2  ;;  %v784_v11 = vcombine.high %v764_v0, %v780_v2  ;;  %v636_v1 = vpop.f32.mrf.mxu1 }
 0x208   : > { %786 = vst.msk [vmem:[#allocation2] sm:$0xff] %vm785_vm1, %v781_v3  ;;  %787 = vst.msk [vmem:[#allocation2 + $0x8] sm:$0xff] %vm785_vm1, %v782_v6  ;;  %v638_v6 = vpop.f32.mrf.mxu1 }
 0x209   : > { %788 = vst.msk [vmem:[#allocation2 + $0x10] sm:$0xff] %vm785_vm1, %v783_v10  ;;  %789 = vst.msk [vmem:[#allocation2 + $0x18] sm:$0xff] %vm785_vm1, %v784_v11  ;;  %v639_v10 = vadd.f32 %v638_v6, %v3311_v9  ;;  %v637_v11 = vadd.f32 %v636_v1, %v3307_v8 }
 0x20f   : > { %v1168_v12 = vld [vmem:[#allocation2] sm:$0xff]  ;;  %v1169_v53 = vld [vmem:[#allocation2 + $0x8] sm:$0xff] }
 0x210   : > { %2344 = vmatpush3.xpose.msk.msra.mxu0 %vm785_vm1, %v1168_v12  ;;  %v1170_v54 = vld [vmem:[#allocation2 + $0x10] sm:$0xff]  ;;  %v1171_v55 = vld [vmem:[#allocation2 + $0x18] sm:$0xff] }
 0x211   : > { %2348 = vmatprep.subr.mxu0 %v2738_v16 }
 0x233   : > { %v1026_v13 = vpop.permute.xlu1 %1025 }
 0x237   : > { %v1030_v14 = vpop.permute.xlu1 %1029 }
 0x238   : > { %v1048_v15 = vcombine.low %v1026_v13, %v1030_v14  ;;  %v1049_v17 = vcombine.high %v1026_v13, %v1030_v14 }
 0x23a   : > { %v1056_v21 = vrot.slane %v1048_v15, %v3342_v35  ;;  %v1063_v26 = vrot.slane %v1049_v17, %v3342_v35 }
 0x23c   : > { %v1064_v27 = vcombine.low %v1040_v18, %v1056_v21  ;;  %v1065_v28 = vcombine.high %v1040_v18, %v1056_v21  ;;  %v1080_v29 = vcombine.low %v1047_v19, %v1063_v26  ;;  %v1081_v30 = vcombine.high %v1047_v19, %v1063_v26 }
 0x23e   : > { %v1072_v31 = vrot.slane %v1064_v27, %v3345_v39  ;;  %v1079_v32 = vrot.slane %v1065_v28, %v3345_v39  ;;  %v1088_v33 = vrot.slane %v1080_v29, %v3345_v39  ;;  %v1095_v23 = vrot.slane %v1081_v30, %v3345_v39 }
 0x23f   : > { %v798_v28 = vcombine.low %v637_v11, %v639_v10  ;;  %v799_v30 = vcombine.high %v637_v11, %v639_v10 }
 0x240   : > { %v1100_v34 = vcombine.low %v1072_v31, %v1079_v32  ;;  %v2302_v36 = vcombine.high %v1072_v31, %v1079_v32  ;;  %v1116_v20 = vcombine.low %v1088_v33, %v1095_v23  ;;  %v2303_v22 = vcombine.high %v1088_v33, %v1095_v23 }
 0x242   : > { %v1107_v25 = vrot.slane %v1100_v34, %v3342_v35  ;;  %v1115_v37 = vrot.slane %v2302_v36, %v3342_v35  ;;  %v1123_v38 = vrot.slane %v1116_v20, %v3342_v35  ;;  %v1131_v40 = vrot.slane %v2303_v22, %v3342_v35 }
 0x243   : > { %v806_v34 = vrot.slane %v798_v28, %v3342_v35  ;;  %v813_v36 = vrot.slane %v799_v30, %v3342_v35 }
 0x244   : > { %v1132_v41 = vcombine.low %v1107_v25, %v1115_v37  ;;  %v1133_v42 = vcombine.high %v1107_v25, %v1115_v37  ;;  %v1148_v43 = vcombine.low %v1123_v38, %v1131_v40  ;;  %v1149_v44 = vcombine.high %v1123_v38, %v1131_v40 }
 0x246   : > { %v1140_v45 = vrot.slane %v1132_v41, %v3345_v39  ;;  %v1156_v46 = vrot.slane %v1148_v43, %v3345_v39  ;;  %v1147_v47 = vrot.slane %v1133_v42, %v3345_v39  ;;  %v1163_v48 = vrot.slane %v1149_v44, %v3345_v39 }
 0x248   : > { %v1164_v49 = vcombine.low %v1140_v45, %v1156_v46  ;;  %v1165_v50 = vcombine.high %v1140_v45, %v1156_v46  ;;  %v1166_v51 = vcombine.low %v1147_v47, %v1163_v48  ;;  %v1167_v52 = vcombine.high %v1147_v47, %v1163_v48 }
 0x24a   : > { %2346 = vmatmul.mubr.msk.f32.vlgmr.msra.gmra.mxu0 %vm785_vm1, %v1164_v49 }
 0x24b   : > { %2349 = vmatpush3.xpose.msk.msra.mxu0 %vm785_vm1, %v1169_v53  ;;  %2350 = vmatprep.mubr.msk.f32.mxu0 %vm2739_vm0, %v2738_v16 }
 0x24c   : > { %2353 = vmatprep.subr.mxu0 %v2738_v16 }
 0x24e   : > { %2351 = vmatmul.mubr.msk.f32.vlgmr.msra.gmra.mxu0 %vm785_vm1, %v1165_v50 }
 0x24f   : > { %2354 = vmatpush3.xpose.msk.msra.mxu0 %vm785_vm1, %v1170_v54  ;;  %2355 = vmatprep.mubr.msk.f32.mxu0 %vm2739_vm0, %v2738_v16 }
 0x250   : > { %2358 = vmatprep.subr.mxu0 %v2738_v16 }
 0x252   : > { %2356 = vmatmul.mubr.msk.f32.vlgmr.msra.gmra.mxu0 %vm785_vm1, %v1166_v51 }
 0x253   : > { %2359 = vmatpush3.xpose.msk.msra.mxu0 %vm785_vm1, %v1171_v55  ;;  %2360 = vmatprep.mubr.msk.f32.mxu0 %vm2739_vm0, %v2738_v16 }
 0x256   : > { %2361 = vmatmul.mubr.msk.f32.vlgmr.msra.gmra.mxu0 %vm785_vm1, %v1167_v52 }
 0x30a   : > { %v1249_v56 = vpop.f32.mrf.mxu0 }
 0x30b   : > { %v1482_v57 = vsel %vm1481_vm2, %v1249_v56, -inf }
 0x30c   : > { %1483 = vmax.xlane.f32.xlu0 %v1482_v57  ;;  %v2347_v58 = vpop.f32.mrf.mxu0 }
 0x30e   : > { %v1325_v59 = vpop.f32.mrf.mxu0 }
 0x30f   : > { %v1485_v60 = vsel %vm1481_vm2, %v1325_v59, -inf }
 0x310   : > { %1486 = vmax.xlane.f32.xlu1 %v1485_v60  ;;  %v2352_v61 = vpop.f32.mrf.mxu0 }
 0x312   : > { %v1401_v62 = vpop.f32.mrf.mxu0 }
 0x313   : > { %v1488_v63 = vsel %vm1481_vm2, %v1401_v62, -inf }
 0x314   : > { %1489 = vmax.xlane.f32.xlu0 %v1488_v63  ;;  %v2357_v24 = vpop.f32.mrf.mxu0 }
 0x316   : > { %v1477_v0 = vpop.f32.mrf.mxu0 }
 0x317   : > { %v1491_v2 = vsel %vm1481_vm2, %v1477_v0, -inf }
 0x318   : > { %1492 = vmax.xlane.f32.xlu0 %v1491_v2  ;;  %v2362_v3 = vpop.f32.mrf.mxu0 }
 0x321   : > { %795 = vrot.lane.b32.xlu1 %v639_v10, %s2737_s18 }
 0x32e   : > { %791 = vrot.lane.b32.xlu0 %v637_v11, %s2737_s18 }
 0x395   : > { %v1484_v12 = vpop.xlane.xlu0 %1483 }
 0x396   : > { %v1494_v13 = vsub.f32 %v1249_v56, %v1484_v12 }
 0x398   : > { %v1498_v14 = vmul.f32 1.442695, %v1494_v13 }
 0x399   : > { %v1487_v15 = vpop.xlane.xlu1 %1486 }
 0x39a   : > { %2488 = vpow2.f32 %v1498_v14  ;;  %v1495_v17 = vsub.f32 %v1325_v59, %v1487_v15 }
 0x39c   : > { %v1500_v18 = vmul.f32 1.442695, %v1495_v17 }
 0x39d   : > { %v1490_v19 = vpop.xlane.xlu0 %1489  ;;  %v796_v29 = vpop.permute.xlu1 %795 }
 0x39e   : > { %2490 = vpow2.f32 %v1500_v18  ;;  %v1496_v21 = vsub.f32 %v1401_v62, %v1490_v19 }
 0x3a0   : > { %v1502_v26 = vmul.f32 1.442695, %v1496_v21 }
 0x3a1   : > { %v1493_v27 = vpop.xlane.xlu0 %1492 }
 0x3a2   : > { %2492 = vpow2.f32 %v1502_v26  ;;  %v1497_v9 = vsub.f32 %v1477_v0, %v1493_v27 }
 0x3a4   : > { %v1504_v8 = vmul.f32 1.442695, %v1497_v9 }
 0x3a5   : > { %v792_v31 = vpop.permute.xlu0 %791 }
 0x3a6   : > { %2494 = vpow2.f32 %v1504_v8  ;;  %v814_v32 = vcombine.low %v792_v31, %v796_v29  ;;  %v815_v33 = vcombine.high %v792_v31, %v796_v29 }
 0x3a7   : > { %v2489_v23 = vpop.eup %2488 }
 0x3a8   : > { %v822_v20 = vrot.slane %v814_v32, %v3342_v35  ;;  %v829_v22 = vrot.slane %v815_v33, %v3342_v35  ;;  %v1506_v25 = vsel %vm1481_vm2, %v2489_v23, 0.0  ;;  %v1995_v32 = vld [vmem:[#allocation12 + $0xf8] sm:$0xff]  ;;  %v1994_v33 = vld [vmem:[#allocation12 + $0xf0] sm:$0xff] }
 0x3a9   : > { %1507 = vadd.xlane.f32.xlu1 %v1506_v25  ;;  %v1988_v25 = vld [vmem:[#allocation12 + $0xc0] sm:$0xff] }
 0x3aa   : > { %v830_v37 = vcombine.low %v806_v34, %v822_v20  ;;  %v831_v38 = vcombine.high %v806_v34, %v822_v20  ;;  %v846_v40 = vcombine.low %v813_v36, %v829_v22  ;;  %v847_v41 = vcombine.high %v813_v36, %v829_v22  ;;  %v1992_v34 = vld [vmem:[#allocation12 + $0xe0] sm:$0xff]  ;;  %v1991_v36 = vld [vmem:[#allocation12 + $0xd8] sm:$0xff]  ;;  %v1990_v20 = vld [vmem:[#allocation12 + $0xd0] sm:$0xff] }
 0x3ab   : > { %v2491_v42 = vpop.eup %2490  ;;  %v1989_v22 = vld [vmem:[#allocation12 + $0xc8] sm:$0xff] }
 0x3ac   : > { %v838_v43 = vrot.slane %v830_v37, %v3345_v39  ;;  %v845_v44 = vrot.slane %v831_v38, %v3345_v39  ;;  %v854_v45 = vrot.slane %v846_v40, %v3345_v39  ;;  %v861_v46 = vrot.slane %v847_v41, %v3345_v39  ;;  %v1987_v37 = vld [vmem:[#allocation12 + $0xb8] sm:$0xff]  ;;  %v1985_v38 = vld [vmem:[#allocation12 + $0xa8] sm:$0xff]  ;;  %v1984_v40 = vld [vmem:[#allocation12 + $0xa0] sm:$0xff] }
 0x3ad   : > { %v1509_v47 = vsel %vm1481_vm2, %v2491_v42, 0.0  ;;  %v1983_v41 = vld [vmem:[#allocation12 + $0x98] sm:$0xff] }
 0x3ae   : > { %v866_v48 = vcombine.low %v838_v43, %v845_v44  ;;  %v2300_v49 = vcombine.high %v838_v43, %v845_v44  ;;  %v882_v50 = vcombine.low %v854_v45, %v861_v46  ;;  %v2301_v51 = vcombine.high %v854_v45, %v861_v46  ;;  %1510 = vadd.xlane.f32.xlu1 %v1509_v47  ;;  %v1981_v43 = vld [vmem:[#allocation12 + $0x88] sm:$0xff]  ;;  %v1980_v44 = vld [vmem:[#allocation12 + $0x80] sm:$0xff]  ;;  %v1979_v45 = vld [vmem:[#allocation12 + $0x78] sm:$0xff] }
 0x3af   : > { %v2493_v52 = vpop.eup %2492  ;;  %v1978_v46 = vld [vmem:[#allocation12 + $0x70] sm:$0xff]  ;;  %v1977_v47 = vld [vmem:[#allocation12 + $0x68] sm:$0xff] }
 0x3b0   : > { %v873_v53 = vrot.slane %v866_v48, %v3342_v35  ;;  %v881_v54 = vrot.slane %v2300_v49, %v3342_v35  ;;  %v889_v55 = vrot.slane %v882_v50, %v3342_v35  ;;  %v897_v56 = vrot.slane %v2301_v51, %v3342_v35  ;;  %v1976_v48 = vld [vmem:[#allocation12 + $0x60] sm:$0xff]  ;;  %v1975_v49 = vld [vmem:[#allocation12 + $0x58] sm:$0xff]  ;;  %v1974_v50 = vld [vmem:[#allocation12 + $0x50] sm:$0xff] }
 0x3b1   : > { %v1512_v57 = vsel %vm1481_vm2, %v2493_v52, 0.0  ;;  %v1973_v51 = vld [vmem:[#allocation12 + $0x48] sm:$0xff] }
 0x3b2   : > { %v898_v58 = vcombine.low %v873_v53, %v881_v54  ;;  %v899_v59 = vcombine.high %v873_v53, %v881_v54  ;;  %v914_v60 = vcombine.low %v889_v55, %v897_v56  ;;  %v915_v61 = vcombine.high %v889_v55, %v897_v56  ;;  %1513 = vadd.xlane.f32.xlu0 %v1512_v57  ;;  %v1971_v53 = vld [vmem:[#allocation12 + $0x38] sm:$0xff]  ;;  %v1970_v54 = vld [vmem:[#allocation12 + $0x30] sm:$0xff]  ;;  %v1969_v55 = vld [vmem:[#allocation12 + $0x28] sm:$0xff] }
 0x3b3   : > { %v2495_v62 = vpop.eup %2494  ;;  %v1968_v56 = vld [vmem:[#allocation12 + $0x20] sm:$0xff]  ;;  %v1967_v57 = vld [vmem:[#allocation12 + $0x18] sm:$0xff] }
 0x3b4   : > { %v906_v63 = vrot.slane %v898_v58, %v3345_v39  ;;  %v913_v24 = vrot.slane %v899_v59, %v3345_v39  ;;  %v922_v0 = vrot.slane %v914_v60, %v3345_v39  ;;  %v929_v1 = vrot.slane %v915_v61, %v3345_v39  ;;  %v1966_v58 = vld [vmem:[#allocation12 + $0x10] sm:$0xff]  ;;  %v1965_v59 = vld [vmem:[#allocation12 + $0x8] sm:$0xff]  ;;  %v1964_v60 = vld [vmem:[#allocation12] sm:$0xff] }
 0x3b5   : > { %v1515_v2 = vsel %vm1481_vm2, %v2495_v62, 0.0  ;;  %v2027_v61 = vld [vmem:[#allocation12 + $0x1f8] sm:$0xff] }
 0x3b6   : > { %v930_v3 = vcombine.low %v906_v63, %v922_v0  ;;  %v931_v6 = vcombine.high %v906_v63, %v922_v0  ;;  %v932_v10 = vcombine.low %v913_v24, %v929_v1  ;;  %v933_v11 = vcombine.high %v913_v24, %v929_v1  ;;  %1516 = vadd.xlane.f32.xlu0 %v1515_v2  ;;  %v2025_v63 = vld [vmem:[#allocation12 + $0x1e8] sm:$0xff]  ;;  %v2024_v24 = vld [vmem:[#allocation12 + $0x1e0] sm:$0xff]  ;;  %v2023_v0 = vld [vmem:[#allocation12 + $0x1d8] sm:$0xff] }
 0x3b7   : > { %v2022_v1 = vld [vmem:[#allocation12 + $0x1d0] sm:$0xff]  ;;  %v2021_v2 = vld [vmem:[#allocation12 + $0x1c8] sm:$0xff] }
 0x3b8   : > { %934 = vst.msk [vmem:[#allocation3] sm:$0xff] %vm785_vm1, %v930_v3  ;;  %935 = vst.msk [vmem:[#allocation3 + $0x8] sm:$0xff] %vm785_vm1, %v931_v6  ;;  %v2020_v3 = vld [vmem:[#allocation12 + $0x1c0] sm:$0xff]  ;;  %v2019_v6 = vld [vmem:[#allocation12 + $0x1b8] sm:$0xff] }
 0x3b9   : > { %936 = vst.msk [vmem:[#allocation3 + $0x10] sm:$0xff] %vm785_vm1, %v932_v10  ;;  %937 = vst.msk [vmem:[#allocation3 + $0x18] sm:$0xff] %vm785_vm1, %v933_v11  ;;  %v2018_v10 = vld [vmem:[#allocation12 + $0x1b0] sm:$0xff]  ;;  %v2017_v11 = vld [vmem:[#allocation12 + $0x1a8] sm:$0xff] }
 0x3bf   : > { %v1172_v12 = vld [vmem:[#allocation3] sm:$0xff]  ;;  %v1173_v21 = vld [vmem:[#allocation3 + $0x8] sm:$0xff] }
 0x3c0   : > { %2364 = vmatpush3.msra.mxu1 %v1172_v12  ;;  %v1174_v9 = vld [vmem:[#allocation3 + $0x10] sm:$0xff]  ;;  %v1175_v30 = vld [vmem:[#allocation3 + $0x18] sm:$0xff]  ;;  %v2016_v12 = vld [vmem:[#allocation12 + $0x1a0] sm:$0xff] }
 0x3c1   : > { %2368 = vmatprep.subr.mxu1 %v2738_v16 }
 0x432   : > { %v1508_v13 = vpop.xlane.xlu1 %1507 }
 0x433   : > { %2496 = vrcp.f32 %v1508_v13  ;;  %v2015_v13 = vld [vmem:[#allocation12 + $0x198] sm:$0xff] }
 0x437   : > { %v1511_v14 = vpop.xlane.xlu1 %1510 }
 0x438   : > { %2498 = vrcp.f32 %v1511_v14  ;;  %v2014_v14 = vld [vmem:[#allocation12 + $0x190] sm:$0xff] }
 0x43b   : > { %v1514_v15 = vpop.xlane.xlu0 %1513 }
 0x43c   : > { %2500 = vrcp.f32 %v1514_v15  ;;  %v2013_v15 = vld [vmem:[#allocation12 + $0x188] sm:$0xff] }
 0x43f   : > { %v1517_v17 = vpop.xlane.xlu0 %1516 }
 0x440   : > { %v2497_v18 = vpop.eup %2496  ;;  %2502 = vrcp.f32 %v1517_v17  ;;  %v2012_v17 = vld [vmem:[#allocation12 + $0x180] sm:$0xff] }
 0x441   : > { %v1522_v19 = vmul.f32 %v2497_v18, %v2489_v23  ;;  %v1993_v23 = vld [vmem:[#allocation12 + $0xe8] sm:$0xff]  ;;  %v2011_v18 = vld [vmem:[#allocation12 + $0x178] sm:$0xff] }
 0x443   : > { %2366 = vmatmul.mubr.msk.f32.vlgmr.msra.gmra.mxu1 %vm1481_vm2, %v1522_v19  ;;  %v2010_v19 = vld [vmem:[#allocation12 + $0x170] sm:$0xff] }
 0x444   : > { %2369 = vmatpush3.msra.mxu1 %v1173_v21  ;;  %2370 = vmatprep.mubr.msk.f32.mxu1 %vm2739_vm0, %v2738_v16  ;;  %v2009_v21 = vld [vmem:[#allocation12 + $0x168] sm:$0xff] }
 0x445   : > { %v2499_v26 = vpop.eup %2498  ;;  %2373 = vmatprep.subr.mxu1 %v2738_v16 }
 0x446   : > { %v1523_v27 = vmul.f32 %v2499_v26, %v2491_v42  ;;  %v1982_v42 = vld [vmem:[#allocation12 + $0x90] sm:$0xff]  ;;  %v2008_v26 = vld [vmem:[#allocation12 + $0x160] sm:$0xff] }
 0x448   : > { %2371 = vmatmul.mubr.msk.f32.vlgmr.msra.gmra.mxu1 %vm1481_vm2, %v1523_v27  ;;  %v2007_v27 = vld [vmem:[#allocation12 + $0x158] sm:$0xff] }
 0x449   : > { %v2501_v28 = vpop.eup %2500  ;;  %2374 = vmatpush3.msra.mxu1 %v1174_v9  ;;  %2375 = vmatprep.mubr.msk.f32.mxu1 %vm2739_vm0, %v2738_v16  ;;  %v2006_v9 = vld [vmem:[#allocation12 + $0x150] sm:$0xff] }
 0x44a   : > { %2378 = vmatprep.subr.mxu1 %v2738_v16  ;;  %v1524_v29 = vmul.f32 %v2501_v28, %v2493_v52  ;;  %v1972_v52 = vld [vmem:[#allocation12 + $0x40] sm:$0xff]  ;;  %v2005_v28 = vld [vmem:[#allocation12 + $0x148] sm:$0xff] }
 0x44c   : > { %2376 = vmatmul.mubr.msk.f32.vlgmr.msra.gmra.mxu1 %vm1481_vm2, %v1524_v29  ;;  %v2004_v29 = vld [vmem:[#allocation12 + $0x140] sm:$0xff] }
 0x44d   : > { %v2503_v8 = vpop.eup %2502  ;;  %2379 = vmatpush3.msra.mxu1 %v1175_v30  ;;  %2380 = vmatprep.mubr.msk.f32.mxu1 %vm2739_vm0, %v2738_v16  ;;  %v1986_v16 = vld [vmem:[#allocation12 + $0xb0] sm:$0xff]  ;;  %v2003_v30 = vld [vmem:[#allocation12 + $0x138] sm:$0xff] }
 0x44e   : > { %v1525_v31 = vmul.f32 %v2503_v8, %v2495_v62  ;;  %2040 = vmatprep.subr.mxu1 %v1995_v32  ;;  %v2026_v62 = vld [vmem:[#allocation12 + $0x1f0] sm:$0xff]  ;;  %v2000_v32 = vld [vmem:[#allocation12 + $0x120] sm:$0xff] }
 0x44f   : > { %v2002_v8 = vld [vmem:[#allocation12 + $0x130] sm:$0xff] }
 0x450   : > { %2381 = vmatmul.mubr.msk.f32.vlgmr.msra.gmra.mxu1 %vm1481_vm2, %v1525_v31  ;;  %v2001_v31 = vld [vmem:[#allocation12 + $0x128] sm:$0xff] }
 0x451   : > { %2041 = vmatpush1.msra.mxu1 %v1994_v33 }
 0x452   : > { %2042 = vmatprep.subr.mxu1 %v1993_v23 }
 0x453   : > { %2043 = vmatpush1.msra.mxu1 %v1992_v34 }
 0x454   : > { %2044 = vmatprep.subr.mxu1 %v1991_v36 }
 0x455   : > { %2045 = vmatpush1.msra.mxu1 %v1990_v20 }
 0x456   : > { %2046 = vmatprep.subr.mxu1 %v1989_v22 }
 0x457   : > { %2047 = vmatpush1.msra.mxu1 %v1988_v25 }
 0x458   : > { %2048 = vmatprep.subr.mxu1 %v1987_v37 }
 0x459   : > { %2049 = vmatpush1.msra.mxu1 %v1986_v16 }
 0x45a   : > { %2050 = vmatprep.subr.mxu1 %v1985_v38 }
 0x45b   : > { %2051 = vmatpush1.msra.mxu1 %v1984_v40 }
 0x45c   : > { %2052 = vmatprep.subr.mxu1 %v1983_v41 }
 0x45d   : > { %2053 = vmatpush1.msra.mxu1 %v1982_v42 }
 0x45e   : > { %2054 = vmatprep.subr.mxu1 %v1981_v43 }
 0x45f   : > { %2055 = vmatpush1.msra.mxu1 %v1980_v44 }
 0x460   : > { %2056 = vmatprep.subr.mxu1 %v1979_v45 }
 0x461   : > { %2057 = vmatpush1.msra.mxu1 %v1978_v46 }
 0x462   : > { %2058 = vmatprep.subr.mxu1 %v1977_v47 }
 0x463   : > { %2059 = vmatpush1.msra.mxu1 %v1976_v48 }
 0x464   : > { %2060 = vmatprep.subr.mxu1 %v1975_v49 }
 0x465   : > { %2061 = vmatpush1.msra.mxu1 %v1974_v50 }
 0x466   : > { %2062 = vmatprep.subr.mxu1 %v1973_v51 }
 0x467   : > { %2063 = vmatpush1.msra.mxu1 %v1972_v52 }
 0x468   : > { %2064 = vmatprep.subr.mxu1 %v1971_v53 }
 0x469   : > { %2065 = vmatpush1.msra.mxu1 %v1970_v54  ;;  %v1999_v54 = vld [vmem:[#allocation12 + $0x118] sm:$0xff] }
 0x46a   : > { %2066 = vmatprep.subr.mxu1 %v1969_v55  ;;  %v1998_v55 = vld [vmem:[#allocation12 + $0x110] sm:$0xff] }
 0x46b   : > { %2067 = vmatpush1.msra.mxu1 %v1968_v56  ;;  %v1997_v56 = vld [vmem:[#allocation12 + $0x108] sm:$0xff] }
 0x46c   : > { %2068 = vmatprep.subr.mxu1 %v1967_v57 }
 0x46d   : > { %2069 = vmatpush1.msra.mxu1 %v1966_v58 }
 0x46e   : > { %2070 = vmatprep.subr.mxu1 %v1965_v59 }
 0x46f   : > { %2071 = vmatpush1.msra.mxu1 %v1964_v60 }
 0x470   : > { %2072 = vmatprep.subr.mxu1 %v2027_v61  ;;  %v1996_v61 = vld [vmem:[#allocation12 + $0x100] sm:$0xff] }
 0x471   : > { %2073 = vmatpush2.msra.mxu1 %v2026_v62 }
 0x472   : > { %2074 = vmatprep.subr.mxu1 %v2025_v63 }
 0x473   : > { %2075 = vmatpush2.msra.mxu1 %v2024_v24 }
 0x474   : > { %2076 = vmatprep.subr.mxu1 %v2023_v0 }
 0x475   : > { %2077 = vmatpush2.msra.mxu1 %v2022_v1 }
 0x476   : > { %2078 = vmatprep.subr.mxu1 %v2021_v2 }
 0x477   : > { %2079 = vmatpush2.msra.mxu1 %v2020_v3 }
 0x478   : > { %2080 = vmatprep.subr.mxu1 %v2019_v6 }
 0x479   : > { %2081 = vmatpush2.msra.mxu1 %v2018_v10 }
 0x47a   : > { %2082 = vmatprep.subr.mxu1 %v2017_v11 }
 0x47b   : > { %2083 = vmatpush2.msra.mxu1 %v2016_v12 }
 0x47c   : > { %2084 = vmatprep.subr.mxu1 %v2015_v13 }
 0x47d   : > { %2085 = vmatpush2.msra.mxu1 %v2014_v14 }
 0x47e   : > { %2086 = vmatprep.subr.mxu1 %v2013_v15 }
 0x47f   : > { %2087 = vmatpush2.msra.mxu1 %v2012_v17 }
 0x480   : > { %2088 = vmatprep.subr.mxu1 %v2011_v18 }
 0x481   : > { %2089 = vmatpush2.msra.mxu1 %v2010_v19 }
 0x482   : > { %2090 = vmatprep.subr.mxu1 %v2009_v21 }
 0x483   : > { %2091 = vmatpush2.msra.mxu1 %v2008_v26 }
 0x484   : > { %2092 = vmatprep.subr.mxu1 %v2007_v27 }
 0x485   : > { %2093 = vmatpush2.msra.mxu1 %v2006_v9 }
 0x486   : > { %2094 = vmatprep.subr.mxu1 %v2005_v28 }
 0x487   : > { %2095 = vmatpush2.msra.mxu1 %v2004_v29 }
 0x488   : > { %2096 = vmatprep.subr.mxu1 %v2003_v30 }
 0x489   : > { %2097 = vmatpush2.msra.mxu1 %v2002_v8 }
 0x48a   : > { %2098 = vmatprep.subr.mxu1 %v2001_v31 }
 0x48b   : > { %2099 = vmatpush2.msra.mxu1 %v2000_v32 }
 0x48c   : > { %2100 = vmatprep.subr.mxu1 %v1999_v54 }
 0x48d   : > { %2101 = vmatpush2.msra.mxu1 %v1998_v55 }
 0x48e   : > { %2102 = vmatprep.subr.mxu1 %v1997_v56 }
 0x48f   : > { %2103 = vmatpush2.msra.mxu1 %v1996_v61 }
 0x503   : > { %v1595_v33 = vpop.f32.mrf.mxu1 }
 0x505   : > { %v2367_v23 = vpop.f32.mrf.mxu1 }
 0x508   : > { %v1668_v34 = vpop.f32.mrf.mxu1 }
 0x50a   : > { %v2372_v36 = vpop.f32.mrf.mxu1 }
 0x50c   : > { %v1741_v20 = vpop.f32.mrf.mxu1 }
 0x50d   : > { %v1818_v25 = vcombine.low %v1595_v33, %v1741_v20  ;;  %v1819_v37 = vcombine.high %v1595_v33, %v1741_v20 }
 0x50e   : > { %v2377_v22 = vpop.f32.mrf.mxu1 }
 0x50f   : > { %v1826_v42 = vrot.slane %v1818_v25, %v3342_v35  ;;  %v1833_v43 = vrot.slane %v1819_v37, %v3342_v35 }
 0x510   : > { %v1814_v16 = vpop.f32.mrf.mxu1 }
 0x511   : > { %v1834_v38 = vcombine.low %v1668_v34, %v1814_v16  ;;  %v1835_v40 = vcombine.high %v1668_v34, %v1814_v16 }
 0x512   : > { %v2382_v41 = vpop.f32.mrf.mxu1 }
 0x513   : > { %v1842_v44 = vrot.slane %v1834_v38, %v3342_v35  ;;  %v1849_v45 = vrot.slane %v1835_v40, %v3342_v35 }
 0x515   : > { %v1850_v46 = vcombine.low %v1826_v42, %v1842_v44  ;;  %v1851_v47 = vcombine.high %v1826_v42, %v1842_v44  ;;  %v1866_v48 = vcombine.low %v1833_v43, %v1849_v45  ;;  %v1867_v49 = vcombine.high %v1833_v43, %v1849_v45 }
 0x517   : > { %v1858_v50 = vrot.slane %v1850_v46, %v3345_v39  ;;  %v1865_v51 = vrot.slane %v1851_v47, %v3345_v39  ;;  %v1874_v52 = vrot.slane %v1866_v48, %v3345_v39  ;;  %v1881_v53 = vrot.slane %v1867_v49, %v3345_v39 }
 0x519   : > { %v1886_v57 = vcombine.low %v1858_v50, %v1865_v51  ;;  %v2316_v58 = vcombine.high %v1858_v50, %v1865_v51  ;;  %v1902_v59 = vcombine.low %v1874_v52, %v1881_v53  ;;  %v2317_v60 = vcombine.high %v1874_v52, %v1881_v53 }
 0x51b   : > { %v1893_v62 = vrot.slane %v1886_v57, %v3342_v35  ;;  %v1901_v63 = vrot.slane %v2316_v58, %v3342_v35  ;;  %v1909_v24 = vrot.slane %v1902_v59, %v3342_v35  ;;  %v1917_v0 = vrot.slane %v2317_v60, %v3342_v35 }
 0x51d   : > { %v1918_v1 = vcombine.low %v1893_v62, %v1901_v63  ;;  %v1919_v2 = vcombine.high %v1893_v62, %v1901_v63  ;;  %v1934_v3 = vcombine.low %v1909_v24, %v1917_v0  ;;  %v1935_v6 = vcombine.high %v1909_v24, %v1917_v0 }
 0x51f   : > { %v1926_v10 = vrot.slane %v1918_v1, %v3345_v39  ;;  %v1933_v11 = vrot.slane %v1919_v2, %v3345_v39  ;;  %v1942_v12 = vrot.slane %v1934_v3, %v3345_v39  ;;  %v1949_v13 = vrot.slane %v1935_v6, %v3345_v39  ;;  %v2028_v39 = vld [vmem:[%s3524_s6] sm:$0x3] }
 0x520   : > { %v2033_v28 = vrot.slane %v2028_v39, %v489_v5  ;;  %v2037_v29 = vrot.slane %v2028_v39, %v493_v7 }
 0x521   : > { %v1951_v14 = vcombine.high %v1926_v10, %v1942_v12  ;;  %v1953_v15 = vcombine.high %v1933_v11, %v1949_v13  ;;  %v1952_v17 = vcombine.low %v1933_v11, %v1949_v13  ;;  %v1950_v35 = vcombine.low %v1926_v10, %v1942_v12 }
 0x523   : > { %v2483_v18 = vpack.i.bf16 %v1951_v14, %v1953_v15 }
 0x525   : > { %2484 = vrot.lane.b32.xlu1 %v2483_v18, %s2737_s18 }
 0x597   : > { %v2485_v19 = vpop.permute.xlu1 %2484 }
 0x598   : > { %v2487_v21 = vunpack.i.h.bf16 %v2485_v19  ;;  %v2486_v26 = vunpack.i.l.bf16 %v2485_v19 }
 0x59a   : > { %v1963_v27 = vsel %vm785_vm1, %v1952_v17, %v2486_v26  ;;  %v1962_v9 = vsel %vm785_vm1, %v1950_v35, %v2487_v21 }
 0x59b   : > { %2104 = vmatprep.mubr.f32.mxu1 %v1963_v27 }
 0x59c   : > { %2105 = vmatmul.mubr.f32.vlgmr.msra.gmra.mxu1 %v1962_v9 }
 0x65c   : > { %v2106_v30 = vpop.f32.mrf.mxu1 }
 0x65d   : > { %v2107_v8 = vadd.f32 %v2106_v30, %v2033_v28 }
 0x65e   : > { %v2108_v31 = vpop.f32.mrf.mxu1 }
 0x65f   : > { %2111 = vst [vmem:[%s414_s24] sm:$0xff] %v2107_v8  ;;  %v2109_v32 = vadd.f32 %v2108_v31, %v2037_v29 }
 0x661   : > { %2112 = vst [vmem:[%s414_s24 + $0x8] sm:$0xff] %v2109_v32 }
 0x662   : > { %2653 = shalt.err (!%p2650_p1)
}
 0x663   : > { %s2654_s3 = scalar_lea.hbm %s2128_s14, 256  ;;  %s2658_s10 = scalar_lea.hbm %s3576_s21, 512 }
 0x664   : > { %p2655_p4 = scmp.ne.s32.totalorder %s2128_s14, %s2654_s3  ;;  %p2659_p11 = scmp.lt.s32.totalorder %s2128_s14, %s3576_s21 }
 0x665   : > { %p2660_p2 = scmp.lt.s32.totalorder %s2658_s10, %s2654_s3 }
 0x666   : > { %p2656_p6 = pnand %p2655_p4, %p3577_p9 }
 0x667   : > { %p2661_p12 = por %p2660_p2, %p2659_p11 }
 0x668   : > { %p2657_p8 = pneg %p2656_p6 }
 0x66a   : > { %p2662_p3 = pnand %p2661_p12, %p2657_p8 }
 0x66c   : > { %2665 = shalt.err (!%p2662_p3)
}
 0x66d   : > { %2397 = dma.vmem_to_hbm [thread:$0]  (%p3577_p9), %s2131_s16, 256, %s2128_s14, %s2114_s7  }
 0x66e PF: > { %s3578_s30 = sld [smem:[#allocation18_spill]] }
 0x66f   : > { %s3579_s9 = sld [smem:[#allocation21_spill]] }
 0x670   : > { %s3580_s18 = sld [smem:[#allocation20_spill]] }
 0x674   : > { %s2142_s28 = sand.u32 1, %s3578_s30  }
 0x675   : > { %p3581_p0 = scmp.ne.s32.totalorder %s3579_s9, 0  ;;  %s2143_s29 = scalar_lea.sflag [#allocation6], %s2142_s28 }
 0x676   : > { %p3582_p7 = scmp.ge.s32.totalorder %s3580_s18, 2 }
 0x678   : > { %p2417_p10 = pnand %p3582_p7, %p3581_p0 }
 0x67a   : > { %p2418_p13 = pneg %p2417_p10 }
 0x67c   : > { %2703 = dma.done.wait (%p2418_p13), %s2143_s29, 256  }
 0x67d   : > { %2705 = vsyncadd (%p2418_p13), %s2143_s29, 4294967040  ;;  %s27_s29 = sadd.s32 1, %s3580_s18   ;;  %s3583_s15 = sld [smem:[#allocation23_spill]] }
 0x67e   : > { %p24_p5 = scmp.ge.s32.totalorder %s27_s29, 4   ;;  %s3584_s27 = sld [smem:[#allocation19_spill]] }
 0x67f   : > { %s3585_s28 = sld [smem:[#allocation22_spill]]  ;;  %s3586_s24 = smov %s2712_s25 }
 0x680   : > { %s3587_s25 = smov %s2716_s26  ;;  %26 = sbr.rel (!%p24_p5) target bundleno = 13 (0xd), region = 129 }
 0x683   : > { %s3588_s26 = smov %s3583_s15 }
 0x685   :  { %2148 = vsyncpa [#allocation5], 1 }
 0x686   :  { %2150 = vsyncpa [#allocation5 + $0x1], 1 }
 0x687   :  { %2151 = vsyncpa [#allocation8], 1 }
 0x688   :  { %2153 = vsyncpa [#allocation8 + $0x1], 1 }
 0x689   :  { %2154 = vsyncpa [#allocation11], 1 }
 0x68a   :  { %2155 = vsyncpa [#allocation6], 1 }
 0x68b   :  { %2157 = vsyncpa [#allocation6 + $0x1], 1 }

// kernel: tpu_custom_call.1
= control target key start
LH: loop header
LB: loop body
LE: loop exit
PB: predicated region body
PF: predicated region fallthrough
CT: control target
= control target key end

     0   :  { %s3518_s0 = inlined_call_operand.hbm [shape: f32[2,8,256], index: 0, kind: input, shape index: {}]   ;;  %s3519_s1 = inlined_call_operand.hbm [shape: f32[2,8,256], index: 1, kind: input, shape index: {}]   ;;  %s3520_s2 = inlined_call_operand.hbm [shape: f32[2,8,256], index: 2, kind: input, shape index: {}]   ;;  %s3521_s3 = inlined_call_operand.hbm [shape: f32[256,256], index: 3, kind: input, shape index: {}]   ;;  %s3522_s4 = inlined_call_operand.vmem [shape: f32[1,256], index: 4, kind: input, shape index: {}]   ;;  %s3523_s5 = inlined_call_operand.hbm [shape: f32[256,256], index: 5, kind: input, shape index: {}]   ;;  %s3524_s6 = inlined_call_operand.vmem [shape: f32[1,256], index: 6, kind: input, shape index: {}]   ;;  %s3525_s7 = inlined_call_operand.hbm [shape: f32[2,8,256], index: 7, kind: output, shape index: {}]  }
   0x1   :  { %3544 = sst [smem:[#allocation26_spill]] %s3519_s1 }
   0x2   :  { %3545 = sst [smem:[#allocation27_spill]] %s3521_s3 }
   0x3   :  { %3546 = sst [smem:[#allocation28_spill]] %s3525_s7 }
   0x4   :  { %12 = vsyncpa [#allocation5], 0 }
   0x5   :  { %14 = vsyncpa [#allocation5 + $0x1], 0 }
   0x6   :  { %15 = vsyncpa [#allocation8], 0 }
   0x7   :  { %17 = vsyncpa [#allocation8 + $0x1], 0 }
   0x8   :  { %18 = vsyncpa [#allocation11], 0 }
   0x9   :  { %19 = vsyncpa [#allocation6], 0 }
   0xa   :  { %21 = vsyncpa [#allocation6 + $0x1], 0  ;;  %s2783_s24 = smov 0   ;;  %s2785_s25 = smov 0  }
   0xb   :  { %s2787_s26 = smov 0   ;;  %s2789_s27 = smov 0  }
   0xc   :  { %s2791_s28 = smov 0   ;;  %s2793_s29 = smov 0  }
   0xd LB: > { %3547 = sst [smem:[#allocation18_spill]] %s2708_s24  ;;  %s2814_s30 = sadd.s32 4294967295, %s2728_s29   ;;  %s2728_s29 = sphi %s2793_s29, %s27_s29   ;;  %s2724_s28 = sphi %s2791_s28, %s3585_s28   ;;  %s2720_s27 = sphi %s2789_s27, %s3584_s27   ;;  %s2716_s26 = sphi %s2787_s26, %s3588_s26   ;;  %s2712_s25 = sphi %s2785_s25, %s3587_s25   ;;  %s2708_s24 = sphi %s2783_s24, %s3586_s24  }
   0xe   : > { %3548 = sst [smem:[#allocation19_spill]] %s2724_s28  ;;  %s2277_s8 = sadd.s32 4294967294, %s2728_s29  }
   0xf   : > { %3549 = sst [smem:[#allocation20_spill]] %s2728_s29  ;;  %p61_p0 = scmp.ne.s32.totalorder %s2712_s25, %s2708_s24 }
  0x10   : > { %p3534_p1 = scmp.eq.s32.totalorder %s2814_s30, 0  ;;  %p229_p3 = scmp.eq.s32.totalorder %s2277_s8, 1 }
  0x11   : > { %p2278_p5 = scmp.ge.s32.totalorder %s2728_s29, 1  ;;  %p236_p7 = scmp.lt.s32.totalorder %s2728_s29, 3 }
  0x12   : > { %p2823_p4 = por %p3534_p1, %p61_p0  ;;  %p2828_p6 = por %p229_p3, %p61_p0 }
  0x13   : > { %p2833_p8 = pnand %p2278_p5, %p236_p7  ;;  %s2730_s12 = smov [#allocation10]  }
  0x14   : > { %s3550_s9 = scalar_select %p2823_p4, 1, 0 }
  0x15   : > { %s3551_s10 = scalar_select %p2828_p6, 1, 0 }
  0x16   : > { %s3553_s11 = scalar_select %p2833_p8, 1, 0 }
  0x17   : > { %3552 = sst [smem:[#allocation21_spill]] %s3551_s10  ;;  %s248_s13 = sshll.u32 %s2730_s12, 4  ;;  %s249_s13 = int_to_ptr.vmem [resolvable:$true] %s248_s13 }
  0x18   : > { %p2399_p9 = pneg %p2833_p8  ;;  %s39_s15 = sadd.s32 1, %s2724_s28 }
  0x19   : > { %s2515_s16 = scalar_lea.vmem %s249_s13, 8192  ;;  %p2523_p5 = scmp.lt.s32.totalorder %s249_s13, %s249_s13 }
  0x1a   : > { %p2842_p11 = pnand %p2399_p9, %p3534_p1  ;;  %p2516_p13 = scmp.ne.s32.totalorder %s249_s13, %s2515_s16 }
  0x1b   : > { %p2524_p7 = scmp.lt.s32.totalorder %s2515_s16, %s2515_s16 }
  0x1c   : > { %p3535_p12 = pneg %p2842_p11 }
  0x1d   : > { %p2525_p2 = por %p2524_p7, %p2523_p5 }
  0x1e   : > { %p2518_p0 = pnand %p2516_p13, %p3535_p12 }
  0x20   : > { %p2519_p3 = pneg %p2518_p0 }
  0x22   : > { %p2526_p10 = pnand %p2525_p2, %p2519_p3 }
  0x24   : > { %2529 = shalt.err (!%p2526_p10)
}
  0x25   : > { %s3526_s17 = smov 256   ;;  %s3527_s18 = smov 16  }
  0x26   : > { %s3555_s3 = sld [smem:[#allocation27_spill]]  ;;  %p41_p2 = scmp.ge.s32.totalorder %s39_s15, 2 }
  0x27   : > { %s48_s21 = sadd.s32 1, %s2716_s26  ;;  %p55_p9 = scmp.ne.s32.totalorder %s2716_s26, %s2712_s25 }
  0x28   : > { %p56_p10 = scmp.eq.s32.totalorder %s2728_s29, 0  ;;  %s3590_s15 = smov (%p41_p2, %s39_s15), 0 }
  0x29   : > { %3556 = sst [smem:[#allocation22_spill]] %s3590_s15  ;;  %p3557_p0 = scmp.eq.s32.totalorder %s2814_s30, 1 }
  0x2a   : > { %p57_p13 = por %p56_p10, %p55_p9  ;;  %s43_s23 = ssub.s32 %s2724_s28, %s3590_s15 }
  0x2b   : > { %p2868_p3 = por %p3557_p0, %p55_p9  ;;  %p2422_p5 = scmp.lt.s32.totalorder %s2728_s29, 2 }
  0x2c   : > { %2402 = dma.hbm_to_vmem [thread:$0]  (!%p2842_p11), %s3555_s3, 8192, %s249_s13, [#allocation11], %s3526_s17, %s3526_s17, %s3527_s18  }
  0x2d   : > { %s3558_s22 = scalar_select %p2868_p3, 1, 0 }
  0x2e   : > { %p46_p7 = scmp.eq.s32.totalorder %s43_s23, 0  ;;  %s3528_s8 = sand.u32 1, %s2716_s26  }
  0x2f   : > { %s2878_s12 = sshll.u32 %s3528_s8, 4  ;;  %s2881_s13 = sshll.u32 %s2724_s28, 8 }
  0x30   : > { %s2884_s16 = scalar_select %p46_p7, %s2716_s26, %s48_s21  }
  0x31   : > { %p2886_p2 = pnand %p2422_p5, %p57_p13  ;;  %s302_s20 = sand.u32 1, %s2728_s29  }
  0x32   : > { %3559 = sst [smem:[#allocation23_spill]] %s2884_s16  ;;  %s306_s3 = scalar_lea.vmem [#allocation7], %s2878_s12 }
  0x33   : > { %s3561_s1 = sld [smem:[#allocation26_spill]]  ;;  %s314_s8 = sshll.u32 %s306_s3, 4  ;;  %s315_s8 = int_to_ptr.vmem [resolvable:$true] %s314_s8 }
  0x34   : > { %s2733_s15 = smov [#allocation12]   ;;  %s2896_s10 = scalar_lea.sflag [#allocation8], %s302_s20 }
  0x35   : > { %s264_s28 = sshll.u32 %s2733_s15, 4  ;;  %p3536_p9 = pneg %p2886_p2  ;;  %s265_s28 = int_to_ptr.vmem [resolvable:$true] %s264_s28 }
  0x36   : > { %s2543_s21 = scalar_lea.vmem %s315_s8, 256  ;;  %s2734_s16 = smov [#allocation7]  }
  0x37   : > { %p2544_p10 = scmp.ne.s32.totalorder %s315_s8, %s2543_s21  ;;  %s2548_s29 = sshll.u32 %s2734_s16, 4  ;;  %s2549_s29 = int_to_ptr.vmem [resolvable:$false] %s2548_s29 }
  0x38   : > { %s2550_s17 = scalar_lea.vmem %s2549_s29, 512  ;;  %p2551_p5 = scmp.lt.s32.totalorder %s315_s8, %s2549_s29 }
  0x39   : > { %s312_s23 = scalar_lea.hbm %s3561_s1, %s2881_s13  ;;  %p2546_p13 = pnand %p2544_p10, %p3536_p9 }
  0x3a   : > { %p2552_p7 = scmp.lt.s32.totalorder %s2550_s17, %s2543_s21 }
  0x3b   : > { %p2547_p0 = pneg %p2546_p13 }
  0x3c   : > { %p2553_p1 = por %p2552_p7, %p2551_p5 }
  0x3e   : > { %p2554_p12 = pnand %p2553_p1, %p2547_p0 }
  0x40   : > { %2557 = shalt.err (!%p2554_p12)
}
  0x41   : > { %2412 = dma.hbm_to_vmem [thread:$0]  (!%p2886_p2), %s312_s23, 256, %s315_s8, %s2896_s10  }
  0x42   : > { %s2569_s3 = scalar_lea.vmem %s265_s28, 8192  ;;  %p3562_p10 = pneg %p2842_p11 }
  0x43   : > { %p2570_p6 = scmp.ne.s32.totalorder %s265_s28, %s2569_s3  ;;  %p2577_p3 = scmp.lt.s32.totalorder %s265_s28, %s265_s28 }
  0x44   : > { %p2578_p4 = scmp.lt.s32.totalorder %s2569_s3, %s2569_s3 }
  0x45   : > { %p2572_p13 = pnand %p2570_p6, %p3562_p10 }
  0x46   : > { %p2579_p8 = por %p2578_p4, %p2577_p3 }
  0x47   : > { %p2573_p9 = pneg %p2572_p13 }
  0x49   : > { %p2580_p5 = pnand %p2579_p8, %p2573_p9 }
  0x4b   : > { %2583 = shalt.err (!%p2580_p5)
}
  0x4c   : > { %s3563_s29 = smov 16   ;;  %s3564_s15 = smov 256  }
  0x4d   : > { %2405 = dma.hbm_to_vmem [thread:$0]  (!%p2842_p11), %s3523_s5, 8192, %s265_s28, [#allocation11], %s3564_s15, %s3564_s15, %s3563_s29  }
  0x4e   : > { %s293_s23 = scalar_lea.hbm %s3518_s0, %s2881_s13  ;;  %s285_s21 = scalar_lea.vmem [#allocation4], %s2878_s12 }
  0x4f   : > { %s295_s17 = sshll.u32 %s285_s21, 4  ;;  %s331_s1 = scalar_lea.hbm %s3520_s2, %s2881_s13  ;;  %s296_s17 = int_to_ptr.vmem [resolvable:$true] %s295_s17 }
  0x50   : > { %s3565_s24 = sand.u32 1, %s2716_s26   ;;  %s2597_s18 = scalar_lea.vmem %s296_s17, 256 }
  0x51   : > { %s282_s7 = scalar_lea.sflag [#allocation5], %s3565_s24  ;;  %p2598_p1 = scmp.ne.s32.totalorder %s296_s17, %s2597_s18 }
  0x52   : > { %p3566_p4 = pneg %p2886_p2  ;;  %s2735_s28 = smov [#allocation4]  }
  0x53   : > { %s2602_s29 = sshll.u32 %s2735_s28, 4  ;;  %s2603_s29 = int_to_ptr.vmem [resolvable:$false] %s2602_s29 }
  0x54   : > { %p2600_p6 = pnand %p2598_p1, %p3566_p4  ;;  %s2604_s15 = scalar_lea.vmem %s2603_s29, 512 }
  0x55   : > { %p2605_p11 = scmp.lt.s32.totalorder %s296_s17, %s2603_s29  ;;  %p2606_p12 = scmp.lt.s32.totalorder %s2604_s15, %s2597_s18 }
  0x56   : > { %p2601_p8 = pneg %p2600_p6 }
  0x57   : > { %p2607_p3 = por %p2606_p12, %p2605_p11 }
  0x59   : > { %p2608_p9 = pnand %p2607_p3, %p2601_p8 }
  0x5b   : > { %2611 = shalt.err (!%p2608_p9)
}
  0x5c   : > { %2409 = dma.hbm_to_vmem [thread:$0]  (!%p2886_p2), %s293_s23, 256, %s296_s17, %s282_s7  }
  0x5d   : > { %s325_s24 = scalar_lea.vmem [#allocation9], %s2878_s12  ;;  %p3567_p7 = pmov %p3566_p4 }
  0x5e   : > { %s333_s16 = sshll.u32 %s325_s24, 4  ;;  %s2736_s20 = smov [#allocation9]   ;;  %s334_s16 = int_to_ptr.vmem [resolvable:$true] %s333_s16 }
  0x5f   : > { %s2625_s8 = scalar_lea.vmem %s334_s16, 256  ;;  %s2630_s21 = sshll.u32 %s2736_s20, 4  ;;  %s2631_s21 = int_to_ptr.vmem [resolvable:$false] %s2630_s21 }
  0x60   : > { %p2626_p0 = scmp.ne.s32.totalorder %s334_s16, %s2625_s8  ;;  %s2632_s14 = scalar_lea.vmem %s2631_s21, 512 }
  0x61   : > { %p2633_p5 = scmp.lt.s32.totalorder %s334_s16, %s2631_s21  ;;  %p2634_p1 = scmp.lt.s32.totalorder %s2632_s14, %s2625_s8 }
  0x62   : > { %p2628_p10 = pnand %p2626_p0, %p3567_p7 }
  0x63   : > { %p2635_p4 = por %p2634_p1, %p2633_p5 }
  0x64   : > { %p2629_p13 = pneg %p2628_p10 }
  0x66   : > { %p2636_p6 = pnand %p2635_p4, %p2629_p13 }
  0x68   : > { %2639 = shalt.err (!%p2636_p6)
}
  0x69   : > { %2415 = dma.hbm_to_vmem [thread:$0]  (!%p2886_p2), %s331_s1, 256, %s334_s16, %s2896_s10  }
  0x6a   : > { %p3568_p8 = scmp.ne.s32.totalorder %s3553_s11, 0 }
  0x6c   : > { %342 = sbr.rel (%p3568_p8) target bundleno = 1646 (0x66e), region = 48 }
  0x71   : > { %s2948_s23 = sand.u32 1, %s2712_s25   ;;  %p3569_p11 = scmp.ne.s32.totalorder %s3550_s9, 0 }
  0x72   : > { %s2951_s17 = sshll.u32 %s2948_s23, 4  ;;  %s345_s19 = scalar_lea.sflag [#allocation5], %s2948_s23 }
  0x73   : > { %s348_s3 = scalar_lea.vmem [#allocation4], %s2951_s17 }
  0x74   : > { %2691 = dma.done.wait (%p3569_p11), %s345_s19, 256  }
  0x75   : > { %2693 = vsyncadd (%p3569_p11), %s345_s19, 4294967040  ;;  %s353_s1 = sand.u32 1, %s2814_s30   ;;  %s357_s11 = scalar_lea.vmem [#allocation7], %s2951_s17 }
  0x76   : > { %s354_s10 = scalar_lea.sflag [#allocation8], %s353_s1 }
  0x77   : > { %2695 = dma.done.wait (%p3569_p11), %s354_s10, 512  }
  0x78   : > { %2697 = vsyncadd (%p3569_p11), %s354_s10, 4294966784  ;;  %s366_s13 = scalar_lea.vmem [#allocation9], %s2951_s17  ;;  %p3570_p2 = scmp.eq.s32.totalorder %s2814_s30, 0 }
  0x7a   : > { %2699 = dma.done.wait (%p3570_p2), [#allocation11], 16384   ;;  %p3571_p12 = pmov %p3570_p2 }
  0x7b   : > { %v2970_v0 = vld [vmem:[#allocation10 + $0xf8] sm:$0xff]  ;;  %v2972_v1 = vld [vmem:[#allocation10 + $0xf0] sm:$0xff]  ;;  %v2974_v2 = vld [vmem:[#allocation10 + $0xe8] sm:$0xff]  ;;  %s2737_s18 = smov 64   ;;  %vm2739_vm0 = vmmov 0   ;;  %vm785_vm1 = vcmask 523264  }
  0x7c   : > { %2701 = vsyncadd (%p3571_p12), [#allocation11], 4294950912  ;;  %497 = vmatprep.subr.mxu0 %v2970_v0  ;;  %v2977_v3 = vld [vmem:[#allocation10 + $0xe0] sm:$0xff]  ;;  %570 = vmatprep.subr.mxu1 %v2970_v0  ;;  %v2981_v4 = vld [vmem:[#allocation10 + $0xd8] sm:$0xff]  ;;  %vm1481_vm2 = vcmask 64512   ;;  %s2326_s15 = sshll.u32 %s2720_s27, 8 }
  0x7d   : > { %498 = vmatpush1.msra.mxu0 %v2972_v1  ;;  %571 = vmatpush1.msra.mxu1 %v2972_v1  ;;  %v2985_v5 = vld [vmem:[#allocation10 + $0xd0] sm:$0xff]  ;;  %v2989_v6 = vld [vmem:[#allocation10 + $0xc8] sm:$0xff]  ;;  %v2993_v7 = vld [vmem:[#allocation10 + $0xc0] sm:$0xff]  ;;  %s414_s24 = scalar_lea.vmem [#allocation13], %s2951_s17  ;;  %s3576_s21 = sld [smem:[#allocation28_spill]] }
  0x7e   : > { %499 = vmatprep.subr.mxu0 %v2974_v2  ;;  %572 = vmatprep.subr.mxu1 %v2974_v2  ;;  %v2997_v8 = vld [vmem:[#allocation10 + $0xb8] sm:$0xff]  ;;  %v3001_v9 = vld [vmem:[#allocation10 + $0xb0] sm:$0xff]  ;;  %v3005_v10 = vld [vmem:[#allocation10 + $0xa8] sm:$0xff]  ;;  %s2130_s16 = sshll.u32 %s414_s24, 4  ;;  %s2114_s7 = scalar_lea.sflag [#allocation6], %s2948_s23  ;;  %s2131_s16 = int_to_ptr.vmem [resolvable:$true] %s2130_s16 }
  0x7f   : > { %500 = vmatpush1.msra.mxu0 %v2977_v3  ;;  %573 = vmatpush1.msra.mxu1 %v2977_v3  ;;  %v3009_v11 = vld [vmem:[#allocation10 + $0xa0] sm:$0xff]  ;;  %v3013_v12 = vld [vmem:[#allocation10 + $0x98] sm:$0xff]  ;;  %v3017_v13 = vld [vmem:[#allocation10 + $0x90] sm:$0xff]  ;;  %s2640_s12 = scalar_lea.vmem %s2131_s16, 256  ;;  %p3577_p9 = scmp.ne.s32.totalorder %s3558_s22, 0 }
  0x80   : > { %501 = vmatprep.subr.mxu0 %v2981_v4  ;;  %574 = vmatprep.subr.mxu1 %v2981_v4  ;;  %v3021_v14 = vld [vmem:[#allocation10 + $0x88] sm:$0xff]  ;;  %v3025_v15 = vld [vmem:[#allocation10 + $0x80] sm:$0xff]  ;;  %v3029_v16 = vld [vmem:[#allocation10 + $0x78] sm:$0xff]  ;;  %p2641_p3 = scmp.ne.s32.totalorder %s2131_s16, %s2640_s12  ;;  %s2742_s19 = smov [#allocation13]  }
  0x81   : > { %502 = vmatpush1.msra.mxu0 %v2985_v5  ;;  %575 = vmatpush1.msra.mxu1 %v2985_v5  ;;  %v3033_v17 = vld [vmem:[#allocation10 + $0x70] sm:$0xff]  ;;  %v3037_v18 = vld [vmem:[#allocation10 + $0x68] sm:$0xff]  ;;  %v3041_v19 = vld [vmem:[#allocation10 + $0x60] sm:$0xff]  ;;  %s2644_s27 = sshll.u32 %s2742_s19, 4  ;;  %s2645_s27 = int_to_ptr.vmem [resolvable:$false] %s2644_s27 }
  0x82   : > { %503 = vmatprep.subr.mxu0 %v2989_v6  ;;  %576 = vmatprep.subr.mxu1 %v2989_v6  ;;  %v3045_v20 = vld [vmem:[#allocation10 + $0x58] sm:$0xff]  ;;  %v3049_v21 = vld [vmem:[#allocation10 + $0x50] sm:$0xff]  ;;  %v3053_v22 = vld [vmem:[#allocation10 + $0x48] sm:$0xff]  ;;  %p2642_p0 = pnand %p2641_p3, %p3577_p9  ;;  %s2646_s17 = scalar_lea.vmem %s2645_s27, 512 }
  0x83   : > { %504 = vmatpush1.msra.mxu0 %v2993_v7  ;;  %577 = vmatpush1.msra.mxu1 %v2993_v7  ;;  %v3057_v23 = vld [vmem:[#allocation10 + $0x40] sm:$0xff]  ;;  %v485_v24 = vld [vmem:[%s357_s11 + $0x8] sm:$0xff]  ;;  %v3066_v26 = vld [vmem:[#allocation10 + $0x30] sm:$0xff]  ;;  %s2128_s14 = scalar_lea.hbm %s3576_s21, %s2326_s15  ;;  %p2647_p10 = scmp.lt.s32.totalorder %s2131_s16, %s2645_s27 }
  0x84   : > { %505 = vmatprep.subr.mxu0 %v2997_v8  ;;  %578 = vmatprep.subr.mxu1 %v2997_v8  ;;  %v3063_v25 = vld [vmem:[#allocation10 + $0x38] sm:$0xff]  ;;  %v3070_v27 = vld [vmem:[#allocation10 + $0x28] sm:$0xff]  ;;  %v3074_v28 = vld [vmem:[#allocation10 + $0x20] sm:$0xff]  ;;  %p2643_p7 = pneg %p2642_p0  ;;  %p2648_p13 = scmp.lt.s32.totalorder %s2646_s17, %s2640_s12 }
  0x85   : > { %506 = vmatpush1.msra.mxu0 %v3001_v9  ;;  %579 = vmatpush1.msra.mxu1 %v3001_v9  ;;  %v3078_v29 = vld [vmem:[#allocation10 + $0x18] sm:$0xff]  ;;  %v3082_v30 = vld [vmem:[#allocation10 + $0x10] sm:$0xff]  ;;  %v3086_v31 = vld [vmem:[#allocation10 + $0x8] sm:$0xff] }
  0x86   : > { %507 = vmatprep.subr.mxu0 %v3005_v10  ;;  %580 = vmatprep.subr.mxu1 %v3005_v10  ;;  %v3090_v32 = vld [vmem:[#allocation10] sm:$0xff]  ;;  %v3094_v33 = vld [vmem:[#allocation10 + $0x1f8] sm:$0xff]  ;;  %v3098_v34 = vld [vmem:[#allocation10 + $0x1f0] sm:$0xff]  ;;  %p2649_p5 = por %p2648_p13, %p2647_p10 }
  0x87   : > { %508 = vmatpush1.msra.mxu0 %v3009_v11  ;;  %581 = vmatpush1.msra.mxu1 %v3009_v11  ;;  %v3102_v35 = vld [vmem:[#allocation10 + $0x1e8] sm:$0xff]  ;;  %v3106_v36 = vld [vmem:[#allocation10 + $0x1e0] sm:$0xff]  ;;  %v3110_v37 = vld [vmem:[#allocation10 + $0x1d8] sm:$0xff] }
  0x88   : > { %509 = vmatprep.subr.mxu0 %v3013_v12  ;;  %582 = vmatprep.subr.mxu1 %v3013_v12  ;;  %v3114_v38 = vld [vmem:[#allocation10 + $0x1d0] sm:$0xff]  ;;  %v3118_v39 = vld [vmem:[#allocation10 + $0x1c8] sm:$0xff]  ;;  %v3122_v40 = vld [vmem:[#allocation10 + $0x1c0] sm:$0xff]  ;;  %p2650_p1 = pnand %p2649_p5, %p2643_p7 }
  0x89   : > { %510 = vmatpush1.msra.mxu0 %v3017_v13  ;;  %583 = vmatpush1.msra.mxu1 %v3017_v13  ;;  %v3126_v41 = vld [vmem:[#allocation10 + $0x1b8] sm:$0xff]  ;;  %v3130_v42 = vld [vmem:[#allocation10 + $0x1b0] sm:$0xff]  ;;  %v3134_v43 = vld [vmem:[#allocation10 + $0x1a8] sm:$0xff] }
  0x8a   : > { %511 = vmatprep.subr.mxu0 %v3021_v14  ;;  %584 = vmatprep.subr.mxu1 %v3021_v14  ;;  %v3138_v44 = vld [vmem:[#allocation10 + $0x1a0] sm:$0xff]  ;;  %v3142_v45 = vld [vmem:[#allocation10 + $0x198] sm:$0xff]  ;;  %v3146_v46 = vld [vmem:[#allocation10 + $0x190] sm:$0xff] }
  0x8b   : > { %512 = vmatpush1.msra.mxu0 %v3025_v15  ;;  %585 = vmatpush1.msra.mxu1 %v3025_v15  ;;  %v3150_v47 = vld [vmem:[#allocation10 + $0x188] sm:$0xff]  ;;  %v3154_v48 = vld [vmem:[#allocation10 + $0x180] sm:$0xff]  ;;  %v3158_v49 = vld [vmem:[#allocation10 + $0x178] sm:$0xff] }
  0x8c   : > { %513 = vmatprep.subr.mxu0 %v3029_v16  ;;  %586 = vmatprep.subr.mxu1 %v3029_v16  ;;  %v3162_v50 = vld [vmem:[#allocation10 + $0x170] sm:$0xff]  ;;  %v3166_v51 = vld [vmem:[#allocation10 + $0x168] sm:$0xff]  ;;  %v3170_v52 = vld [vmem:[#allocation10 + $0x160] sm:$0xff] }
  0x8d   : > { %514 = vmatpush1.msra.mxu0 %v3033_v17  ;;  %587 = vmatpush1.msra.mxu1 %v3033_v17  ;;  %v3174_v53 = vld [vmem:[#allocation10 + $0x158] sm:$0xff]  ;;  %v3178_v54 = vld [vmem:[#allocation10 + $0x150] sm:$0xff]  ;;  %v3182_v55 = vld [vmem:[#allocation10 + $0x148] sm:$0xff] }
  0x8e   : > { %515 = vmatprep.subr.mxu0 %v3037_v18  ;;  %588 = vmatprep.subr.mxu1 %v3037_v18  ;;  %v3186_v56 = vld [vmem:[#allocation10 + $0x140] sm:$0xff]  ;;  %v3190_v57 = vld [vmem:[#allocation10 + $0x138] sm:$0xff]  ;;  %v3194_v58 = vld [vmem:[#allocation10 + $0x130] sm:$0xff] }
  0x8f   : > { %516 = vmatpush1.msra.mxu0 %v3041_v19  ;;  %589 = vmatpush1.msra.mxu1 %v3041_v19  ;;  %3572 = vst [vmem:[#allocation24_spill] sm:$0xff] %v3190_v57  ;;  %3573 = vst [vmem:[#allocation25_spill] sm:$0xff] %v3194_v58  ;;  %v3198_v59 = vld [vmem:[#allocation10 + $0x128] sm:$0xff]  ;;  %v3202_v60 = vld [vmem:[#allocation10 + $0x120] sm:$0xff] }
  0x90   : > { %517 = vmatprep.subr.mxu0 %v3045_v20  ;;  %590 = vmatprep.subr.mxu1 %v3045_v20  ;;  %v3206_v61 = vld [vmem:[#allocation10 + $0x118] sm:$0xff]  ;;  %v3210_v62 = vld [vmem:[#allocation10 + $0x110] sm:$0xff]  ;;  %v3214_v63 = vld [vmem:[#allocation10 + $0x108] sm:$0xff] }
  0x91   : > { %518 = vmatpush1.msra.mxu0 %v3049_v21  ;;  %561 = vmatprep.mubr.f32.mxu0 %v485_v24  ;;  %v3218_v24 = vld [vmem:[#allocation10 + $0x100] sm:$0xff] }
  0x92   : > { %519 = vmatprep.subr.mxu0 %v3053_v22  ;;  %591 = vmatpush1.msra.mxu1 %v3049_v21 }
  0x93   : > { %520 = vmatpush1.msra.mxu0 %v3057_v23  ;;  %592 = vmatprep.subr.mxu1 %v3053_v22 }
  0x94   : > { %521 = vmatprep.subr.mxu0 %v3063_v25  ;;  %593 = vmatpush1.msra.mxu1 %v3057_v23 }
  0x95   : > { %522 = vmatpush1.msra.mxu0 %v3066_v26  ;;  %594 = vmatprep.subr.mxu1 %v3063_v25 }
  0x96   : > { %523 = vmatprep.subr.mxu0 %v3070_v27  ;;  %595 = vmatpush1.msra.mxu1 %v3066_v26 }
  0x97   : > { %524 = vmatpush1.msra.mxu0 %v3074_v28  ;;  %596 = vmatprep.subr.mxu1 %v3070_v27 }
  0x98   : > { %525 = vmatprep.subr.mxu0 %v3078_v29  ;;  %597 = vmatpush1.msra.mxu1 %v3074_v28 }
  0x99   : > { %526 = vmatpush1.msra.mxu0 %v3082_v30  ;;  %598 = vmatprep.subr.mxu1 %v3078_v29 }
  0x9a   : > { %527 = vmatprep.subr.mxu0 %v3086_v31  ;;  %599 = vmatpush1.msra.mxu1 %v3082_v30 }
  0x9b   : > { %528 = vmatpush1.msra.mxu0 %v3090_v32  ;;  %600 = vmatprep.subr.mxu1 %v3086_v31 }
  0x9c   : > { %529 = vmatprep.subr.mxu0 %v3094_v33  ;;  %601 = vmatpush1.msra.mxu1 %v3090_v32 }
  0x9d   : > { %530 = vmatpush2.msra.mxu0 %v3098_v34  ;;  %602 = vmatprep.subr.mxu1 %v3094_v33 }
  0x9e   : > { %531 = vmatprep.subr.mxu0 %v3102_v35  ;;  %603 = vmatpush2.msra.mxu1 %v3098_v34 }
  0x9f   : > { %532 = vmatpush2.msra.mxu0 %v3106_v36  ;;  %604 = vmatprep.subr.mxu1 %v3102_v35 }
  0xa0   : > { %533 = vmatprep.subr.mxu0 %v3110_v37  ;;  %605 = vmatpush2.msra.mxu1 %v3106_v36 }
  0xa1   : > { %534 = vmatpush2.msra.mxu0 %v3114_v38  ;;  %606 = vmatprep.subr.mxu1 %v3110_v37 }
  0xa2   : > { %535 = vmatprep.subr.mxu0 %v3118_v39  ;;  %607 = vmatpush2.msra.mxu1 %v3114_v38 }
  0xa3   : > { %536 = vmatpush2.msra.mxu0 %v3122_v40  ;;  %608 = vmatprep.subr.mxu1 %v3118_v39 }
  0xa4   : > { %537 = vmatprep.subr.mxu0 %v3126_v41  ;;  %609 = vmatpush2.msra.mxu1 %v3122_v40 }
  0xa5   : > { %538 = vmatpush2.msra.mxu0 %v3130_v42  ;;  %610 = vmatprep.subr.mxu1 %v3126_v41 }
  0xa6   : > { %539 = vmatprep.subr.mxu0 %v3134_v43  ;;  %611 = vmatpush2.msra.mxu1 %v3130_v42 }
  0xa7   : > { %540 = vmatpush2.msra.mxu0 %v3138_v44  ;;  %612 = vmatprep.subr.mxu1 %v3134_v43 }
  0xa8   : > { %541 = vmatprep.subr.mxu0 %v3142_v45  ;;  %613 = vmatpush2.msra.mxu1 %v3138_v44 }
  0xa9   : > { %542 = vmatpush2.msra.mxu0 %v3146_v46  ;;  %614 = vmatprep.subr.mxu1 %v3142_v45 }
  0xaa   : > { %543 = vmatprep.subr.mxu0 %v3150_v47  ;;  %615 = vmatpush2.msra.mxu1 %v3146_v46 }
  0xab   : > { %544 = vmatpush2.msra.mxu0 %v3154_v48  ;;  %616 = vmatprep.subr.mxu1 %v3150_v47 }
  0xac   : > { %545 = vmatprep.subr.mxu0 %v3158_v49  ;;  %617 = vmatpush2.msra.mxu1 %v3154_v48 }
  0xad   : > { %546 = vmatpush2.msra.mxu0 %v3162_v50  ;;  %618 = vmatprep.subr.mxu1 %v3158_v49 }
  0xae   : > { %547 = vmatprep.subr.mxu0 %v3166_v51  ;;  %619 = vmatpush2.msra.mxu1 %v3162_v50 }
  0xaf   : > { %548 = vmatpush2.msra.mxu0 %v3170_v52  ;;  %620 = vmatprep.subr.mxu1 %v3166_v51 }
  0xb0   : > { %549 = vmatprep.subr.mxu0 %v3174_v53  ;;  %621 = vmatpush2.msra.mxu1 %v3170_v52 }
  0xb1   : > { %550 = vmatpush2.msra.mxu0 %v3178_v54  ;;  %622 = vmatprep.subr.mxu1 %v3174_v53 }
  0xb2   : > { %551 = vmatprep.subr.mxu0 %v3182_v55  ;;  %623 = vmatpush2.msra.mxu1 %v3178_v54 }
  0xb3   : > { %552 = vmatpush2.msra.mxu0 %v3186_v56  ;;  %624 = vmatprep.subr.mxu1 %v3182_v55 }
  0xb4   : > { %553 = vmatprep.subr.mxu0 %v3190_v57  ;;  %625 = vmatpush2.msra.mxu1 %v3186_v56 }
  0xb5   : > { %554 = vmatpush2.msra.mxu0 %v3194_v58  ;;  %626 = vmatprep.subr.mxu1 %v3190_v57  ;;  %v484_v57 = vld [vmem:[%s357_s11] sm:$0xff] }
  0xb6   : > { %555 = vmatprep.subr.mxu0 %v3198_v59  ;;  %627 = vmatpush2.msra.mxu1 %v3194_v58  ;;  %v939_v58 = vld [vmem:[%s348_s3 + $0x8] sm:$0xff] }
  0xb7   : > { %556 = vmatpush2.msra.mxu0 %v3202_v60  ;;  %628 = vmatprep.subr.mxu1 %v3198_v59 }
  0xb8   : > { %557 = vmatprep.subr.mxu0 %v3206_v61  ;;  %629 = vmatpush2.msra.mxu1 %v3202_v60 }
  0xb9   : > { %558 = vmatpush2.msra.mxu0 %v3210_v62  ;;  %630 = vmatprep.subr.mxu1 %v3206_v61 }
  0xba   : > { %559 = vmatprep.subr.mxu0 %v3214_v63  ;;  %631 = vmatpush2.msra.mxu1 %v3210_v62 }
  0xbb   : > { %560 = vmatpush2.msra.mxu0 %v3218_v24  ;;  %632 = vmatprep.subr.mxu1 %v3214_v63 }
  0xbc   : > { %562 = vmatmul.mubr.f32.vlgmr.msra.gmra.mxu0 %v484_v57  ;;  %951 = vmatprep.subr.mxu0 %v2970_v0  ;;  %v3574_v0 = vld [vmem:[#allocation24_spill] sm:$0xff] }
  0xbd   : > { %952 = vmatpush1.msra.mxu0 %v2972_v1  ;;  %1015 = vmatprep.mubr.f32.mxu0 %v939_v58  ;;  %v3575_v1 = vld [vmem:[#allocation25_spill] sm:$0xff] }
  0xbe   : > { %953 = vmatprep.subr.mxu0 %v2974_v2  ;;  %633 = vmatpush2.msra.mxu1 %v3218_v24  ;;  %v938_v2 = vld [vmem:[%s348_s3] sm:$0xff] }
  0xbf   : > { %954 = vmatpush1.msra.mxu0 %v2977_v3  ;;  %v487_v3 = vlaneseq }
  0xc0   : > { %955 = vmatprep.subr.mxu0 %v2981_v4 }
  0xc1   : > { %956 = vmatpush1.msra.mxu0 %v2985_v5  ;;  %v3298_v4 = vshrl.u32 %v487_v3, 7 }
  0xc2   : > { %957 = vmatprep.subr.mxu0 %v2989_v6  ;;  %v479_v6 = vld [vmem:[%s3522_s4] sm:$0x3] }
  0xc3   : > { %958 = vmatpush1.msra.mxu0 %v2993_v7  ;;  %v489_v5 = vsub.s32 0, %v3298_v4  ;;  %v493_v7 = vsub.s32 1, %v3298_v4 }
  0xc4   : > { %959 = vmatprep.subr.mxu0 %v2997_v8 }
  0xc5   : > { %960 = vmatpush1.msra.mxu0 %v3001_v9  ;;  %v3307_v8 = vrot.slane %v479_v6, %v489_v5  ;;  %v3311_v9 = vrot.slane %v479_v6, %v493_v7 }
  0xc6   : > { %961 = vmatprep.subr.mxu0 %v3005_v10 }
  0xc7   : > { %962 = vmatpush1.msra.mxu0 %v3009_v11 }
  0xc8   : > { %963 = vmatprep.subr.mxu0 %v3013_v12 }
  0xc9   : > { %964 = vmatpush1.msra.mxu0 %v3017_v13 }
  0xca   : > { %965 = vmatprep.subr.mxu0 %v3021_v14 }
  0xcb   : > { %966 = vmatpush1.msra.mxu0 %v3025_v15 }
  0xcc   : > { %967 = vmatprep.subr.mxu0 %v3029_v16  ;;  %v2738_v16 = vmov 0.0  }
  0xcd   : > { %968 = vmatpush1.msra.mxu0 %v3033_v17  ;;  %2363 = vmatprep.subr.mxu1 %v2738_v16 }
  0xce   : > { %969 = vmatprep.subr.mxu0 %v3037_v18 }
  0xcf   : > { %970 = vmatpush1.msra.mxu0 %v3041_v19 }
  0xd0   : > { %971 = vmatprep.subr.mxu0 %v3045_v20 }
  0xd1   : > { %972 = vmatpush1.msra.mxu0 %v3049_v21 }
  0xd2   : > { %973 = vmatprep.subr.mxu0 %v3053_v22 }
  0xd3   : > { %974 = vmatpush1.msra.mxu0 %v3057_v23 }
  0xd4   : > { %975 = vmatprep.subr.mxu0 %v3063_v25 }
  0xd5   : > { %976 = vmatpush1.msra.mxu0 %v3066_v26  ;;  %v569_v26 = vld [vmem:[%s366_s13 + $0x8] sm:$0xff] }
  0xd6   : > { %977 = vmatprep.subr.mxu0 %v3070_v27  ;;  %v568_v27 = vld [vmem:[%s366_s13] sm:$0xff]  ;;  %634 = vmatprep.mubr.f32.mxu1 %v569_v26 }
  0xd7   : > { %978 = vmatpush1.msra.mxu0 %v3074_v28  ;;  %635 = vmatmul.mubr.f32.vlgmr.msra.gmra.mxu1 %v568_v27  ;;  %v2740_v28 = vmov 1983009808  }
  0xd8   : > { %979 = vmatprep.subr.mxu0 %v3078_v29  ;;  %2365 = vmatprep.mubr.msk.f32.mxu1 %vm2739_vm0, %v2738_v16  ;;  %v652_v29 = vunpack.c.l.s4 %v2740_v28 }
  0xd9   : > { %980 = vmatpush1.msra.mxu0 %v3082_v30  ;;  %v2741_v30 = vmov 1934713408  }
  0xda   : > { %981 = vmatprep.subr.mxu0 %v3086_v31  ;;  %v684_v31 = vunpack.c.l.s4 %v2741_v30 }
  0xdb   : > { %982 = vmatpush1.msra.mxu0 %v3090_v32  ;;  %v653_v32 = vunpack.c.0.s8 %v652_v29 }
  0xdc   : > { %983 = vmatprep.subr.mxu0 %v3094_v33 }
  0xdd   : > { %984 = vmatpush2.msra.mxu0 %v3098_v34  ;;  %v685_v34 = vunpack.c.0.s8 %v684_v31 }
  0xde   : > { %985 = vmatprep.subr.mxu0 %v3102_v35  ;;  %v3342_v35 = vsub.s32 %v653_v32, %v3298_v4 }
  0xdf   : > { %986 = vmatpush2.msra.mxu0 %v3106_v36 }
  0xe0   : > { %987 = vmatprep.subr.mxu0 %v3110_v37 }
  0xe1   : > { %988 = vmatpush2.msra.mxu0 %v3114_v38 }
  0xe2   : > { %989 = vmatprep.subr.mxu0 %v3118_v39  ;;  %v3345_v39 = vsub.s32 %v685_v34, %v3298_v4 }
  0xe3   : > { %990 = vmatpush2.msra.mxu0 %v3122_v40 }
  0xe4   : > { %991 = vmatprep.subr.mxu0 %v3126_v41 }
  0xe5   : > { %992 = vmatpush2.msra.mxu0 %v3130_v42 }
  0xe6   : > { %993 = vmatprep.subr.mxu0 %v3134_v43 }
  0xe7   : > { %994 = vmatpush2.msra.mxu0 %v3138_v44 }
  0xe8   : > { %995 = vmatprep.subr.mxu0 %v3142_v45 }
  0xe9   : > { %996 = vmatpush2.msra.mxu0 %v3146_v46 }
  0xea   : > { %997 = vmatprep.subr.mxu0 %v3150_v47 }
  0xeb   : > { %998 = vmatpush2.msra.mxu0 %v3154_v48 }
  0xec   : > { %999 = vmatprep.subr.mxu0 %v3158_v49 }
  0xed   : > { %1000 = vmatpush2.msra.mxu0 %v3162_v50 }
  0xee   : > { %1001 = vmatprep.subr.mxu0 %v3166_v51 }
  0xef   : > { %1002 = vmatpush2.msra.mxu0 %v3170_v52 }
  0xf0   : > { %1003 = vmatprep.subr.mxu0 %v3174_v53 }
  0xf1   : > { %1004 = vmatpush2.msra.mxu0 %v3178_v54 }
  0xf2   : > { %1005 = vmatprep.subr.mxu0 %v3182_v55 }
  0xf3   : > { %1006 = vmatpush2.msra.mxu0 %v3186_v56 }
  0xf4   : > { %1007 = vmatprep.subr.mxu0 %v3574_v0 }
  0xf5   : > { %1008 = vmatpush2.msra.mxu0 %v3575_v1 }
  0xf6   : > { %1009 = vmatprep.subr.mxu0 %v3198_v59 }
  0xf7   : > { %1010 = vmatpush2.msra.mxu0 %v3202_v60 }
  0xf8   : > { %1011 = vmatprep.subr.mxu0 %v3206_v61 }
  0xf9   : > { %1012 = vmatpush2.msra.mxu0 %v3210_v62 }
  0xfa   : > { %1013 = vmatprep.subr.mxu0 %v3214_v63 }
  0xfb   : > { %1014 = vmatpush2.msra.mxu0 %v3218_v24 }
  0xfc   : > { %1016 = vmatmul.mubr.f32.vlgmr.msra.gmra.mxu0 %v938_v2  ;;  %2343 = vmatprep.subr.mxu0 %v2738_v16 }
  0xfd   : > { %2345 = vmatprep.mubr.msk.f32.mxu0 %vm2739_vm0, %v2738_v16 }
 0x17c   : > { %v563_v10 = vpop.f32.mrf.mxu0 }
 0x17d   : > { %v564_v11 = vadd.f32 %v563_v10, %v3307_v8 }
 0x17e   : > { %v565_v12 = vpop.f32.mrf.mxu0 }
 0x17f   : > { %v566_v13 = vadd.f32 %v565_v12, %v3311_v9  ;;  %642 = vrot.lane.b32.xlu0 %v564_v11, %s2737_s18 }
 0x181   : > { %v649_v14 = vcombine.low %v564_v11, %v566_v13  ;;  %v650_v15 = vcombine.high %v564_v11, %v566_v13 }
 0x183   : > { %646 = vrot.lane.b32.xlu0 %v566_v13, %s2737_s18  ;;  %v657_v40 = vrot.slane %v649_v14, %v3342_v35  ;;  %v664_v41 = vrot.slane %v650_v15, %v3342_v35 }
 0x1bc   : > { %v1017_v17 = vpop.f32.mrf.mxu0 }
 0x1bd   : > { %v1018_v18 = vadd.f32 %v1017_v17, %v3307_v8 }
 0x1be   : > { %v1019_v19 = vpop.f32.mrf.mxu0 }
 0x1bf   : > { %v3320_v20 = vmul.f32 0.125, %v1018_v18  ;;  %v1020_v21 = vadd.f32 %v1019_v19, %v3311_v9 }
 0x1c1   : > { %v3323_v22 = vmul.f32 0.125, %v1020_v21  ;;  %1025 = vrot.lane.b32.xlu1 %v3320_v20, %s2737_s18 }
 0x1c3   : > { %v1032_v23 = vcombine.low %v3320_v20, %v3323_v22  ;;  %v1033_v25 = vcombine.high %v3320_v20, %v3323_v22 }
 0x1c5   : > { %1029 = vrot.lane.b32.xlu1 %v3323_v22, %s2737_s18  ;;  %v1040_v18 = vrot.slane %v1032_v23, %v3342_v35  ;;  %v1047_v19 = vrot.slane %v1033_v25, %v3342_v35 }
 0x1f1   : > { %v643_v33 = vpop.permute.xlu0 %642 }
 0x1f5   : > { %v647_v36 = vpop.permute.xlu0 %646 }
 0x1f6   : > { %v665_v37 = vcombine.low %v643_v33, %v647_v36  ;;  %v666_v38 = vcombine.high %v643_v33, %v647_v36 }
 0x1f8   : > { %v673_v42 = vrot.slane %v665_v37, %v3342_v35  ;;  %v680_v43 = vrot.slane %v666_v38, %v3342_v35 }
 0x1fa   : > { %v681_v44 = vcombine.low %v657_v40, %v673_v42  ;;  %v682_v45 = vcombine.high %v657_v40, %v673_v42  ;;  %v697_v46 = vcombine.low %v664_v41, %v680_v43  ;;  %v698_v47 = vcombine.high %v664_v41, %v680_v43 }
 0x1fc   : > { %v689_v48 = vrot.slane %v681_v44, %v3345_v39  ;;  %v696_v49 = vrot.slane %v682_v45, %v3345_v39  ;;  %v705_v50 = vrot.slane %v697_v46, %v3345_v39  ;;  %v712_v51 = vrot.slane %v698_v47, %v3345_v39 }
 0x1fe   : > { %v717_v52 = vcombine.low %v689_v48, %v696_v49  ;;  %v2298_v53 = vcombine.high %v689_v48, %v696_v49  ;;  %v733_v54 = vcombine.low %v705_v50, %v712_v51  ;;  %v2299_v55 = vcombine.high %v705_v50, %v712_v51 }
 0x200   : > { %v724_v56 = vrot.slane %v717_v52, %v3342_v35  ;;  %v732_v57 = vrot.slane %v2298_v53, %v3342_v35  ;;  %v740_v58 = vrot.slane %v733_v54, %v3342_v35  ;;  %v748_v59 = vrot.slane %v2299_v55, %v3342_v35 }
 0x202   : > { %v749_v60 = vcombine.low %v724_v56, %v732_v57  ;;  %v750_v61 = vcombine.high %v724_v56, %v732_v57  ;;  %v765_v62 = vcombine.low %v740_v58, %v748_v59  ;;  %v766_v63 = vcombine.high %v740_v58, %v748_v59 }
 0x204   : > { %v757_v24 = vrot.slane %v749_v60, %v3345_v39  ;;  %v764_v0 = vrot.slane %v750_v61, %v3345_v39  ;;  %v773_v1 = vrot.slane %v765_v62, %v3345_v39  ;;  %v780_v2 = vrot.slane %v766_v63, %v3345_v39 }
 0x206   : > { %v781_v3 = vcombine.low %v757_v24, %v773_v1  ;;  %v782_v6 = vcombine.high %v757_v24, %v773_v1  ;;  %v783_v10 = vcombine.low %v764_v0, %v780_v2  ;;  %v784_v11 = vcombine.high %v764_v0, %v780_v2  ;;  %v636_v1 = vpop.f32.mrf.mxu1 }
 0x208   : > { %786 = vst.msk [vmem:[#allocation2] sm:$0xff] %vm785_vm1, %v781_v3  ;;  %787 = vst.msk [vmem:[#allocation2 + $0x8] sm:$0xff] %vm785_vm1, %v782_v6  ;;  %v638_v6 = vpop.f32.mrf.mxu1 }
 0x209   : > { %788 = vst.msk [vmem:[#allocation2 + $0x10] sm:$0xff] %vm785_vm1, %v783_v10  ;;  %789 = vst.msk [vmem:[#allocation2 + $0x18] sm:$0xff] %vm785_vm1, %v784_v11  ;;  %v639_v10 = vadd.f32 %v638_v6, %v3311_v9  ;;  %v637_v11 = vadd.f32 %v636_v1, %v3307_v8 }
 0x20f   : > { %v1168_v12 = vld [vmem:[#allocation2] sm:$0xff]  ;;  %v1169_v53 = vld [vmem:[#allocation2 + $0x8] sm:$0xff] }
 0x210   : > { %2344 = vmatpush3.xpose.msk.msra.mxu0 %vm785_vm1, %v1168_v12  ;;  %v1170_v54 = vld [vmem:[#allocation2 + $0x10] sm:$0xff]  ;;  %v1171_v55 = vld [vmem:[#allocation2 + $0x18] sm:$0xff] }
 0x211   : > { %2348 = vmatprep.subr.mxu0 %v2738_v16 }
 0x233   : > { %v1026_v13 = vpop.permute.xlu1 %1025 }
 0x237   : > { %v1030_v14 = vpop.permute.xlu1 %1029 }
 0x238   : > { %v1048_v15 = vcombine.low %v1026_v13, %v1030_v14  ;;  %v1049_v17 = vcombine.high %v1026_v13, %v1030_v14 }
 0x23a   : > { %v1056_v21 = vrot.slane %v1048_v15, %v3342_v35  ;;  %v1063_v26 = vrot.slane %v1049_v17, %v3342_v35 }
 0x23c   : > { %v1064_v27 = vcombine.low %v1040_v18, %v1056_v21  ;;  %v1065_v28 = vcombine.high %v1040_v18, %v1056_v21  ;;  %v1080_v29 = vcombine.low %v1047_v19, %v1063_v26  ;;  %v1081_v30 = vcombine.high %v1047_v19, %v1063_v26 }
 0x23e   : > { %v1072_v31 = vrot.slane %v1064_v27, %v3345_v39  ;;  %v1079_v32 = vrot.slane %v1065_v28, %v3345_v39  ;;  %v1088_v33 = vrot.slane %v1080_v29, %v3345_v39  ;;  %v1095_v23 = vrot.slane %v1081_v30, %v3345_v39 }
 0x23f   : > { %v798_v28 = vcombine.low %v637_v11, %v639_v10  ;;  %v799_v30 = vcombine.high %v637_v11, %v639_v10 }
 0x240   : > { %v1100_v34 = vcombine.low %v1072_v31, %v1079_v32  ;;  %v2302_v36 = vcombine.high %v1072_v31, %v1079_v32  ;;  %v1116_v20 = vcombine.low %v1088_v33, %v1095_v23  ;;  %v2303_v22 = vcombine.high %v1088_v33, %v1095_v23 }
 0x242   : > { %v1107_v25 = vrot.slane %v1100_v34, %v3342_v35  ;;  %v1115_v37 = vrot.slane %v2302_v36, %v3342_v35  ;;  %v1123_v38 = vrot.slane %v1116_v20, %v3342_v35  ;;  %v1131_v40 = vrot.slane %v2303_v22, %v3342_v35 }
 0x243   : > { %v806_v34 = vrot.slane %v798_v28, %v3342_v35  ;;  %v813_v36 = vrot.slane %v799_v30, %v3342_v35 }
 0x244   : > { %v1132_v41 = vcombine.low %v1107_v25, %v1115_v37  ;;  %v1133_v42 = vcombine.high %v1107_v25, %v1115_v37  ;;  %v1148_v43 = vcombine.low %v1123_v38, %v1131_v40  ;;  %v1149_v44 = vcombine.high %v1123_v38, %v1131_v40 }
 0x246   : > { %v1140_v45 = vrot.slane %v1132_v41, %v3345_v39  ;;  %v1156_v46 = vrot.slane %v1148_v43, %v3345_v39  ;;  %v1147_v47 = vrot.slane %v1133_v42, %v3345_v39  ;;  %v1163_v48 = vrot.slane %v1149_v44, %v3345_v39 }
 0x248   : > { %v1164_v49 = vcombine.low %v1140_v45, %v1156_v46  ;;  %v1165_v50 = vcombine.high %v1140_v45, %v1156_v46  ;;  %v1166_v51 = vcombine.low %v1147_v47, %v1163_v48  ;;  %v1167_v52 = vcombine.high %v1147_v47, %v1163_v48 }
 0x24a   : > { %2346 = vmatmul.mubr.msk.f32.vlgmr.msra.gmra.mxu0 %vm785_vm1, %v1164_v49 }
 0x24b   : > { %2349 = vmatpush3.xpose.msk.msra.mxu0 %vm785_vm1, %v1169_v53  ;;  %2350 = vmatprep.mubr.msk.f32.mxu0 %vm2739_vm0, %v2738_v16 }
 0x24c   : > { %2353 = vmatprep.subr.mxu0 %v2738_v16 }
 0x24e   : > { %2351 = vmatmul.mubr.msk.f32.vlgmr.msra.gmra.mxu0 %vm785_vm1, %v1165_v50 }
 0x24f   : > { %2354 = vmatpush3.xpose.msk.msra.mxu0 %vm785_vm1, %v1170_v54  ;;  %2355 = vmatprep.mubr.msk.f32.mxu0 %vm2739_vm0, %v2738_v16 }
 0x250   : > { %2358 = vmatprep.subr.mxu0 %v2738_v16 }
 0x252   : > { %2356 = vmatmul.mubr.msk.f32.vlgmr.msra.gmra.mxu0 %vm785_vm1, %v1166_v51 }
 0x253   : > { %2359 = vmatpush3.xpose.msk.msra.mxu0 %vm785_vm1, %v1171_v55  ;;  %2360 = vmatprep.mubr.msk.f32.mxu0 %vm2739_vm0, %v2738_v16 }
 0x256   : > { %2361 = vmatmul.mubr.msk.f32.vlgmr.msra.gmra.mxu0 %vm785_vm1, %v1167_v52 }
 0x30a   : > { %v1249_v56 = vpop.f32.mrf.mxu0 }
 0x30b   : > { %v1482_v57 = vsel %vm1481_vm2, %v1249_v56, -inf }
 0x30c   : > { %1483 = vmax.xlane.f32.xlu0 %v1482_v57  ;;  %v2347_v58 = vpop.f32.mrf.mxu0 }
 0x30e   : > { %v1325_v59 = vpop.f32.mrf.mxu0 }
 0x30f   : > { %v1485_v60 = vsel %vm1481_vm2, %v1325_v59, -inf }
 0x310   : > { %1486 = vmax.xlane.f32.xlu1 %v1485_v60  ;;  %v2352_v61 = vpop.f32.mrf.mxu0 }
 0x312   : > { %v1401_v62 = vpop.f32.mrf.mxu0 }
 0x313   : > { %v1488_v63 = vsel %vm1481_vm2, %v1401_v62, -inf }
 0x314   : > { %1489 = vmax.xlane.f32.xlu0 %v1488_v63  ;;  %v2357_v24 = vpop.f32.mrf.mxu0 }
 0x316   : > { %v1477_v0 = vpop.f32.mrf.mxu0 }
 0x317   : > { %v1491_v2 = vsel %vm1481_vm2, %v1477_v0, -inf }
 0x318   : > { %1492 = vmax.xlane.f32.xlu0 %v1491_v2  ;;  %v2362_v3 = vpop.f32.mrf.mxu0 }
 0x321   : > { %795 = vrot.lane.b32.xlu1 %v639_v10, %s2737_s18 }
 0x32e   : > { %791 = vrot.lane.b32.xlu0 %v637_v11, %s2737_s18 }
 0x395   : > { %v1484_v12 = vpop.xlane.xlu0 %1483 }
 0x396   : > { %v1494_v13 = vsub.f32 %v1249_v56, %v1484_v12 }
 0x398   : > { %v1498_v14 = vmul.f32 1.442695, %v1494_v13 }
 0x399   : > { %v1487_v15 = vpop.xlane.xlu1 %1486 }
 0x39a   : > { %2488 = vpow2.f32 %v1498_v14  ;;  %v1495_v17 = vsub.f32 %v1325_v59, %v1487_v15 }
 0x39c   : > { %v1500_v18 = vmul.f32 1.442695, %v1495_v17 }
 0x39d   : > { %v1490_v19 = vpop.xlane.xlu0 %1489  ;;  %v796_v29 = vpop.permute.xlu1 %795 }
 0x39e   : > { %2490 = vpow2.f32 %v1500_v18  ;;  %v1496_v21 = vsub.f32 %v1401_v62, %v1490_v19 }
 0x3a0   : > { %v1502_v26 = vmul.f32 1.442695, %v1496_v21 }
 0x3a1   : > { %v1493_v27 = vpop.xlane.xlu0 %1492 }
 0x3a2   : > { %2492 = vpow2.f32 %v1502_v26  ;;  %v1497_v9 = vsub.f32 %v1477_v0, %v1493_v27 }
 0x3a4   : > { %v1504_v8 = vmul.f32 1.442695, %v1497_v9 }
 0x3a5   : > { %v792_v31 = vpop.permute.xlu0 %791 }
 0x3a6   : > { %2494 = vpow2.f32 %v1504_v8  ;;  %v814_v32 = vcombine.low %v792_v31, %v796_v29  ;;  %v815_v33 = vcombine.high %v792_v31, %v796_v29 }
 0x3a7   : > { %v2489_v23 = vpop.eup %2488 }
 0x3a8   : > { %v822_v20 = vrot.slane %v814_v32, %v3342_v35  ;;  %v829_v22 = vrot.slane %v815_v33, %v3342_v35  ;;  %v1506_v25 = vsel %vm1481_vm2, %v2489_v23, 0.0  ;;  %v1995_v32 = vld [vmem:[#allocation12 + $0xf8] sm:$0xff]  ;;  %v1994_v33 = vld [vmem:[#allocation12 + $0xf0] sm:$0xff] }
 0x3a9   : > { %1507 = vadd.xlane.f32.xlu1 %v1506_v25  ;;  %v1988_v25 = vld [vmem:[#allocation12 + $0xc0] sm:$0xff] }
 0x3aa   : > { %v830_v37 = vcombine.low %v806_v34, %v822_v20  ;;  %v831_v38 = vcombine.high %v806_v34, %v822_v20  ;;  %v846_v40 = vcombine.low %v813_v36, %v829_v22  ;;  %v847_v41 = vcombine.high %v813_v36, %v829_v22  ;;  %v1992_v34 = vld [vmem:[#allocation12 + $0xe0] sm:$0xff]  ;;  %v1991_v36 = vld [vmem:[#allocation12 + $0xd8] sm:$0xff]  ;;  %v1990_v20 = vld [vmem:[#allocation12 + $0xd0] sm:$0xff] }
 0x3ab   : > { %v2491_v42 = vpop.eup %2490  ;;  %v1989_v22 = vld [vmem:[#allocation12 + $0xc8] sm:$0xff] }
 0x3ac   : > { %v838_v43 = vrot.slane %v830_v37, %v3345_v39  ;;  %v845_v44 = vrot.slane %v831_v38, %v3345_v39  ;;  %v854_v45 = vrot.slane %v846_v40, %v3345_v39  ;;  %v861_v46 = vrot.slane %v847_v41, %v3345_v39  ;;  %v1987_v37 = vld [vmem:[#allocation12 + $0xb8] sm:$0xff]  ;;  %v1985_v38 = vld [vmem:[#allocation12 + $0xa8] sm:$0xff]  ;;  %v1984_v40 = vld [vmem:[#allocation12 + $0xa0] sm:$0xff] }
 0x3ad   : > { %v1509_v47 = vsel %vm1481_vm2, %v2491_v42, 0.0  ;;  %v1983_v41 = vld [vmem:[#allocation12 + $0x98] sm:$0xff] }
 0x3ae   : > { %v866_v48 = vcombine.low %v838_v43, %v845_v44  ;;  %v2300_v49 = vcombine.high %v838_v43, %v845_v44  ;;  %v882_v50 = vcombine.low %v854_v45, %v861_v46  ;;  %v2301_v51 = vcombine.high %v854_v45, %v861_v46  ;;  %1510 = vadd.xlane.f32.xlu1 %v1509_v47  ;;  %v1981_v43 = vld [vmem:[#allocation12 + $0x88] sm:$0xff]  ;;  %v1980_v44 = vld [vmem:[#allocation12 + $0x80] sm:$0xff]  ;;  %v1979_v45 = vld [vmem:[#allocation12 + $0x78] sm:$0xff] }
 0x3af   : > { %v2493_v52 = vpop.eup %2492  ;;  %v1978_v46 = vld [vmem:[#allocation12 + $0x70] sm:$0xff]  ;;  %v1977_v47 = vld [vmem:[#allocation12 + $0x68] sm:$0xff] }
 0x3b0   : > { %v873_v53 = vrot.slane %v866_v48, %v3342_v35  ;;  %v881_v54 = vrot.slane %v2300_v49, %v3342_v35  ;;  %v889_v55 = vrot.slane %v882_v50, %v3342_v35  ;;  %v897_v56 = vrot.slane %v2301_v51, %v3342_v35  ;;  %v1976_v48 = vld [vmem:[#allocation12 + $0x60] sm:$0xff]  ;;  %v1975_v49 = vld [vmem:[#allocation12 + $0x58] sm:$0xff]  ;;  %v1974_v50 = vld [vmem:[#allocation12 + $0x50] sm:$0xff] }
 0x3b1   : > { %v1512_v57 = vsel %vm1481_vm2, %v2493_v52, 0.0  ;;  %v1973_v51 = vld [vmem:[#allocation12 + $0x48] sm:$0xff] }
 0x3b2   : > { %v898_v58 = vcombine.low %v873_v53, %v881_v54  ;;  %v899_v59 = vcombine.high %v873_v53, %v881_v54  ;;  %v914_v60 = vcombine.low %v889_v55, %v897_v56  ;;  %v915_v61 = vcombine.high %v889_v55, %v897_v56  ;;  %1513 = vadd.xlane.f32.xlu0 %v1512_v57  ;;  %v1971_v53 = vld [vmem:[#allocation12 + $0x38] sm:$0xff]  ;;  %v1970_v54 = vld [vmem:[#allocation12 + $0x30] sm:$0xff]  ;;  %v1969_v55 = vld [vmem:[#allocation12 + $0x28] sm:$0xff] }
 0x3b3   : > { %v2495_v62 = vpop.eup %2494  ;;  %v1968_v56 = vld [vmem:[#allocation12 + $0x20] sm:$0xff]  ;;  %v1967_v57 = vld [vmem:[#allocation12 + $0x18] sm:$0xff] }
 0x3b4   : > { %v906_v63 = vrot.slane %v898_v58, %v3345_v39  ;;  %v913_v24 = vrot.slane %v899_v59, %v3345_v39  ;;  %v922_v0 = vrot.slane %v914_v60, %v3345_v39  ;;  %v929_v1 = vrot.slane %v915_v61, %v3345_v39  ;;  %v1966_v58 = vld [vmem:[#allocation12 + $0x10] sm:$0xff]  ;;  %v1965_v59 = vld [vmem:[#allocation12 + $0x8] sm:$0xff]  ;;  %v1964_v60 = vld [vmem:[#allocation12] sm:$0xff] }
 0x3b5   : > { %v1515_v2 = vsel %vm1481_vm2, %v2495_v62, 0.0  ;;  %v2027_v61 = vld [vmem:[#allocation12 + $0x1f8] sm:$0xff] }
 0x3b6   : > { %v930_v3 = vcombine.low %v906_v63, %v922_v0  ;;  %v931_v6 = vcombine.high %v906_v63, %v922_v0  ;;  %v932_v10 = vcombine.low %v913_v24, %v929_v1  ;;  %v933_v11 = vcombine.high %v913_v24, %v929_v1  ;;  %1516 = vadd.xlane.f32.xlu0 %v1515_v2  ;;  %v2025_v63 = vld [vmem:[#allocation12 + $0x1e8] sm:$0xff]  ;;  %v2024_v24 = vld [vmem:[#allocation12 + $0x1e0] sm:$0xff]  ;;  %v2023_v0 = vld [vmem:[#allocation12 + $0x1d8] sm:$0xff] }
 0x3b7   : > { %v2022_v1 = vld [vmem:[#allocation12 + $0x1d0] sm:$0xff]  ;;  %v2021_v2 = vld [vmem:[#allocation12 + $0x1c8] sm:$0xff] }
 0x3b8   : > { %934 = vst.msk [vmem:[#allocation3] sm:$0xff] %vm785_vm1, %v930_v3  ;;  %935 = vst.msk [vmem:[#allocation3 + $0x8] sm:$0xff] %vm785_vm1, %v931_v6  ;;  %v2020_v3 = vld [vmem:[#allocation12 + $0x1c0] sm:$0xff]  ;;  %v2019_v6 = vld [vmem:[#allocation12 + $0x1b8] sm:$0xff] }
 0x3b9   : > { %936 = vst.msk [vmem:[#allocation3 + $0x10] sm:$0xff] %vm785_vm1, %v932_v10  ;;  %937 = vst.msk [vmem:[#allocation3 + $0x18] sm:$0xff] %vm785_vm1, %v933_v11  ;;  %v2018_v10 = vld [vmem:[#allocation12 + $0x1b0] sm:$0xff]  ;;  %v2017_v11 = vld [vmem:[#allocation12 + $0x1a8] sm:$0xff] }
 0x3bf   : > { %v1172_v12 = vld [vmem:[#allocation3] sm:$0xff]  ;;  %v1173_v21 = vld [vmem:[#allocation3 + $0x8] sm:$0xff] }
 0x3c0   : > { %2364 = vmatpush3.msra.mxu1 %v1172_v12  ;;  %v1174_v9 = vld [vmem:[#allocation3 + $0x10] sm:$0xff]  ;;  %v1175_v30 = vld [vmem:[#allocation3 + $0x18] sm:$0xff]  ;;  %v2016_v12 = vld [vmem:[#allocation12 + $0x1a0] sm:$0xff] }
 0x3c1   : > { %2368 = vmatprep.subr.mxu1 %v2738_v16 }
 0x432   : > { %v1508_v13 = vpop.xlane.xlu1 %1507 }
 0x433   : > { %2496 = vrcp.f32 %v1508_v13  ;;  %v2015_v13 = vld [vmem:[#allocation12 + $0x198] sm:$0xff] }
 0x437   : > { %v1511_v14 = vpop.xlane.xlu1 %1510 }
 0x438   : > { %2498 = vrcp.f32 %v1511_v14  ;;  %v2014_v14 = vld [vmem:[#allocation12 + $0x190] sm:$0xff] }
 0x43b   : > { %v1514_v15 = vpop.xlane.xlu0 %1513 }
 0x43c   : > { %2500 = vrcp.f32 %v1514_v15  ;;  %v2013_v15 = vld [vmem:[#allocation12 + $0x188] sm:$0xff] }
 0x43f   : > { %v1517_v17 = vpop.xlane.xlu0 %1516 }
 0x440   : > { %v2497_v18 = vpop.eup %2496  ;;  %2502 = vrcp.f32 %v1517_v17  ;;  %v2012_v17 = vld [vmem:[#allocation12 + $0x180] sm:$0xff] }
 0x441   : > { %v1522_v19 = vmul.f32 %v2497_v18, %v2489_v23  ;;  %v1993_v23 = vld [vmem:[#allocation12 + $0xe8] sm:$0xff]  ;;  %v2011_v18 = vld [vmem:[#allocation12 + $0x178] sm:$0xff] }
 0x443   : > { %2366 = vmatmul.mubr.msk.f32.vlgmr.msra.gmra.mxu1 %vm1481_vm2, %v1522_v19  ;;  %v2010_v19 = vld [vmem:[#allocation12 + $0x170] sm:$0xff] }
 0x444   : > { %2369 = vmatpush3.msra.mxu1 %v1173_v21  ;;  %2370 = vmatprep.mubr.msk.f32.mxu1 %vm2739_vm0, %v2738_v16  ;;  %v2009_v21 = vld [vmem:[#allocation12 + $0x168] sm:$0xff] }
 0x445   : > { %v2499_v26 = vpop.eup %2498  ;;  %2373 = vmatprep.subr.mxu1 %v2738_v16 }
 0x446   : > { %v1523_v27 = vmul.f32 %v2499_v26, %v2491_v42  ;;  %v1982_v42 = vld [vmem:[#allocation12 + $0x90] sm:$0xff]  ;;  %v2008_v26 = vld [vmem:[#allocation12 + $0x160] sm:$0xff] }
 0x448   : > { %2371 = vmatmul.mubr.msk.f32.vlgmr.msra.gmra.mxu1 %vm1481_vm2, %v1523_v27  ;;  %v2007_v27 = vld [vmem:[#allocation12 + $0x158] sm:$0xff] }
 0x449   : > { %v2501_v28 = vpop.eup %2500  ;;  %2374 = vmatpush3.msra.mxu1 %v1174_v9  ;;  %2375 = vmatprep.mubr.msk.f32.mxu1 %vm2739_vm0, %v2738_v16  ;;  %v2006_v9 = vld [vmem:[#allocation12 + $0x150] sm:$0xff] }
 0x44a   : > { %2378 = vmatprep.subr.mxu1 %v2738_v16  ;;  %v1524_v29 = vmul.f32 %v2501_v28, %v2493_v52  ;;  %v1972_v52 = vld [vmem:[#allocation12 + $0x40] sm:$0xff]  ;;  %v2005_v28 = vld [vmem:[#allocation12 + $0x148] sm:$0xff] }
 0x44c   : > { %2376 = vmatmul.mubr.msk.f32.vlgmr.msra.gmra.mxu1 %vm1481_vm2, %v1524_v29  ;;  %v2004_v29 = vld [vmem:[#allocation12 + $0x140] sm:$0xff] }
 0x44d   : > { %v2503_v8 = vpop.eup %2502  ;;  %2379 = vmatpush3.msra.mxu1 %v1175_v30  ;;  %2380 = vmatprep.mubr.msk.f32.mxu1 %vm2739_vm0, %v2738_v16  ;;  %v1986_v16 = vld [vmem:[#allocation12 + $0xb0] sm:$0xff]  ;;  %v2003_v30 = vld [vmem:[#allocation12 + $0x138] sm:$0xff] }
 0x44e   : > { %v1525_v31 = vmul.f32 %v2503_v8, %v2495_v62  ;;  %2040 = vmatprep.subr.mxu1 %v1995_v32  ;;  %v2026_v62 = vld [vmem:[#allocation12 + $0x1f0] sm:$0xff]  ;;  %v2000_v32 = vld [vmem:[#allocation12 + $0x120] sm:$0xff] }
 0x44f   : > { %v2002_v8 = vld [vmem:[#allocation12 + $0x130] sm:$0xff] }
 0x450   : > { %2381 = vmatmul.mubr.msk.f32.vlgmr.msra.gmra.mxu1 %vm1481_vm2, %v1525_v31  ;;  %v2001_v31 = vld [vmem:[#allocation12 + $0x128] sm:$0xff] }
 0x451   : > { %2041 = vmatpush1.msra.mxu1 %v1994_v33 }
 0x452   : > { %2042 = vmatprep.subr.mxu1 %v1993_v23 }
 0x453   : > { %2043 = vmatpush1.msra.mxu1 %v1992_v34 }
 0x454   : > { %2044 = vmatprep.subr.mxu1 %v1991_v36 }
 0x455   : > { %2045 = vmatpush1.msra.mxu1 %v1990_v20 }
 0x456   : > { %2046 = vmatprep.subr.mxu1 %v1989_v22 }
 0x457   : > { %2047 = vmatpush1.msra.mxu1 %v1988_v25 }
 0x458   : > { %2048 = vmatprep.subr.mxu1 %v1987_v37 }
 0x459   : > { %2049 = vmatpush1.msra.mxu1 %v1986_v16 }
 0x45a   : > { %2050 = vmatprep.subr.mxu1 %v1985_v38 }
 0x45b   : > { %2051 = vmatpush1.msra.mxu1 %v1984_v40 }
 0x45c   : > { %2052 = vmatprep.subr.mxu1 %v1983_v41 }
 0x45d   : > { %2053 = vmatpush1.msra.mxu1 %v1982_v42 }
 0x45e   : > { %2054 = vmatprep.subr.mxu1 %v1981_v43 }
 0x45f   : > { %2055 = vmatpush1.msra.mxu1 %v1980_v44 }
 0x460   : > { %2056 = vmatprep.subr.mxu1 %v1979_v45 }
 0x461   : > { %2057 = vmatpush1.msra.mxu1 %v1978_v46 }
 0x462   : > { %2058 = vmatprep.subr.mxu1 %v1977_v47 }
 0x463   : > { %2059 = vmatpush1.msra.mxu1 %v1976_v48 }
 0x464   : > { %2060 = vmatprep.subr.mxu1 %v1975_v49 }
 0x465   : > { %2061 = vmatpush1.msra.mxu1 %v1974_v50 }
 0x466   : > { %2062 = vmatprep.subr.mxu1 %v1973_v51 }
 0x467   : > { %2063 = vmatpush1.msra.mxu1 %v1972_v52 }
 0x468   : > { %2064 = vmatprep.subr.mxu1 %v1971_v53 }
 0x469   : > { %2065 = vmatpush1.msra.mxu1 %v1970_v54  ;;  %v1999_v54 = vld [vmem:[#allocation12 + $0x118] sm:$0xff] }
 0x46a   : > { %2066 = vmatprep.subr.mxu1 %v1969_v55  ;;  %v1998_v55 = vld [vmem:[#allocation12 + $0x110] sm:$0xff] }
 0x46b   : > { %2067 = vmatpush1.msra.mxu1 %v1968_v56  ;;  %v1997_v56 = vld [vmem:[#allocation12 + $0x108] sm:$0xff] }
 0x46c   : > { %2068 = vmatprep.subr.mxu1 %v1967_v57 }
 0x46d   : > { %2069 = vmatpush1.msra.mxu1 %v1966_v58 }
 0x46e   : > { %2070 = vmatprep.subr.mxu1 %v1965_v59 }
 0x46f   : > { %2071 = vmatpush1.msra.mxu1 %v1964_v60 }
 0x470   : > { %2072 = vmatprep.subr.mxu1 %v2027_v61  ;;  %v1996_v61 = vld [vmem:[#allocation12 + $0x100] sm:$0xff] }
 0x471   : > { %2073 = vmatpush2.msra.mxu1 %v2026_v62 }
 0x472   : > { %2074 = vmatprep.subr.mxu1 %v2025_v63 }
 0x473   : > { %2075 = vmatpush2.msra.mxu1 %v2024_v24 }
 0x474   : > { %2076 = vmatprep.subr.mxu1 %v2023_v0 }
 0x475   : > { %2077 = vmatpush2.msra.mxu1 %v2022_v1 }
 0x476   : > { %2078 = vmatprep.subr.mxu1 %v2021_v2 }
 0x477   : > { %2079 = vmatpush2.msra.mxu1 %v2020_v3 }
 0x478   : > { %2080 = vmatprep.subr.mxu1 %v2019_v6 }
 0x479   : > { %2081 = vmatpush2.msra.mxu1 %v2018_v10 }
 0x47a   : > { %2082 = vmatprep.subr.mxu1 %v2017_v11 }
 0x47b   : > { %2083 = vmatpush2.msra.mxu1 %v2016_v12 }
 0x47c   : > { %2084 = vmatprep.subr.mxu1 %v2015_v13 }
 0x47d   : > { %2085 = vmatpush2.msra.mxu1 %v2014_v14 }
 0x47e   : > { %2086 = vmatprep.subr.mxu1 %v2013_v15 }
 0x47f   : > { %2087 = vmatpush2.msra.mxu1 %v2012_v17 }
 0x480   : > { %2088 = vmatprep.subr.mxu1 %v2011_v18 }
 0x481   : > { %2089 = vmatpush2.msra.mxu1 %v2010_v19 }
 0x482   : > { %2090 = vmatprep.subr.mxu1 %v2009_v21 }
 0x483   : > { %2091 = vmatpush2.msra.mxu1 %v2008_v26 }
 0x484   : > { %2092 = vmatprep.subr.mxu1 %v2007_v27 }
 0x485   : > { %2093 = vmatpush2.msra.mxu1 %v2006_v9 }
 0x486   : > { %2094 = vmatprep.subr.mxu1 %v2005_v28 }
 0x487   : > { %2095 = vmatpush2.msra.mxu1 %v2004_v29 }
 0x488   : > { %2096 = vmatprep.subr.mxu1 %v2003_v30 }
 0x489   : > { %2097 = vmatpush2.msra.mxu1 %v2002_v8 }
 0x48a   : > { %2098 = vmatprep.subr.mxu1 %v2001_v31 }
 0x48b   : > { %2099 = vmatpush2.msra.mxu1 %v2000_v32 }
 0x48c   : > { %2100 = vmatprep.subr.mxu1 %v1999_v54 }
 0x48d   : > { %2101 = vmatpush2.msra.mxu1 %v1998_v55 }
 0x48e   : > { %2102 = vmatprep.subr.mxu1 %v1997_v56 }
 0x48f   : > { %2103 = vmatpush2.msra.mxu1 %v1996_v61 }
 0x503   : > { %v1595_v33 = vpop.f32.mrf.mxu1 }
 0x505   : > { %v2367_v23 = vpop.f32.mrf.mxu1 }
 0x508   : > { %v1668_v34 = vpop.f32.mrf.mxu1 }
 0x50a   : > { %v2372_v36 = vpop.f32.mrf.mxu1 }
 0x50c   : > { %v1741_v20 = vpop.f32.mrf.mxu1 }
 0x50d   : > { %v1818_v25 = vcombine.low %v1595_v33, %v1741_v20  ;;  %v1819_v37 = vcombine.high %v1595_v33, %v1741_v20 }
 0x50e   : > { %v2377_v22 = vpop.f32.mrf.mxu1 }
 0x50f   : > { %v1826_v42 = vrot.slane %v1818_v25, %v3342_v35  ;;  %v1833_v43 = vrot.slane %v1819_v37, %v3342_v35 }
 0x510   : > { %v1814_v16 = vpop.f32.mrf.mxu1 }
 0x511   : > { %v1834_v38 = vcombine.low %v1668_v34, %v1814_v16  ;;  %v1835_v40 = vcombine.high %v1668_v34, %v1814_v16 }
 0x512   : > { %v2382_v41 = vpop.f32.mrf.mxu1 }
 0x513   : > { %v1842_v44 = vrot.slane %v1834_v38, %v3342_v35  ;;  %v1849_v45 = vrot.slane %v1835_v40, %v3342_v35 }
 0x515   : > { %v1850_v46 = vcombine.low %v1826_v42, %v1842_v44  ;;  %v1851_v47 = vcombine.high %v1826_v42, %v1842_v44  ;;  %v1866_v48 = vcombine.low %v1833_v43, %v1849_v45  ;;  %v1867_v49 = vcombine.high %v1833_v43, %v1849_v45 }
 0x517   : > { %v1858_v50 = vrot.slane %v1850_v46, %v3345_v39  ;;  %v1865_v51 = vrot.slane %v1851_v47, %v3345_v39  ;;  %v1874_v52 = vrot.slane %v1866_v48, %v3345_v39  ;;  %v1881_v53 = vrot.slane %v1867_v49, %v3345_v39 }
 0x519   : > { %v1886_v57 = vcombine.low %v1858_v50, %v1865_v51  ;;  %v2316_v58 = vcombine.high %v1858_v50, %v1865_v51  ;;  %v1902_v59 = vcombine.low %v1874_v52, %v1881_v53  ;;  %v2317_v60 = vcombine.high %v1874_v52, %v1881_v53 }
 0x51b   : > { %v1893_v62 = vrot.slane %v1886_v57, %v3342_v35  ;;  %v1901_v63 = vrot.slane %v2316_v58, %v3342_v35  ;;  %v1909_v24 = vrot.slane %v1902_v59, %v3342_v35  ;;  %v1917_v0 = vrot.slane %v2317_v60, %v3342_v35 }
 0x51d   : > { %v1918_v1 = vcombine.low %v1893_v62, %v1901_v63  ;;  %v1919_v2 = vcombine.high %v1893_v62, %v1901_v63  ;;  %v1934_v3 = vcombine.low %v1909_v24, %v1917_v0  ;;  %v1935_v6 = vcombine.high %v1909_v24, %v1917_v0 }
 0x51f   : > { %v1926_v10 = vrot.slane %v1918_v1, %v3345_v39  ;;  %v1933_v11 = vrot.slane %v1919_v2, %v3345_v39  ;;  %v1942_v12 = vrot.slane %v1934_v3, %v3345_v39  ;;  %v1949_v13 = vrot.slane %v1935_v6, %v3345_v39  ;;  %v2028_v39 = vld [vmem:[%s3524_s6] sm:$0x3] }
 0x520   : > { %v2033_v28 = vrot.slane %v2028_v39, %v489_v5  ;;  %v2037_v29 = vrot.slane %v2028_v39, %v493_v7 }
 0x521   : > { %v1951_v14 = vcombine.high %v1926_v10, %v1942_v12  ;;  %v1953_v15 = vcombine.high %v1933_v11, %v1949_v13  ;;  %v1952_v17 = vcombine.low %v1933_v11, %v1949_v13  ;;  %v1950_v35 = vcombine.low %v1926_v10, %v1942_v12 }
 0x523   : > { %v2483_v18 = vpack.i.bf16 %v1951_v14, %v1953_v15 }
 0x525   : > { %2484 = vrot.lane.b32.xlu1 %v2483_v18, %s2737_s18 }
 0x597   : > { %v2485_v19 = vpop.permute.xlu1 %2484 }
 0x598   : > { %v2487_v21 = vunpack.i.h.bf16 %v2485_v19  ;;  %v2486_v26 = vunpack.i.l.bf16 %v2485_v19 }
 0x59a   : > { %v1963_v27 = vsel %vm785_vm1, %v1952_v17, %v2486_v26  ;;  %v1962_v9 = vsel %vm785_vm1, %v1950_v35, %v2487_v21 }
 0x59b   : > { %2104 = vmatprep.mubr.f32.mxu1 %v1963_v27 }
 0x59c   : > { %2105 = vmatmul.mubr.f32.vlgmr.msra.gmra.mxu1 %v1962_v9 }
 0x65c   : > { %v2106_v30 = vpop.f32.mrf.mxu1 }
 0x65d   : > { %v2107_v8 = vadd.f32 %v2106_v30, %v2033_v28 }
 0x65e   : > { %v2108_v31 = vpop.f32.mrf.mxu1 }
 0x65f   : > { %2111 = vst [vmem:[%s414_s24] sm:$0xff] %v2107_v8  ;;  %v2109_v32 = vadd.f32 %v2108_v31, %v2037_v29 }
 0x661   : > { %2112 = vst [vmem:[%s414_s24 + $0x8] sm:$0xff] %v2109_v32 }
 0x662   : > { %2653 = shalt.err (!%p2650_p1)
}
 0x663   : > { %s2654_s3 = scalar_lea.hbm %s2128_s14, 256  ;;  %s2658_s10 = scalar_lea.hbm %s3576_s21, 512 }
 0x664   : > { %p2655_p4 = scmp.ne.s32.totalorder %s2128_s14, %s2654_s3  ;;  %p2659_p11 = scmp.lt.s32.totalorder %s2128_s14, %s3576_s21 }
 0x665   : > { %p2660_p2 = scmp.lt.s32.totalorder %s2658_s10, %s2654_s3 }
 0x666   : > { %p2656_p6 = pnand %p2655_p4, %p3577_p9 }
 0x667   : > { %p2661_p12 = por %p2660_p2, %p2659_p11 }
 0x668   : > { %p2657_p8 = pneg %p2656_p6 }
 0x66a   : > { %p2662_p3 = pnand %p2661_p12, %p2657_p8 }
 0x66c   : > { %2665 = shalt.err (!%p2662_p3)
}
 0x66d   : > { %2397 = dma.vmem_to_hbm [thread:$0]  (%p3577_p9), %s2131_s16, 256, %s2128_s14, %s2114_s7  }
 0x66e PF: > { %s3578_s30 = sld [smem:[#allocation18_spill]] }
 0x66f   : > { %s3579_s9 = sld [smem:[#allocation21_spill]] }
 0x670   : > { %s3580_s18 = sld [smem:[#allocation20_spill]] }
 0x674   : > { %s2142_s28 = sand.u32 1, %s3578_s30  }
 0x675   : > { %p3581_p0 = scmp.ne.s32.totalorder %s3579_s9, 0  ;;  %s2143_s29 = scalar_lea.sflag [#allocation6], %s2142_s28 }
 0x676   : > { %p3582_p7 = scmp.ge.s32.totalorder %s3580_s18, 2 }
 0x678   : > { %p2417_p10 = pnand %p3582_p7, %p3581_p0 }
 0x67a   : > { %p2418_p13 = pneg %p2417_p10 }
 0x67c   : > { %2703 = dma.done.wait (%p2418_p13), %s2143_s29, 256  }
 0x67d   : > { %2705 = vsyncadd (%p2418_p13), %s2143_s29, 4294967040  ;;  %s27_s29 = sadd.s32 1, %s3580_s18   ;;  %s3583_s15 = sld [smem:[#allocation23_spill]] }
 0x67e   : > { %p24_p5 = scmp.ge.s32.totalorder %s27_s29, 4   ;;  %s3584_s27 = sld [smem:[#allocation19_spill]] }
 0x67f   : > { %s3585_s28 = sld [smem:[#allocation22_spill]]  ;;  %s3586_s24 = smov %s2712_s25 }
 0x680   : > { %s3587_s25 = smov %s2716_s26  ;;  %26 = sbr.rel (!%p24_p5) target bundleno = 13 (0xd), region = 129 }
 0x683   : > { %s3588_s26 = smov %s3583_s15 }
 0x685   :  { %2148 = vsyncpa [#allocation5], 1 }
 0x686   :  { %2150 = vsyncpa [#allocation5 + $0x1], 1 }
 0x687   :  { %2151 = vsyncpa [#allocation8], 1 }
 0x688   :  { %2153 = vsyncpa [#allocation8 + $0x1], 1 }
 0x689   :  { %2154 = vsyncpa [#allocation11], 1 }
 0x68a   :  { %2155 = vsyncpa [#allocation6], 1 }
 0x68b   :  { %2157 = vsyncpa [#allocation6 + $0x1], 1 }

</bundles_post_ra>
